<compile_context>
chip_gen: v6e
topology: v6e:2x2x1
jax: 0.10.0
libtpu: 0.0.40
codegen_flags: <defaults>
</compile_context>

<pallas_src>
import functools

import jax
import jax.numpy as jnp
from jax.experimental import pallas as pl
from jax.experimental.pallas import tpu as pltpu


# ----------------------------------------------------------------------------
# Shared math helpers
# ----------------------------------------------------------------------------
def _layernorm(x, w, b, eps=1e-5):
    mu = jnp.mean(x, axis=-1, keepdims=True)
    var = jnp.mean(jnp.square(x - mu), axis=-1, keepdims=True)
    return (x - mu) * jax.lax.rsqrt(var + eps) * w + b


# ----------------------------------------------------------------------------
# Pallas kernel: one grid step processes a whole batch block.
# ----------------------------------------------------------------------------
def _slot_attention_kernel(iterations, n, k_slots, d, bblk,
                           x_ref, slots0_ref, wkv_ref, wq_ref, wgru_ref,
                           wff_ref, vec_ref, slots_out_ref, att_out_ref):
    f32 = jnp.float32
    bf16 = jnp.bfloat16
    m = bblk * k_slots

    # ---- Hoisted, loop-invariant parameter loads. ----
    wkv = wkv_ref[...]        # (D, 2D)  bf16 fused K|V projection
    wq = wq_ref[...]          # (D, D)   bf16 q projection (softmax scale folded)
    wgru = wgru_ref[...]      # (2D, 4D) bf16 block-packed GRU gate weights
    wff = wff_ref[...]        # (D, D)   bf16

    ln_w, ln_b = vec_ref[0:1, :], vec_ref[1:2, :]
    bk, bv = vec_ref[6:7, :], vec_ref[7:8, :]
    bq = vec_ref[8:9, :]
    # Rows used inside the unrolled loop: pre-broadcast to (m, D) once.
    ln1_w = jnp.broadcast_to(vec_ref[2:3, :], (m, d))
    ln1_b = jnp.broadcast_to(vec_ref[3:4, :], (m, d))
    ln2_w = jnp.broadcast_to(vec_ref[4:5, :], (m, d))
    ln2_b = jnp.broadcast_to(vec_ref[5:6, :], (m, d))
    b_r = jnp.broadcast_to(vec_ref[9:10, :], (m, d))     # b_ir + b_hr
    b_z = jnp.broadcast_to(vec_ref[10:11, :], (m, d))    # b_iz + b_hz
    b_in = jnp.broadcast_to(vec_ref[11:12, :], (m, d))   # b_in
    b_hn = jnp.broadcast_to(vec_ref[12:13, :], (m, d))   # b_hn
    bff = jnp.broadcast_to(vec_ref[13:14, :], (m, d))

    # ---- Pre-loop: input LayerNorm + fused K|V projection (one matmul). ----
    x = x_ref[...].reshape(bblk * n, d).astype(f32)             # (B*N, D)
    xn = _layernorm(x, ln_w, ln_b)
    kv = jnp.dot(xn.astype(bf16), wkv, preferred_element_type=f32)   # (B*N, 2D)
    k_out = (kv[:, 0:d] + bk).reshape(bblk, n, d)               # (B, N, D) f32
    v_bf = (kv[:, d:2 * d] + bv).reshape(bblk, n, d).astype(bf16)

    k_bf = k_out.astype(bf16)
    # Hoisted attention RHS: wqk[b] = Wq_s @ k[b]^T  -> (B, D, N)
    #                        bqk[b] = bq_s @ k[b]^T  -> (B, 1, N)
    # Per-iteration logits then need no extra matmul and no k relayout.
    wq_b = jnp.broadcast_to(wq[None, :, :], (bblk, d, d))
    wqk = jnp.einsum('bed,bnd->ben', wq_b, k_bf,
                     preferred_element_type=f32).astype(bf16)    # (B, D, N)
    bq_b = jnp.broadcast_to(bq.astype(bf16)[None, :, :], (bblk, 1, d))
    bqk = jnp.einsum('brd,bnd->brn', bq_b, k_bf,
                     preferred_element_type=f32)                 # (B, 1, N)
    bqk = jnp.broadcast_to(bqk, (bblk, k_slots, n))

    slots = slots0_ref[...].reshape(m, d).astype(f32)            # (B*K, D)
    att_t = jnp.zeros((bblk, k_slots, n), f32)

    for _ in range(iterations):                 # static unroll (iterations = 3)
        slot_prev = slots
        s_n = _layernorm(slots, ln1_w, ln1_b)
        s_nb = s_n.reshape(bblk, k_slots, d).astype(bf16)

        # logits[b, j, i] = <q_scaled[b, j], k[b, i]>        -> (B, K, N)
        logits = jnp.einsum('bke,ben->bkn', s_nb, wqk,
                            preferred_element_type=f32) + bqk
        # softmax over slots (axis=1) == torch softmax(dim=2) on the (B,N,K) view
        logits = logits - jnp.max(logits, axis=1, keepdims=True)
        e = jnp.exp(logits)
        att_t = e * pl.reciprocal(jnp.sum(e, axis=1, keepdims=True),
                                  approx=True) + 1e-8
        # renormalize over the N inputs (torch dim=1); exact division here.
        att_n = att_t / jnp.sum(att_t, axis=2, keepdims=True)

        # updates[b, j] = sum_i att_n[b, j, i] * v[b, i]      -> (B, K, D)
        updates = jnp.einsum('bkn,bnd->bkd', att_n.astype(bf16), v_bf,
                             preferred_element_type=f32).reshape(m, d)

        # Fused GRUCell: ONE (m, 2D) x (2D, 4D) matmul ->
        #   columns [gi_r+gh_r | gi_z+gh_z | gi_n | gh_n]
        uh = jnp.concatenate([updates, slot_prev], axis=-1).astype(bf16)
        g = jnp.dot(uh, wgru, preferred_element_type=f32)        # (m, 4D)
        r = jax.nn.sigmoid(g[:, 0:d] + b_r)
        z = jax.nn.sigmoid(g[:, d:2 * d] + b_z)
        n_cand = jnp.tanh(g[:, 2 * d:3 * d] + b_in +
                          r * (g[:, 3 * d:4 * d] + b_hn))
        slots = (1.0 - z) * n_cand + z * slot_prev

        # slots = relu(ff(layernorm_slot2(slots))) + slots
        s2 = _layernorm(slots, ln2_w, ln2_b)
        slots = jax.nn.relu(
            jnp.dot(s2.astype(bf16), wff, preferred_element_type=f32) + bff
        ) + slots

    # ---- Simple epilogue stores (tiny outputs; wrapper reshapes). ----
    slots_out_ref[0] = slots.astype(slots_out_ref.dtype)                 # (m, D)
    att_out_ref[0] = att_t.reshape(m, n).astype(att_out_ref.dtype)       # (m, N)


# ----------------------------------------------------------------------------
# Wrapper: parameter packing, batch blocking, output unpacking.
# ----------------------------------------------------------------------------
def _num_batch_blocks(b):
    """grid=(1,) on single-TC chips (v5e/v6e); 2 parallel blocks only on v7x."""
    try:
        kind = jax.devices()[0].device_kind.lower()
    except Exception:
        kind = ""
    if (('v7' in kind) or ('7x' in kind)) and b >= 2 and b % 2 == 0:
        return 2
    return 1


def slot_attention_forward(encoder_out, slots_init, params, *, iterations=3,
                           num_blocks=None):
    b, n, d = encoder_out.shape
    k = slots_init.shape[1]

    nblk = _num_batch_blocks(b) if num_blocks is None else num_blocks
    assert b % nblk == 0
    bblk = b // nblk

    f32, bf16 = jnp.float32, jnp.bfloat16
    scale = float(d) ** -0.5
    w_ih, w_hh = params['gru_w_ih'], params['gru_w_hh']
    b_ih, b_hh = params['gru_b_ih'], params['gru_b_hh']

    # MXU operands are pre-cast to bf16 here; the kernel accumulates in f32.
    w_kv = jnp.concatenate([params['k_w'].T, params['v_w'].T],
                           axis=1).astype(bf16)                     # (D, 2D)
    w_q = (params['q_w'].T * scale).astype(bf16)                    # (D, D)
    w_ff = params['ff_w'].T.astype(bf16)                            # (D, D)

    zero = jnp.zeros((d, d), f32)
    w_gru = jnp.concatenate([
        jnp.concatenate([w_ih[0:d].T, w_ih[d:2 * d].T,
                         w_ih[2 * d:3 * d].T, zero], axis=1),
        jnp.concatenate([w_hh[0:d].T, w_hh[d:2 * d].T,
                         zero, w_hh[2 * d:3 * d].T], axis=1),
    ], axis=0).astype(bf16)                                         # (2D, 4D)

    vec_slab = jnp.stack([
        params['ln_w'], params['ln_b'],
        params['ln1_w'], params['ln1_b'],
        params['ln2_w'], params['ln2_b'],
        params['k_b'], params['v_b'], params['q_b'] * scale,
        b_ih[0:d] + b_hh[0:d],            # r-gate bias (input + hidden)
        b_ih[d:2 * d] + b_hh[d:2 * d],    # z-gate bias
        b_ih[2 * d:3 * d],                # n-gate input bias
        b_hh[2 * d:3 * d],                # n-gate hidden bias
        params['ff_b'],
        jnp.zeros((d,), f32), jnp.zeros((d,), f32),   # pad to 16 rows
    ], axis=0).astype(f32)                                          # (16, D)

    kernel = functools.partial(_slot_attention_kernel,
                               iterations, n, k, d, bblk)

    in_specs = [
        pl.BlockSpec((bblk, n, d), lambda i: (i, 0, 0)),
        pl.BlockSpec((bblk, k, d), lambda i: (i, 0, 0)),
        pl.BlockSpec(w_kv.shape, lambda i: (0, 0)),
        pl.BlockSpec(w_q.shape, lambda i: (0, 0)),
        pl.BlockSpec(w_gru.shape, lambda i: (0, 0)),
        pl.BlockSpec(w_ff.shape, lambda i: (0, 0)),
        pl.BlockSpec(vec_slab.shape, lambda i: (0, 0)),
    ]
    out_specs = (
        pl.BlockSpec((1, bblk * k, d), lambda i: (i, 0, 0)),
        pl.BlockSpec((1, bblk * k, n), lambda i: (i, 0, 0)),
    )
    out_shape = (
        jax.ShapeDtypeStruct((nblk, bblk * k, d), f32),
        jax.ShapeDtypeStruct((nblk, bblk * k, n), f32),
    )

    slots_flat, att_flat = pl.pallas_call(
        kernel,
        out_shape=out_shape,
        grid=(nblk,),
        in_specs=in_specs,
        out_specs=out_specs,
        compiler_params=pltpu.CompilerParams(
            dimension_semantics=("parallel",)),
    )(encoder_out, slots_init, w_kv, w_q, w_gru, w_ff, vec_slab)

    slots = slots_flat.reshape(b, k, d)
    att = att_flat.reshape(b, k, n).transpose(0, 2, 1)   # -> (B, N, K)
    return slots, att


# ----------------------------------------------------------------------------
# Plain-JAX encoder glue (convs + positional embedding + layernorm + MLP).
# ----------------------------------------------------------------------------
def _conv2d(x, w, b, stride, padding=2):
    out = jax.lax.conv_general_dilated(
        x, w, window_strides=(stride, stride),
        padding=[(padding, padding), (padding, padding)],
        dimension_numbers=('NCHW', 'OIHW', 'NCHW'))
    return out + b[None, :, None, None]


def _positional_embedding(feat, w, b):
    """Faithful port of PositionalEmbedding.forward (including the raw .view)."""
    bsz, dd, h, wd = feat.shape
    ii = jnp.arange(h, dtype=jnp.float32)[:, None]
    jj = jnp.arange(wd, dtype=jnp.float32)[None, :]
    pe = jnp.stack([
        jnp.broadcast_to(jj / (wd - 1), (h, wd)),
        jnp.broadcast_to(ii / (h - 1), (h, wd)),
        jnp.broadcast_to((wd - 1 - jj) / (wd - 1), (h, wd)),
        jnp.broadcast_to((h - 1 - ii) / (h - 1), (h, wd)),
    ], axis=-1)                                          # (h, w, 4)
    pe = jnp.broadcast_to(pe[None], (bsz, h, wd, 4))
    pe = pe.reshape(bsz * h * wd, 4) @ w.T + b           # Linear(4 -> D)
    pe = pe.reshape(bsz, h, wd, dd)
    # The torch code adds a raw .view() (reshape), NOT a permute.
    return feat + pe.reshape(bsz, dd, h, wd)


def encoder_forward(x, p):
    h = jax.nn.relu(_conv2d(x, p['conv1_w'], p['conv1_b'], stride=1))
    h = jax.nn.relu(_conv2d(h, p['conv2_w'], p['conv2_b'], stride=2))
    h = jax.nn.relu(_conv2d(h, p['conv3_w'], p['conv3_b'], stride=2))
    h = jax.nn.relu(_conv2d(h, p['conv4_w'], p['conv4_b'], stride=1))
    h = _positional_embedding(h, p['pos_w'], p['pos_b'])
    bsz, dd, hh, ww = h.shape
    tok = jnp.transpose(h.reshape(bsz, dd, hh * ww), (0, 2, 1))   # (B, N, D)
    tok = _layernorm(tok, p['enc_ln_w'], p['enc_ln_b'])
    tok = jax.nn.relu(tok @ p['nn1_w'].T + p['nn1_b']) @ p['nn2_w'].T + p['nn2_b']
    return tok


# ----------------------------------------------------------------------------
# Pure-JAX reference for the slot-attention kernel (tolerance check).
# ----------------------------------------------------------------------------
def slot_attention_reference(encoder_out, slots_init, p, iterations=3):
    d = encoder_out.shape[-1]
    scale = float(d) ** -0.5
    xn = _layernorm(encoder_out, p['ln_w'], p['ln_b'])
    k_out = xn @ p['k_w'].T + p['k_b']
    v_out = xn @ p['v_w'].T + p['v_b']
    slots = slots_init
    temp_att = None
    for _ in range(iterations):
        prev = slots
        s = _layernorm(slots, p['ln1_w'], p['ln1_b'])
        q = s @ p['q_w'].T + p['q_b']
        att = jax.nn.softmax(
            jnp.einsum('bid,bjd->bij', k_out, q) * scale, axis=2) + 1e-8
        temp_att = att
        att_n = att / jnp.sum(att, axis=1, keepdims=True)
        updates = jnp.einsum('bnd,bnk->bkd', v_out, att_n)
        gi = updates @ p['gru_w_ih'].T + p['gru_b_ih']
        gh = prev @ p['gru_w_hh'].T + p['gru_b_hh']
        r = jax.nn.sigmoid(gi[..., 0:d] + gh[..., 0:d])
        z = jax.nn.sigmoid(gi[..., d:2 * d] + gh[..., d:2 * d])
        n_c = jnp.tanh(gi[..., 2 * d:3 * d] + r * gh[..., 2 * d:3 * d])
        slots = (1.0 - z) * n_c + z * prev
        s2 = _layernorm(slots, p['ln2_w'], p['ln2_b'])
        slots = jax.nn.relu(s2 @ p['ff_w'].T + p['ff_b']) + slots
    return slots, temp_att


# ----------------------------------------------------------------------------
# Parameter initialisation (deterministic glue).
# ----------------------------------------------------------------------------
def _uniform(key, shape, bound):
    return jax.random.uniform(key, shape, jnp.float32, -bound, bound)


def init_encoder_params(key, hid_dim):
    d = hid_dim
    ks = jax.random.split(key, 14)

    def conv_init(k1, k2, out_c, in_c, ksz):
        bound = 1.0 / float(in_c * ksz * ksz) ** 0.5
        return (_uniform(k1, (out_c, in_c, ksz, ksz), bound),
                _uniform(k2, (out_c,), bound))

    c1w, c1b = conv_init(ks[0], ks[1], d, 3, 5)
    c2w, c2b = conv_init(ks[2], ks[3], d, d, 5)
    c3w, c3b = conv_init(ks[4], ks[5], d, d, 5)
    c4w, c4b = conv_init(ks[6], ks[7], d, d, 5)
    lb = 1.0 / float(d) ** 0.5
    return {
        'conv1_w': c1w, 'conv1_b': c1b, 'conv2_w': c2w, 'conv2_b': c2b,
        'conv3_w': c3w, 'conv3_b': c3b, 'conv4_w': c4w, 'conv4_b': c4b,
        'pos_w': _uniform(ks[8], (d, 4), 0.5),
        'pos_b': _uniform(ks[9], (d,), 0.5),
        'nn1_w': _uniform(ks[10], (d, d), lb), 'nn1_b': _uniform(ks[11], (d,), lb),
        'nn2_w': _uniform(ks[12], (d, d), lb), 'nn2_b': _uniform(ks[13], (d,), lb),
        'enc_ln_w': jnp.ones((d,), jnp.float32),
        'enc_ln_b': jnp.zeros((d,), jnp.float32),
    }


def init_slot_attention_params(key, hid_dim):
    d = hid_dim
    ks = jax.random.split(key, 14)
    bound = 1.0 / float(d) ** 0.5
    u = lambda kk, shape: _uniform(kk, shape, bound)
    return {
        'ln_w': jnp.ones((d,), jnp.float32), 'ln_b': jnp.zeros((d,), jnp.float32),
        'ln1_w': jnp.ones((d,), jnp.float32), 'ln1_b': jnp.zeros((d,), jnp.float32),
        'ln2_w': jnp.ones((d,), jnp.float32), 'ln2_b': jnp.zeros((d,), jnp.float32),
        'q_w': u(ks[0], (d, d)), 'q_b': u(ks[1], (d,)),
        'k_w': u(ks[2], (d, d)), 'k_b': u(ks[3], (d,)),
        'v_w': u(ks[4], (d, d)), 'v_b': u(ks[5], (d,)),
        'ff_w': u(ks[6], (d, d)), 'ff_b': u(ks[7], (d,)),
        'gru_w_ih': u(ks[8], (3 * d, d)), 'gru_b_ih': u(ks[9], (3 * d,)),
        'gru_w_hh': u(ks[10], (3 * d, d)), 'gru_b_hh': u(ks[11], (3 * d,)),
        'mu': jax.random.normal(ks[12], (1, 1, d), jnp.float32),
        'sigma': jax.random.uniform(ks[13], (1, 1, d), jnp.float32),
    }


if __name__ == "__main__":
    B, C, H, W = 4, 3, 16, 16          # -> N = (H//4)*(W//4) = 16 tokens
    HID, K_SLOTS, ITERS = 32, 8, 3

    key = jax.random.PRNGKey(0)
    k_img, k_enc, k_sa, k_noise = jax.random.split(key, 4)

    x = jax.random.normal(k_img, (B, C, H, W), jnp.float32)
    enc_params = init_encoder_params(k_enc, HID)
    sa_params = init_slot_attention_params(k_sa, HID)

    # slot_model2.forward: encoder (plain-JAX glue) -> slot attention (Pallas).
    encoder_out = encoder_forward(x, enc_params)             # (B, 16, 32)
    # slots = torch.normal(mu.expand(b,k,d), sigma.expand(b,k,d))
    slots_init = (sa_params['mu'] + sa_params['sigma'] *
                  jax.random.normal(k_noise, (B, K_SLOTS, HID), jnp.float32))

    slots, att = slot_attention_forward(
        encoder_out, slots_init, sa_params, iterations=ITERS)
    jax.block_until_ready((slots, att))

    assert slots.shape == (B, K_SLOTS, HID)
    assert att.shape == (B, encoder_out.shape[1], K_SLOTS)

    # Tolerance check vs. a pure-JAX/XLA f32 reference (bf16 MXU operands +
    # approx softmax reciprocal widen the drift slightly -> loosened bounds).
    slots_ref, att_ref = slot_attention_reference(
        encoder_out, slots_init, sa_params, iterations=ITERS)
    assert float(jnp.max(jnp.abs(att - att_ref))) < 5e-2
    assert float(jnp.max(jnp.abs(slots - slots_ref))) < 1.5e-1

    print("KERNEL_OK")
</pallas_src>

<mosaic_0001>
module attributes {stable_mosaic.version = 11 : i64} {
  func.func @_slot_attention_kernel(%arg0: i32, %arg1: memref<4x16x32xf32, #tpu.memory_space<vmem>>, %arg2: memref<4x8x32xf32, #tpu.memory_space<vmem>>, %arg3: memref<32x64xbf16, #tpu.memory_space<vmem>>, %arg4: memref<32x32xbf16, #tpu.memory_space<vmem>>, %arg5: memref<64x128xbf16, #tpu.memory_space<vmem>>, %arg6: memref<32x32xbf16, #tpu.memory_space<vmem>>, %arg7: memref<16x32xf32, #tpu.memory_space<vmem>>, %arg8: memref<1x32x32xf32, #tpu.memory_space<vmem>>, %arg9: memref<1x32x16xf32, #tpu.memory_space<vmem>>) attributes {dimension_semantics = [#tpu.dimension_semantics<parallel>], iteration_bounds = array<i64: 1>, scalar_prefetch = 0 : i64, scratch_operands = 0 : i64, tpu.core_type = #tpu.core_type<tc>, window_params = [{transform_indices = @transform_0, window_bounds = array<i64: 4, 16, 32>}, {transform_indices = @transform_1, window_bounds = array<i64: 4, 8, 32>}, {pipeline_mode = #tpu.pipeline_mode<synchronous>, transform_indices = @transform_2, window_bounds = array<i64: 32, 64>}, {pipeline_mode = #tpu.pipeline_mode<synchronous>, transform_indices = @transform_3, window_bounds = array<i64: 32, 32>}, {pipeline_mode = #tpu.pipeline_mode<synchronous>, transform_indices = @transform_4, window_bounds = array<i64: 64, 128>}, {pipeline_mode = #tpu.pipeline_mode<synchronous>, transform_indices = @transform_5, window_bounds = array<i64: 32, 32>}, {pipeline_mode = #tpu.pipeline_mode<synchronous>, transform_indices = @transform_6, window_bounds = array<i64: 16, 32>}, {transform_indices = @transform_7, window_bounds = array<i64: 1, 32, 32>}, {transform_indices = @transform_8, window_bounds = array<i64: 1, 32, 16>}]} {
    %c0 = arith.constant 0 : index
    %c0_0 = arith.constant 0 : index
    %0 = vector.load %arg3[%c0, %c0_0] : memref<32x64xbf16, #tpu.memory_space<vmem>>, vector<32x64xbf16>
    %c0_1 = arith.constant 0 : index
    %c0_2 = arith.constant 0 : index
    %1 = vector.load %arg4[%c0_1, %c0_2] : memref<32x32xbf16, #tpu.memory_space<vmem>>, vector<32x32xbf16>
    %c0_3 = arith.constant 0 : index
    %c0_4 = arith.constant 0 : index
    %2 = vector.load %arg5[%c0_3, %c0_4] : memref<64x128xbf16, #tpu.memory_space<vmem>>, vector<64x128xbf16>
    %c0_5 = arith.constant 0 : index
    %c0_6 = arith.constant 0 : index
    %3 = vector.load %arg6[%c0_5, %c0_6] : memref<32x32xbf16, #tpu.memory_space<vmem>>, vector<32x32xbf16>
    %c0_7 = arith.constant 0 : index
    %c0_8 = arith.constant 0 : index
    %4 = vector.load %arg7[%c0_7, %c0_8] : memref<16x32xf32, #tpu.memory_space<vmem>>, vector<1x32xf32>
    %c1 = arith.constant 1 : index
    %c0_9 = arith.constant 0 : index
    %5 = vector.load %arg7[%c1, %c0_9] : memref<16x32xf32, #tpu.memory_space<vmem>>, vector<1x32xf32>
    %c6 = arith.constant 6 : index
    %c0_10 = arith.constant 0 : index
    %6 = vector.load %arg7[%c6, %c0_10] : memref<16x32xf32, #tpu.memory_space<vmem>>, vector<1x32xf32>
    %c7 = arith.constant 7 : index
    %c0_11 = arith.constant 0 : index
    %7 = vector.load %arg7[%c7, %c0_11] : memref<16x32xf32, #tpu.memory_space<vmem>>, vector<1x32xf32>
    %c8 = arith.constant 8 : index
    %c0_12 = arith.constant 0 : index
    %8 = vector.load %arg7[%c8, %c0_12] : memref<16x32xf32, #tpu.memory_space<vmem>>, vector<1x32xf32>
    %c2 = arith.constant 2 : index
    %c0_13 = arith.constant 0 : index
    %9 = vector.load %arg7[%c2, %c0_13] : memref<16x32xf32, #tpu.memory_space<vmem>>, vector<1x32xf32>
    %10 = vector.shape_cast %9 : vector<1x32xf32> to vector<1x32xf32>
    %11 = vector.broadcast %10 : vector<1x32xf32> to vector<32x32xf32>
    %c3 = arith.constant 3 : index
    %c0_14 = arith.constant 0 : index
    %12 = vector.load %arg7[%c3, %c0_14] : memref<16x32xf32, #tpu.memory_space<vmem>>, vector<1x32xf32>
    %13 = vector.shape_cast %12 : vector<1x32xf32> to vector<1x32xf32>
    %14 = vector.broadcast %13 : vector<1x32xf32> to vector<32x32xf32>
    %c4 = arith.constant 4 : index
    %c0_15 = arith.constant 0 : index
    %15 = vector.load %arg7[%c4, %c0_15] : memref<16x32xf32, #tpu.memory_space<vmem>>, vector<1x32xf32>
    %16 = vector.shape_cast %15 : vector<1x32xf32> to vector<1x32xf32>
    %17 = vector.broadcast %16 : vector<1x32xf32> to vector<32x32xf32>
    %c5 = arith.constant 5 : index
    %c0_16 = arith.constant 0 : index
    %18 = vector.load %arg7[%c5, %c0_16] : memref<16x32xf32, #tpu.memory_space<vmem>>, vector<1x32xf32>
    %19 = vector.shape_cast %18 : vector<1x32xf32> to vector<1x32xf32>
    %20 = vector.broadcast %19 : vector<1x32xf32> to vector<32x32xf32>
    %c9 = arith.constant 9 : index
    %c0_17 = arith.constant 0 : index
    %21 = vector.load %arg7[%c9, %c0_17] : memref<16x32xf32, #tpu.memory_space<vmem>>, vector<1x32xf32>
    %22 = vector.shape_cast %21 : vector<1x32xf32> to vector<1x32xf32>
    %23 = vector.broadcast %22 : vector<1x32xf32> to vector<32x32xf32>
    %c10 = arith.constant 10 : index
    %c0_18 = arith.constant 0 : index
    %24 = vector.load %arg7[%c10, %c0_18] : memref<16x32xf32, #tpu.memory_space<vmem>>, vector<1x32xf32>
    %25 = vector.shape_cast %24 : vector<1x32xf32> to vector<1x32xf32>
    %26 = vector.broadcast %25 : vector<1x32xf32> to vector<32x32xf32>
    %c11 = arith.constant 11 : index
    %c0_19 = arith.constant 0 : index
    %27 = vector.load %arg7[%c11, %c0_19] : memref<16x32xf32, #tpu.memory_space<vmem>>, vector<1x32xf32>
    %28 = vector.shape_cast %27 : vector<1x32xf32> to vector<1x32xf32>
    %29 = vector.broadcast %28 : vector<1x32xf32> to vector<32x32xf32>
    %c12 = arith.constant 12 : index
    %c0_20 = arith.constant 0 : index
    %30 = vector.load %arg7[%c12, %c0_20] : memref<16x32xf32, #tpu.memory_space<vmem>>, vector<1x32xf32>
    %31 = vector.shape_cast %30 : vector<1x32xf32> to vector<1x32xf32>
    %32 = vector.broadcast %31 : vector<1x32xf32> to vector<32x32xf32>
    %c13 = arith.constant 13 : index
    %c0_21 = arith.constant 0 : index
    %33 = vector.load %arg7[%c13, %c0_21] : memref<16x32xf32, #tpu.memory_space<vmem>>, vector<1x32xf32>
    %34 = vector.shape_cast %33 : vector<1x32xf32> to vector<1x32xf32>
    %35 = vector.broadcast %34 : vector<1x32xf32> to vector<32x32xf32>
    %c0_22 = arith.constant 0 : index
    %c0_23 = arith.constant 0 : index
    %c0_24 = arith.constant 0 : index
    %36 = vector.load %arg1[%c0_22, %c0_23, %c0_24] : memref<4x16x32xf32, #tpu.memory_space<vmem>>, vector<4x16x32xf32>
    %37 = vector.shape_cast %36 : vector<4x16x32xf32> to vector<64x32xf32>
    %cst = arith.constant dense<0.000000e+00> : vector<64xf32>
    %38 = vector.multi_reduction <add>, %37, %cst [1] : vector<64x32xf32> to vector<64xf32>
    %39 = vector.shape_cast %38 : vector<64xf32> to vector<64x1xf32>
    %cst_25 = arith.constant 3.200000e+01 : f32
    %40 = vector.broadcast %cst_25 : f32 to vector<64x1xf32>
    %41 = arith.divf %39, %40 : vector<64x1xf32>
    %42 = vector.broadcast %41 : vector<64x1xf32> to vector<64x32xf32>
    %43 = arith.subf %37, %42 : vector<64x32xf32>
    %44 = arith.mulf %43, %43 : vector<64x32xf32>
    %cst_26 = arith.constant dense<0.000000e+00> : vector<64xf32>
    %45 = vector.multi_reduction <add>, %44, %cst_26 [1] : vector<64x32xf32> to vector<64xf32>
    %46 = vector.shape_cast %45 : vector<64xf32> to vector<64x1xf32>
    %cst_27 = arith.constant 3.200000e+01 : f32
    %47 = vector.broadcast %cst_27 : f32 to vector<64x1xf32>
    %48 = arith.divf %46, %47 : vector<64x1xf32>
    %49 = vector.broadcast %41 : vector<64x1xf32> to vector<64x32xf32>
    %50 = arith.subf %37, %49 : vector<64x32xf32>
    %cst_28 = arith.constant 9.99999974E-6 : f32
    %51 = vector.broadcast %cst_28 : f32 to vector<64x1xf32>
    %52 = arith.addf %48, %51 : vector<64x1xf32>
    %53 = math.rsqrt %52 : vector<64x1xf32>
    %54 = vector.broadcast %53 : vector<64x1xf32> to vector<64x32xf32>
    %55 = arith.mulf %50, %54 : vector<64x32xf32>
    %56 = vector.broadcast %4 : vector<1x32xf32> to vector<64x32xf32>
    %57 = arith.mulf %55, %56 : vector<64x32xf32>
    %58 = vector.broadcast %5 : vector<1x32xf32> to vector<64x32xf32>
    %59 = arith.addf %57, %58 : vector<64x32xf32>
    %60 = arith.truncf %59 : vector<64x32xf32> to vector<64x32xbf16>
    %cst_29 = arith.constant dense<0.000000e+00> : vector<64x64xf32>
    %61 = tpu.matmul %60, %0, %cst_29 {dimension_numbers = #tpu.dot_dimension_numbers<[1], [0], [0], [1], [0, 0, 1, 1], [], []>} : vector<64x32xbf16>, vector<32x64xbf16>, vector<64x64xf32> -> vector<64x64xf32>
    %62 = vector.extract_strided_slice %61 {offsets = [0, 0], sizes = [64, 32], strides = [1, 1]} : vector<64x64xf32> to vector<64x32xf32>
    %63 = vector.broadcast %6 : vector<1x32xf32> to vector<64x32xf32>
    %64 = arith.addf %62, %63 : vector<64x32xf32>
    %65 = vector.shape_cast %64 : vector<64x32xf32> to vector<4x16x32xf32>
    %66 = vector.extract_strided_slice %61 {offsets = [0, 32], sizes = [64, 32], strides = [1, 1]} : vector<64x64xf32> to vector<64x32xf32>
    %67 = vector.broadcast %7 : vector<1x32xf32> to vector<64x32xf32>
    %68 = arith.addf %66, %67 : vector<64x32xf32>
    %69 = vector.shape_cast %68 : vector<64x32xf32> to vector<4x16x32xf32>
    %70 = arith.truncf %69 : vector<4x16x32xf32> to vector<4x16x32xbf16>
    %71 = arith.truncf %65 : vector<4x16x32xf32> to vector<4x16x32xbf16>
    %72 = vector.shape_cast %1 : vector<32x32xbf16> to vector<1x32x32xbf16>
    %73 = vector.shape_cast %72 : vector<1x32x32xbf16> to vector<1x32x32xbf16>
    %74 = vector.broadcast %73 : vector<1x32x32xbf16> to vector<4x32x32xbf16>
    "tpu.trace_start"() <{level = 10 : i32, message = "bed,bnd->ben"}> : () -> ()
    %cst_30 = arith.constant dense<0.000000e+00> : vector<4x32x16xf32>
    %75 = tpu.matmul %74, %71, %cst_30 {dimension_numbers = #tpu.dot_dimension_numbers<[2], [2], [1], [1], [0, 0, 0, 1, 1, 1], [0], [0]>} : vector<4x32x32xbf16>, vector<4x16x32xbf16>, vector<4x32x16xf32> -> vector<4x32x16xf32>
    "tpu.trace_stop"() : () -> ()
    %76 = arith.truncf %75 : vector<4x32x16xf32> to vector<4x32x16xbf16>
    %77 = arith.truncf %8 : vector<1x32xf32> to vector<1x32xbf16>
    %78 = vector.shape_cast %77 : vector<1x32xbf16> to vector<1x1x32xbf16>
    %79 = vector.shape_cast %78 : vector<1x1x32xbf16> to vector<1x1x32xbf16>
    %80 = vector.broadcast %79 : vector<1x1x32xbf16> to vector<4x1x32xbf16>
    "tpu.trace_start"() <{level = 10 : i32, message = "brd,bnd->brn"}> : () -> ()
    %cst_31 = arith.constant dense<0.000000e+00> : vector<4x1x16xf32>
    %81 = tpu.matmul %80, %71, %cst_31 {dimension_numbers = #tpu.dot_dimension_numbers<[2], [2], [1], [1], [0, 0, 0, 1, 1, 1], [0], [0]>} : vector<4x1x32xbf16>, vector<4x16x32xbf16>, vector<4x1x16xf32> -> vector<4x1x16xf32>
    "tpu.trace_stop"() : () -> ()
    %82 = vector.shape_cast %81 : vector<4x1x16xf32> to vector<4x1x16xf32>
    %83 = vector.broadcast %82 : vector<4x1x16xf32> to vector<4x8x16xf32>
    %c0_32 = arith.constant 0 : index
    %c0_33 = arith.constant 0 : index
    %c0_34 = arith.constant 0 : index
    %84 = vector.load %arg2[%c0_32, %c0_33, %c0_34] : memref<4x8x32xf32, #tpu.memory_space<vmem>>, vector<4x8x32xf32>
    %85 = vector.shape_cast %84 : vector<4x8x32xf32> to vector<32x32xf32>
    %cst_35 = arith.constant dense<0.000000e+00> : vector<32xf32>
    %86 = vector.multi_reduction <add>, %85, %cst_35 [1] : vector<32x32xf32> to vector<32xf32>
    %87 = vector.shape_cast %86 : vector<32xf32> to vector<32x1xf32>
    %cst_36 = arith.constant 3.200000e+01 : f32
    %88 = vector.broadcast %cst_36 : f32 to vector<32x1xf32>
    %89 = arith.divf %87, %88 : vector<32x1xf32>
    %90 = vector.broadcast %89 : vector<32x1xf32> to vector<32x32xf32>
    %91 = arith.subf %85, %90 : vector<32x32xf32>
    %92 = arith.mulf %91, %91 : vector<32x32xf32>
    %cst_37 = arith.constant dense<0.000000e+00> : vector<32xf32>
    %93 = vector.multi_reduction <add>, %92, %cst_37 [1] : vector<32x32xf32> to vector<32xf32>
    %94 = vector.shape_cast %93 : vector<32xf32> to vector<32x1xf32>
    %cst_38 = arith.constant 3.200000e+01 : f32
    %95 = vector.broadcast %cst_38 : f32 to vector<32x1xf32>
    %96 = arith.divf %94, %95 : vector<32x1xf32>
    %97 = vector.broadcast %89 : vector<32x1xf32> to vector<32x32xf32>
    %98 = arith.subf %85, %97 : vector<32x32xf32>
    %cst_39 = arith.constant 9.99999974E-6 : f32
    %99 = vector.broadcast %cst_39 : f32 to vector<32x1xf32>
    %100 = arith.addf %96, %99 : vector<32x1xf32>
    %101 = math.rsqrt %100 : vector<32x1xf32>
    %102 = vector.broadcast %101 : vector<32x1xf32> to vector<32x32xf32>
    %103 = arith.mulf %98, %102 : vector<32x32xf32>
    %104 = arith.mulf %103, %11 : vector<32x32xf32>
    %105 = arith.addf %104, %14 : vector<32x32xf32>
    %106 = vector.shape_cast %105 : vector<32x32xf32> to vector<4x8x32xf32>
    %107 = arith.truncf %106 : vector<4x8x32xf32> to vector<4x8x32xbf16>
    "tpu.trace_start"() <{level = 10 : i32, message = "bke,ben->bkn"}> : () -> ()
    %cst_40 = arith.constant dense<0.000000e+00> : vector<4x8x16xf32>
    %108 = tpu.matmul %107, %76, %cst_40 {dimension_numbers = #tpu.dot_dimension_numbers<[2], [1], [1], [2], [0, 0, 0, 1, 1, 2], [0], [0]>} : vector<4x8x32xbf16>, vector<4x32x16xbf16>, vector<4x8x16xf32> -> vector<4x8x16xf32>
    "tpu.trace_stop"() : () -> ()
    %109 = arith.addf %108, %83 : vector<4x8x16xf32>
    %cst_41 = arith.constant dense<0xFF800000> : vector<4x16xf32>
    %110 = vector.multi_reduction <maximumf>, %109, %cst_41 [1] : vector<4x8x16xf32> to vector<4x16xf32>
    %111 = vector.shape_cast %110 : vector<4x16xf32> to vector<4x1x16xf32>
    %112 = vector.broadcast %111 : vector<4x1x16xf32> to vector<4x8x16xf32>
    %113 = arith.subf %109, %112 : vector<4x8x16xf32>
    %114 = math.exp %113 : vector<4x8x16xf32>
    %cst_42 = arith.constant dense<0.000000e+00> : vector<4x16xf32>
    %115 = vector.multi_reduction <add>, %114, %cst_42 [1] : vector<4x8x16xf32> to vector<4x16xf32>
    %116 = vector.shape_cast %115 : vector<4x16xf32> to vector<4x1x16xf32>
    %117 = tpu.reciprocal %116 {approx = true} : vector<4x1x16xf32> -> vector<4x1x16xf32>
    %118 = vector.broadcast %117 : vector<4x1x16xf32> to vector<4x8x16xf32>
    %119 = arith.mulf %114, %118 : vector<4x8x16xf32>
    %cst_43 = arith.constant 9.99999993E-9 : f32
    %120 = vector.broadcast %cst_43 : f32 to vector<4x8x16xf32>
    %121 = arith.addf %119, %120 : vector<4x8x16xf32>
    %cst_44 = arith.constant dense<0.000000e+00> : vector<4x8xf32>
    %122 = vector.multi_reduction <add>, %121, %cst_44 [2] : vector<4x8x16xf32> to vector<4x8xf32>
    %123 = vector.shape_cast %122 : vector<4x8xf32> to vector<4x8x1xf32>
    %124 = vector.broadcast %123 : vector<4x8x1xf32> to vector<4x8x16xf32>
    %125 = arith.divf %121, %124 : vector<4x8x16xf32>
    %126 = arith.truncf %125 : vector<4x8x16xf32> to vector<4x8x16xbf16>
    "tpu.trace_start"() <{level = 10 : i32, message = "bkn,bnd->bkd"}> : () -> ()
    %cst_45 = arith.constant dense<0.000000e+00> : vector<4x8x32xf32>
    %127 = tpu.matmul %126, %70, %cst_45 {dimension_numbers = #tpu.dot_dimension_numbers<[2], [1], [1], [2], [0, 0, 0, 1, 1, 2], [0], [0]>} : vector<4x8x16xbf16>, vector<4x16x32xbf16>, vector<4x8x32xf32> -> vector<4x8x32xf32>
    "tpu.trace_stop"() : () -> ()
    %128 = vector.shape_cast %127 : vector<4x8x32xf32> to vector<32x32xf32>
    %129 = tpu.concatenate %128, %85 in 1 : vector<32x32xf32>, vector<32x32xf32> -> vector<32x64xf32>
    %130 = arith.truncf %129 : vector<32x64xf32> to vector<32x64xbf16>
    %cst_46 = arith.constant dense<0.000000e+00> : vector<32x128xf32>
    %131 = tpu.matmul %130, %2, %cst_46 {dimension_numbers = #tpu.dot_dimension_numbers<[1], [0], [0], [1], [0, 0, 1, 1], [], []>} : vector<32x64xbf16>, vector<64x128xbf16>, vector<32x128xf32> -> vector<32x128xf32>
    %132 = vector.extract_strided_slice %131 {offsets = [0, 0], sizes = [32, 32], strides = [1, 1]} : vector<32x128xf32> to vector<32x32xf32>
    %133 = arith.addf %132, %23 : vector<32x32xf32>
    %134 = arith.negf %133 : vector<32x32xf32>
    %135 = math.exp %134 : vector<32x32xf32>
    %cst_47 = arith.constant 1.000000e+00 : f32
    %136 = vector.broadcast %cst_47 : f32 to vector<32x32xf32>
    %137 = arith.addf %136, %135 : vector<32x32xf32>
    %138 = arith.divf %136, %137 : vector<32x32xf32>
    %139 = vector.extract_strided_slice %131 {offsets = [0, 32], sizes = [32, 32], strides = [1, 1]} : vector<32x128xf32> to vector<32x32xf32>
    %140 = arith.addf %139, %26 : vector<32x32xf32>
    %141 = arith.negf %140 : vector<32x32xf32>
    %142 = math.exp %141 : vector<32x32xf32>
    %cst_48 = arith.constant 1.000000e+00 : f32
    %143 = vector.broadcast %cst_48 : f32 to vector<32x32xf32>
    %144 = arith.addf %143, %142 : vector<32x32xf32>
    %145 = arith.divf %143, %144 : vector<32x32xf32>
    %146 = vector.extract_strided_slice %131 {offsets = [0, 64], sizes = [32, 32], strides = [1, 1]} : vector<32x128xf32> to vector<32x32xf32>
    %147 = arith.addf %146, %29 : vector<32x32xf32>
    %148 = vector.extract_strided_slice %131 {offsets = [0, 96], sizes = [32, 32], strides = [1, 1]} : vector<32x128xf32> to vector<32x32xf32>
    %149 = arith.addf %148, %32 : vector<32x32xf32>
    %150 = arith.mulf %138, %149 : vector<32x32xf32>
    %151 = arith.addf %147, %150 : vector<32x32xf32>
    %152 = math.tanh %151 : vector<32x32xf32>
    %cst_49 = arith.constant 1.000000e+00 : f32
    %153 = vector.broadcast %cst_49 : f32 to vector<32x32xf32>
    %154 = arith.subf %153, %145 : vector<32x32xf32>
    %155 = arith.mulf %154, %152 : vector<32x32xf32>
    %156 = arith.mulf %145, %85 : vector<32x32xf32>
    %157 = arith.addf %155, %156 : vector<32x32xf32>
    %cst_50 = arith.constant dense<0.000000e+00> : vector<32xf32>
    %158 = vector.multi_reduction <add>, %157, %cst_50 [1] : vector<32x32xf32> to vector<32xf32>
    %159 = vector.shape_cast %158 : vector<32xf32> to vector<32x1xf32>
    %cst_51 = arith.constant 3.200000e+01 : f32
    %160 = vector.broadcast %cst_51 : f32 to vector<32x1xf32>
    %161 = arith.divf %159, %160 : vector<32x1xf32>
    %162 = vector.broadcast %161 : vector<32x1xf32> to vector<32x32xf32>
    %163 = arith.subf %157, %162 : vector<32x32xf32>
    %164 = arith.mulf %163, %163 : vector<32x32xf32>
    %cst_52 = arith.constant dense<0.000000e+00> : vector<32xf32>
    %165 = vector.multi_reduction <add>, %164, %cst_52 [1] : vector<32x32xf32> to vector<32xf32>
    %166 = vector.shape_cast %165 : vector<32xf32> to vector<32x1xf32>
    %cst_53 = arith.constant 3.200000e+01 : f32
    %167 = vector.broadcast %cst_53 : f32 to vector<32x1xf32>
    %168 = arith.divf %166, %167 : vector<32x1xf32>
    %169 = vector.broadcast %161 : vector<32x1xf32> to vector<32x32xf32>
    %170 = arith.subf %157, %169 : vector<32x32xf32>
    %cst_54 = arith.constant 9.99999974E-6 : f32
    %171 = vector.broadcast %cst_54 : f32 to vector<32x1xf32>
    %172 = arith.addf %168, %171 : vector<32x1xf32>
    %173 = math.rsqrt %172 : vector<32x1xf32>
    %174 = vector.broadcast %173 : vector<32x1xf32> to vector<32x32xf32>
    %175 = arith.mulf %170, %174 : vector<32x32xf32>
    %176 = arith.mulf %175, %17 : vector<32x32xf32>
    %177 = arith.addf %176, %20 : vector<32x32xf32>
    %178 = arith.truncf %177 : vector<32x32xf32> to vector<32x32xbf16>
    %cst_55 = arith.constant dense<0.000000e+00> : vector<32x32xf32>
    %179 = tpu.matmul %178, %3, %cst_55 {dimension_numbers = #tpu.dot_dimension_numbers<[1], [0], [0], [1], [0, 0, 1, 1], [], []>} : vector<32x32xbf16>, vector<32x32xbf16>, vector<32x32xf32> -> vector<32x32xf32>
    %180 = arith.addf %179, %35 : vector<32x32xf32>
    %cst_56 = arith.constant 0.000000e+00 : f32
    %181 = vector.broadcast %cst_56 : f32 to vector<32x32xf32>
    %182 = arith.maximumf %180, %181 : vector<32x32xf32>
    %183 = arith.addf %182, %157 : vector<32x32xf32>
    %cst_57 = arith.constant dense<0.000000e+00> : vector<32xf32>
    %184 = vector.multi_reduction <add>, %183, %cst_57 [1] : vector<32x32xf32> to vector<32xf32>
    %185 = vector.shape_cast %184 : vector<32xf32> to vector<32x1xf32>
    %cst_58 = arith.constant 3.200000e+01 : f32
    %186 = vector.broadcast %cst_58 : f32 to vector<32x1xf32>
    %187 = arith.divf %185, %186 : vector<32x1xf32>
    %188 = vector.broadcast %187 : vector<32x1xf32> to vector<32x32xf32>
    %189 = arith.subf %183, %188 : vector<32x32xf32>
    %190 = arith.mulf %189, %189 : vector<32x32xf32>
    %cst_59 = arith.constant dense<0.000000e+00> : vector<32xf32>
    %191 = vector.multi_reduction <add>, %190, %cst_59 [1] : vector<32x32xf32> to vector<32xf32>
    %192 = vector.shape_cast %191 : vector<32xf32> to vector<32x1xf32>
    %cst_60 = arith.constant 3.200000e+01 : f32
    %193 = vector.broadcast %cst_60 : f32 to vector<32x1xf32>
    %194 = arith.divf %192, %193 : vector<32x1xf32>
    %195 = vector.broadcast %187 : vector<32x1xf32> to vector<32x32xf32>
    %196 = arith.subf %183, %195 : vector<32x32xf32>
    %cst_61 = arith.constant 9.99999974E-6 : f32
    %197 = vector.broadcast %cst_61 : f32 to vector<32x1xf32>
    %198 = arith.addf %194, %197 : vector<32x1xf32>
    %199 = math.rsqrt %198 : vector<32x1xf32>
    %200 = vector.broadcast %199 : vector<32x1xf32> to vector<32x32xf32>
    %201 = arith.mulf %196, %200 : vector<32x32xf32>
    %202 = arith.mulf %201, %11 : vector<32x32xf32>
    %203 = arith.addf %202, %14 : vector<32x32xf32>
    %204 = vector.shape_cast %203 : vector<32x32xf32> to vector<4x8x32xf32>
    %205 = arith.truncf %204 : vector<4x8x32xf32> to vector<4x8x32xbf16>
    "tpu.trace_start"() <{level = 10 : i32, message = "bke,ben->bkn"}> : () -> ()
    %cst_62 = arith.constant dense<0.000000e+00> : vector<4x8x16xf32>
    %206 = tpu.matmul %205, %76, %cst_62 {dimension_numbers = #tpu.dot_dimension_numbers<[2], [1], [1], [2], [0, 0, 0, 1, 1, 2], [0], [0]>} : vector<4x8x32xbf16>, vector<4x32x16xbf16>, vector<4x8x16xf32> -> vector<4x8x16xf32>
    "tpu.trace_stop"() : () -> ()
    %207 = arith.addf %206, %83 : vector<4x8x16xf32>
    %cst_63 = arith.constant dense<0xFF800000> : vector<4x16xf32>
    %208 = vector.multi_reduction <maximumf>, %207, %cst_63 [1] : vector<4x8x16xf32> to vector<4x16xf32>
    %209 = vector.shape_cast %208 : vector<4x16xf32> to vector<4x1x16xf32>
    %210 = vector.broadcast %209 : vector<4x1x16xf32> to vector<4x8x16xf32>
    %211 = arith.subf %207, %210 : vector<4x8x16xf32>
    %212 = math.exp %211 : vector<4x8x16xf32>
    %cst_64 = arith.constant dense<0.000000e+00> : vector<4x16xf32>
    %213 = vector.multi_reduction <add>, %212, %cst_64 [1] : vector<4x8x16xf32> to vector<4x16xf32>
    %214 = vector.shape_cast %213 : vector<4x16xf32> to vector<4x1x16xf32>
    %215 = tpu.reciprocal %214 {approx = true} : vector<4x1x16xf32> -> vector<4x1x16xf32>
    %216 = vector.broadcast %215 : vector<4x1x16xf32> to vector<4x8x16xf32>
    %217 = arith.mulf %212, %216 : vector<4x8x16xf32>
    %cst_65 = arith.constant 9.99999993E-9 : f32
    %218 = vector.broadcast %cst_65 : f32 to vector<4x8x16xf32>
    %219 = arith.addf %217, %218 : vector<4x8x16xf32>
    %cst_66 = arith.constant dense<0.000000e+00> : vector<4x8xf32>
    %220 = vector.multi_reduction <add>, %219, %cst_66 [2] : vector<4x8x16xf32> to vector<4x8xf32>
    %221 = vector.shape_cast %220 : vector<4x8xf32> to vector<4x8x1xf32>
    %222 = vector.broadcast %221 : vector<4x8x1xf32> to vector<4x8x16xf32>
    %223 = arith.divf %219, %222 : vector<4x8x16xf32>
    %224 = arith.truncf %223 : vector<4x8x16xf32> to vector<4x8x16xbf16>
    "tpu.trace_start"() <{level = 10 : i32, message = "bkn,bnd->bkd"}> : () -> ()
    %cst_67 = arith.constant dense<0.000000e+00> : vector<4x8x32xf32>
    %225 = tpu.matmul %224, %70, %cst_67 {dimension_numbers = #tpu.dot_dimension_numbers<[2], [1], [1], [2], [0, 0, 0, 1, 1, 2], [0], [0]>} : vector<4x8x16xbf16>, vector<4x16x32xbf16>, vector<4x8x32xf32> -> vector<4x8x32xf32>
    "tpu.trace_stop"() : () -> ()
    %226 = vector.shape_cast %225 : vector<4x8x32xf32> to vector<32x32xf32>
    %227 = tpu.concatenate %226, %183 in 1 : vector<32x32xf32>, vector<32x32xf32> -> vector<32x64xf32>
    %228 = arith.truncf %227 : vector<32x64xf32> to vector<32x64xbf16>
    %cst_68 = arith.constant dense<0.000000e+00> : vector<32x128xf32>
    %229 = tpu.matmul %228, %2, %cst_68 {dimension_numbers = #tpu.dot_dimension_numbers<[1], [0], [0], [1], [0, 0, 1, 1], [], []>} : vector<32x64xbf16>, vector<64x128xbf16>, vector<32x128xf32> -> vector<32x128xf32>
    %230 = vector.extract_strided_slice %229 {offsets = [0, 0], sizes = [32, 32], strides = [1, 1]} : vector<32x128xf32> to vector<32x32xf32>
    %231 = arith.addf %230, %23 : vector<32x32xf32>
    %232 = arith.negf %231 : vector<32x32xf32>
    %233 = math.exp %232 : vector<32x32xf32>
    %cst_69 = arith.constant 1.000000e+00 : f32
    %234 = vector.broadcast %cst_69 : f32 to vector<32x32xf32>
    %235 = arith.addf %234, %233 : vector<32x32xf32>
    %236 = arith.divf %234, %235 : vector<32x32xf32>
    %237 = vector.extract_strided_slice %229 {offsets = [0, 32], sizes = [32, 32], strides = [1, 1]} : vector<32x128xf32> to vector<32x32xf32>
    %238 = arith.addf %237, %26 : vector<32x32xf32>
    %239 = arith.negf %238 : vector<32x32xf32>
    %240 = math.exp %239 : vector<32x32xf32>
    %cst_70 = arith.constant 1.000000e+00 : f32
    %241 = vector.broadcast %cst_70 : f32 to vector<32x32xf32>
    %242 = arith.addf %241, %240 : vector<32x32xf32>
    %243 = arith.divf %241, %242 : vector<32x32xf32>
    %244 = vector.extract_strided_slice %229 {offsets = [0, 64], sizes = [32, 32], strides = [1, 1]} : vector<32x128xf32> to vector<32x32xf32>
    %245 = arith.addf %244, %29 : vector<32x32xf32>
    %246 = vector.extract_strided_slice %229 {offsets = [0, 96], sizes = [32, 32], strides = [1, 1]} : vector<32x128xf32> to vector<32x32xf32>
    %247 = arith.addf %246, %32 : vector<32x32xf32>
    %248 = arith.mulf %236, %247 : vector<32x32xf32>
    %249 = arith.addf %245, %248 : vector<32x32xf32>
    %250 = math.tanh %249 : vector<32x32xf32>
    %cst_71 = arith.constant 1.000000e+00 : f32
    %251 = vector.broadcast %cst_71 : f32 to vector<32x32xf32>
    %252 = arith.subf %251, %243 : vector<32x32xf32>
    %253 = arith.mulf %252, %250 : vector<32x32xf32>
    %254 = arith.mulf %243, %183 : vector<32x32xf32>
    %255 = arith.addf %253, %254 : vector<32x32xf32>
    %cst_72 = arith.constant dense<0.000000e+00> : vector<32xf32>
    %256 = vector.multi_reduction <add>, %255, %cst_72 [1] : vector<32x32xf32> to vector<32xf32>
    %257 = vector.shape_cast %256 : vector<32xf32> to vector<32x1xf32>
    %cst_73 = arith.constant 3.200000e+01 : f32
    %258 = vector.broadcast %cst_73 : f32 to vector<32x1xf32>
    %259 = arith.divf %257, %258 : vector<32x1xf32>
    %260 = vector.broadcast %259 : vector<32x1xf32> to vector<32x32xf32>
    %261 = arith.subf %255, %260 : vector<32x32xf32>
    %262 = arith.mulf %261, %261 : vector<32x32xf32>
    %cst_74 = arith.constant dense<0.000000e+00> : vector<32xf32>
    %263 = vector.multi_reduction <add>, %262, %cst_74 [1] : vector<32x32xf32> to vector<32xf32>
    %264 = vector.shape_cast %263 : vector<32xf32> to vector<32x1xf32>
    %cst_75 = arith.constant 3.200000e+01 : f32
    %265 = vector.broadcast %cst_75 : f32 to vector<32x1xf32>
    %266 = arith.divf %264, %265 : vector<32x1xf32>
    %267 = vector.broadcast %259 : vector<32x1xf32> to vector<32x32xf32>
    %268 = arith.subf %255, %267 : vector<32x32xf32>
    %cst_76 = arith.constant 9.99999974E-6 : f32
    %269 = vector.broadcast %cst_76 : f32 to vector<32x1xf32>
    %270 = arith.addf %266, %269 : vector<32x1xf32>
    %271 = math.rsqrt %270 : vector<32x1xf32>
    %272 = vector.broadcast %271 : vector<32x1xf32> to vector<32x32xf32>
    %273 = arith.mulf %268, %272 : vector<32x32xf32>
    %274 = arith.mulf %273, %17 : vector<32x32xf32>
    %275 = arith.addf %274, %20 : vector<32x32xf32>
    %276 = arith.truncf %275 : vector<32x32xf32> to vector<32x32xbf16>
    %cst_77 = arith.constant dense<0.000000e+00> : vector<32x32xf32>
    %277 = tpu.matmul %276, %3, %cst_77 {dimension_numbers = #tpu.dot_dimension_numbers<[1], [0], [0], [1], [0, 0, 1, 1], [], []>} : vector<32x32xbf16>, vector<32x32xbf16>, vector<32x32xf32> -> vector<32x32xf32>
    %278 = arith.addf %277, %35 : vector<32x32xf32>
    %cst_78 = arith.constant 0.000000e+00 : f32
    %279 = vector.broadcast %cst_78 : f32 to vector<32x32xf32>
    %280 = arith.maximumf %278, %279 : vector<32x32xf32>
    %281 = arith.addf %280, %255 : vector<32x32xf32>
    %cst_79 = arith.constant dense<0.000000e+00> : vector<32xf32>
    %282 = vector.multi_reduction <add>, %281, %cst_79 [1] : vector<32x32xf32> to vector<32xf32>
    %283 = vector.shape_cast %282 : vector<32xf32> to vector<32x1xf32>
    %cst_80 = arith.constant 3.200000e+01 : f32
    %284 = vector.broadcast %cst_80 : f32 to vector<32x1xf32>
    %285 = arith.divf %283, %284 : vector<32x1xf32>
    %286 = vector.broadcast %285 : vector<32x1xf32> to vector<32x32xf32>
    %287 = arith.subf %281, %286 : vector<32x32xf32>
    %288 = arith.mulf %287, %287 : vector<32x32xf32>
    %cst_81 = arith.constant dense<0.000000e+00> : vector<32xf32>
    %289 = vector.multi_reduction <add>, %288, %cst_81 [1] : vector<32x32xf32> to vector<32xf32>
    %290 = vector.shape_cast %289 : vector<32xf32> to vector<32x1xf32>
    %cst_82 = arith.constant 3.200000e+01 : f32
    %291 = vector.broadcast %cst_82 : f32 to vector<32x1xf32>
    %292 = arith.divf %290, %291 : vector<32x1xf32>
    %293 = vector.broadcast %285 : vector<32x1xf32> to vector<32x32xf32>
    %294 = arith.subf %281, %293 : vector<32x32xf32>
    %cst_83 = arith.constant 9.99999974E-6 : f32
    %295 = vector.broadcast %cst_83 : f32 to vector<32x1xf32>
    %296 = arith.addf %292, %295 : vector<32x1xf32>
    %297 = math.rsqrt %296 : vector<32x1xf32>
    %298 = vector.broadcast %297 : vector<32x1xf32> to vector<32x32xf32>
    %299 = arith.mulf %294, %298 : vector<32x32xf32>
    %300 = arith.mulf %299, %11 : vector<32x32xf32>
    %301 = arith.addf %300, %14 : vector<32x32xf32>
    %302 = vector.shape_cast %301 : vector<32x32xf32> to vector<4x8x32xf32>
    %303 = arith.truncf %302 : vector<4x8x32xf32> to vector<4x8x32xbf16>
    "tpu.trace_start"() <{level = 10 : i32, message = "bke,ben->bkn"}> : () -> ()
    %cst_84 = arith.constant dense<0.000000e+00> : vector<4x8x16xf32>
    %304 = tpu.matmul %303, %76, %cst_84 {dimension_numbers = #tpu.dot_dimension_numbers<[2], [1], [1], [2], [0, 0, 0, 1, 1, 2], [0], [0]>} : vector<4x8x32xbf16>, vector<4x32x16xbf16>, vector<4x8x16xf32> -> vector<4x8x16xf32>
    "tpu.trace_stop"() : () -> ()
    %305 = arith.addf %304, %83 : vector<4x8x16xf32>
    %cst_85 = arith.constant dense<0xFF800000> : vector<4x16xf32>
    %306 = vector.multi_reduction <maximumf>, %305, %cst_85 [1] : vector<4x8x16xf32> to vector<4x16xf32>
    %307 = vector.shape_cast %306 : vector<4x16xf32> to vector<4x1x16xf32>
    %308 = vector.broadcast %307 : vector<4x1x16xf32> to vector<4x8x16xf32>
    %309 = arith.subf %305, %308 : vector<4x8x16xf32>
    %310 = math.exp %309 : vector<4x8x16xf32>
    %cst_86 = arith.constant dense<0.000000e+00> : vector<4x16xf32>
    %311 = vector.multi_reduction <add>, %310, %cst_86 [1] : vector<4x8x16xf32> to vector<4x16xf32>
    %312 = vector.shape_cast %311 : vector<4x16xf32> to vector<4x1x16xf32>
    %313 = tpu.reciprocal %312 {approx = true} : vector<4x1x16xf32> -> vector<4x1x16xf32>
    %314 = vector.broadcast %313 : vector<4x1x16xf32> to vector<4x8x16xf32>
    %315 = arith.mulf %310, %314 : vector<4x8x16xf32>
    %cst_87 = arith.constant 9.99999993E-9 : f32
    %316 = vector.broadcast %cst_87 : f32 to vector<4x8x16xf32>
    %317 = arith.addf %315, %316 : vector<4x8x16xf32>
    %cst_88 = arith.constant dense<0.000000e+00> : vector<4x8xf32>
    %318 = vector.multi_reduction <add>, %317, %cst_88 [2] : vector<4x8x16xf32> to vector<4x8xf32>
    %319 = vector.shape_cast %318 : vector<4x8xf32> to vector<4x8x1xf32>
    %320 = vector.broadcast %319 : vector<4x8x1xf32> to vector<4x8x16xf32>
    %321 = arith.divf %317, %320 : vector<4x8x16xf32>
    %322 = arith.truncf %321 : vector<4x8x16xf32> to vector<4x8x16xbf16>
    "tpu.trace_start"() <{level = 10 : i32, message = "bkn,bnd->bkd"}> : () -> ()
    %cst_89 = arith.constant dense<0.000000e+00> : vector<4x8x32xf32>
    %323 = tpu.matmul %322, %70, %cst_89 {dimension_numbers = #tpu.dot_dimension_numbers<[2], [1], [1], [2], [0, 0, 0, 1, 1, 2], [0], [0]>} : vector<4x8x16xbf16>, vector<4x16x32xbf16>, vector<4x8x32xf32> -> vector<4x8x32xf32>
    "tpu.trace_stop"() : () -> ()
    %324 = vector.shape_cast %323 : vector<4x8x32xf32> to vector<32x32xf32>
    %325 = tpu.concatenate %324, %281 in 1 : vector<32x32xf32>, vector<32x32xf32> -> vector<32x64xf32>
    %326 = arith.truncf %325 : vector<32x64xf32> to vector<32x64xbf16>
    %cst_90 = arith.constant dense<0.000000e+00> : vector<32x128xf32>
    %327 = tpu.matmul %326, %2, %cst_90 {dimension_numbers = #tpu.dot_dimension_numbers<[1], [0], [0], [1], [0, 0, 1, 1], [], []>} : vector<32x64xbf16>, vector<64x128xbf16>, vector<32x128xf32> -> vector<32x128xf32>
    %328 = vector.extract_strided_slice %327 {offsets = [0, 0], sizes = [32, 32], strides = [1, 1]} : vector<32x128xf32> to vector<32x32xf32>
    %329 = arith.addf %328, %23 : vector<32x32xf32>
    %330 = arith.negf %329 : vector<32x32xf32>
    %331 = math.exp %330 : vector<32x32xf32>
    %cst_91 = arith.constant 1.000000e+00 : f32
    %332 = vector.broadcast %cst_91 : f32 to vector<32x32xf32>
    %333 = arith.addf %332, %331 : vector<32x32xf32>
    %334 = arith.divf %332, %333 : vector<32x32xf32>
    %335 = vector.extract_strided_slice %327 {offsets = [0, 32], sizes = [32, 32], strides = [1, 1]} : vector<32x128xf32> to vector<32x32xf32>
    %336 = arith.addf %335, %26 : vector<32x32xf32>
    %337 = arith.negf %336 : vector<32x32xf32>
    %338 = math.exp %337 : vector<32x32xf32>
    %cst_92 = arith.constant 1.000000e+00 : f32
    %339 = vector.broadcast %cst_92 : f32 to vector<32x32xf32>
    %340 = arith.addf %339, %338 : vector<32x32xf32>
    %341 = arith.divf %339, %340 : vector<32x32xf32>
    %342 = vector.extract_strided_slice %327 {offsets = [0, 64], sizes = [32, 32], strides = [1, 1]} : vector<32x128xf32> to vector<32x32xf32>
    %343 = arith.addf %342, %29 : vector<32x32xf32>
    %344 = vector.extract_strided_slice %327 {offsets = [0, 96], sizes = [32, 32], strides = [1, 1]} : vector<32x128xf32> to vector<32x32xf32>
    %345 = arith.addf %344, %32 : vector<32x32xf32>
    %346 = arith.mulf %334, %345 : vector<32x32xf32>
    %347 = arith.addf %343, %346 : vector<32x32xf32>
    %348 = math.tanh %347 : vector<32x32xf32>
    %cst_93 = arith.constant 1.000000e+00 : f32
    %349 = vector.broadcast %cst_93 : f32 to vector<32x32xf32>
    %350 = arith.subf %349, %341 : vector<32x32xf32>
    %351 = arith.mulf %350, %348 : vector<32x32xf32>
    %352 = arith.mulf %341, %281 : vector<32x32xf32>
    %353 = arith.addf %351, %352 : vector<32x32xf32>
    %cst_94 = arith.constant dense<0.000000e+00> : vector<32xf32>
    %354 = vector.multi_reduction <add>, %353, %cst_94 [1] : vector<32x32xf32> to vector<32xf32>
    %355 = vector.shape_cast %354 : vector<32xf32> to vector<32x1xf32>
    %cst_95 = arith.constant 3.200000e+01 : f32
    %356 = vector.broadcast %cst_95 : f32 to vector<32x1xf32>
    %357 = arith.divf %355, %356 : vector<32x1xf32>
    %358 = vector.broadcast %357 : vector<32x1xf32> to vector<32x32xf32>
    %359 = arith.subf %353, %358 : vector<32x32xf32>
    %360 = arith.mulf %359, %359 : vector<32x32xf32>
    %cst_96 = arith.constant dense<0.000000e+00> : vector<32xf32>
    %361 = vector.multi_reduction <add>, %360, %cst_96 [1] : vector<32x32xf32> to vector<32xf32>
    %362 = vector.shape_cast %361 : vector<32xf32> to vector<32x1xf32>
    %cst_97 = arith.constant 3.200000e+01 : f32
    %363 = vector.broadcast %cst_97 : f32 to vector<32x1xf32>
    %364 = arith.divf %362, %363 : vector<32x1xf32>
    %365 = vector.broadcast %357 : vector<32x1xf32> to vector<32x32xf32>
    %366 = arith.subf %353, %365 : vector<32x32xf32>
    %cst_98 = arith.constant 9.99999974E-6 : f32
    %367 = vector.broadcast %cst_98 : f32 to vector<32x1xf32>
    %368 = arith.addf %364, %367 : vector<32x1xf32>
    %369 = math.rsqrt %368 : vector<32x1xf32>
    %370 = vector.broadcast %369 : vector<32x1xf32> to vector<32x32xf32>
    %371 = arith.mulf %366, %370 : vector<32x32xf32>
    %372 = arith.mulf %371, %17 : vector<32x32xf32>
    %373 = arith.addf %372, %20 : vector<32x32xf32>
    %374 = arith.truncf %373 : vector<32x32xf32> to vector<32x32xbf16>
    %cst_99 = arith.constant dense<0.000000e+00> : vector<32x32xf32>
    %375 = tpu.matmul %374, %3, %cst_99 {dimension_numbers = #tpu.dot_dimension_numbers<[1], [0], [0], [1], [0, 0, 1, 1], [], []>} : vector<32x32xbf16>, vector<32x32xbf16>, vector<32x32xf32> -> vector<32x32xf32>
    %376 = arith.addf %375, %35 : vector<32x32xf32>
    %cst_100 = arith.constant 0.000000e+00 : f32
    %377 = vector.broadcast %cst_100 : f32 to vector<32x32xf32>
    %378 = arith.maximumf %376, %377 : vector<32x32xf32>
    %379 = arith.addf %378, %353 : vector<32x32xf32>
    %c0_101 = arith.constant 0 : index
    %c0_102 = arith.constant 0 : index
    %c0_103 = arith.constant 0 : index
    %380 = vector.load %arg8[%c0_101, %c0_102, %c0_103] : memref<1x32x32xf32, #tpu.memory_space<vmem>>, vector<1x32x32xf32>
    %381 = vector.shape_cast %380 : vector<1x32x32xf32> to vector<32x32xf32>
    %382 = vector.shape_cast %379 : vector<32x32xf32> to vector<1x32x32xf32>
    tpu.vector_store %arg8[%c0_101, %c0_102, %c0_103], %382 {strides = array<i32>} : memref<1x32x32xf32, #tpu.memory_space<vmem>>, vector<1x32x32xf32>,
    %383 = vector.shape_cast %317 : vector<4x8x16xf32> to vector<32x16xf32>
    %c0_104 = arith.constant 0 : index
    %c0_105 = arith.constant 0 : index
    %c0_106 = arith.constant 0 : index
    %384 = vector.load %arg9[%c0_104, %c0_105, %c0_106] : memref<1x32x16xf32, #tpu.memory_space<vmem>>, vector<1x32x16xf32>
    %385 = vector.shape_cast %384 : vector<1x32x16xf32> to vector<32x16xf32>
    %386 = vector.shape_cast %383 : vector<32x16xf32> to vector<1x32x16xf32>
    tpu.vector_store %arg9[%c0_104, %c0_105, %c0_106], %386 {strides = array<i32>} : memref<1x32x16xf32, #tpu.memory_space<vmem>>, vector<1x32x16xf32>,
    return
  }
  func.func @transform_0(%arg0: i32) -> (i32, i32, i32) {
    %c0_i32 = arith.constant 0 : i32
    %c0_i32_0 = arith.constant 0 : i32
    %c0_i32_1 = arith.constant 0 : i32
    return %arg0, %c0_i32, %c0_i32_0 : i32, i32, i32
  }
  func.func @transform_1(%arg0: i32) -> (i32, i32, i32) {
    %c0_i32 = arith.constant 0 : i32
    %c0_i32_0 = arith.constant 0 : i32
    %c0_i32_1 = arith.constant 0 : i32
    return %arg0, %c0_i32, %c0_i32_0 : i32, i32, i32
  }
  func.func @transform_2(%arg0: i32) -> (i32, i32) {
    %c0_i32 = arith.constant 0 : i32
    %c0_i32_0 = arith.constant 0 : i32
    %c0_i32_1 = arith.constant 0 : i32
    return %c0_i32, %c0_i32_0 : i32, i32
  }
  func.func @transform_3(%arg0: i32) -> (i32, i32) {
    %c0_i32 = arith.constant 0 : i32
    %c0_i32_0 = arith.constant 0 : i32
    %c0_i32_1 = arith.constant 0 : i32
    return %c0_i32, %c0_i32_0 : i32, i32
  }
  func.func @transform_4(%arg0: i32) -> (i32, i32) {
    %c0_i32 = arith.constant 0 : i32
    %c0_i32_0 = arith.constant 0 : i32
    %c0_i32_1 = arith.constant 0 : i32
    return %c0_i32, %c0_i32_0 : i32, i32
  }
  func.func @transform_5(%arg0: i32) -> (i32, i32) {
    %c0_i32 = arith.constant 0 : i32
    %c0_i32_0 = arith.constant 0 : i32
    %c0_i32_1 = arith.constant 0 : i32
    return %c0_i32, %c0_i32_0 : i32, i32
  }
  func.func @transform_6(%arg0: i32) -> (i32, i32) {
    %c0_i32 = arith.constant 0 : i32
    %c0_i32_0 = arith.constant 0 : i32
    %c0_i32_1 = arith.constant 0 : i32
    return %c0_i32, %c0_i32_0 : i32, i32
  }
  func.func @transform_7(%arg0: i32) -> (i32, i32, i32) {
    %c0_i32 = arith.constant 0 : i32
    %c0_i32_0 = arith.constant 0 : i32
    %c0_i32_1 = arith.constant 0 : i32
    return %arg0, %c0_i32, %c0_i32_0 : i32, i32, i32
  }
  func.func @transform_8(%arg0: i32) -> (i32, i32, i32) {
    %c0_i32 = arith.constant 0 : i32
    %c0_i32_0 = arith.constant 0 : i32
    %c0_i32_1 = arith.constant 0 : i32
    return %arg0, %c0_i32, %c0_i32_0 : i32, i32, i32
  }
}

</mosaic_0001>

<bundles_post_ra>
// kernel: tpu_custom_call.1
= control target key start
LH: loop header
LB: loop body
LE: loop exit
PB: predicated region body
PF: predicated region fallthrough
CT: control target
= control target key end

     0   :  { %14 = vsyncpa [#allocation3], 0  ;;  %s5606_s0 = inlined_call_operand.hbm [shape: f32[4,16,32], index: 0, kind: input, shape index: {}]   ;;  %s5607_s1 = inlined_call_operand.hbm [shape: f32[4,8,32], index: 1, kind: input, shape index: {}]   ;;  %s5608_s2 = inlined_call_operand.hbm [shape: bf16[32,64], index: 2, kind: input, shape index: {}]   ;;  %s5609_s3 = inlined_call_operand.hbm [shape: bf16[32,32], index: 3, kind: input, shape index: {}]   ;;  %s5610_s4 = inlined_call_operand.hbm [shape: bf16[64,128], index: 4, kind: input, shape index: {}]   ;;  %s5611_s5 = inlined_call_operand.hbm [shape: bf16[32,32], index: 5, kind: input, shape index: {}]   ;;  %s5612_s6 = inlined_call_operand.hbm [shape: f32[16,32], index: 6, kind: input, shape index: {}]   ;;  %s5613_s7 = inlined_call_operand.hbm [shape: f32[1,32,32], index: 7, kind: output, shape index: {0}]   ;;  %s5614_s8 = inlined_call_operand.vmem [shape: f32[1,32,16], index: 8, kind: output, shape index: {1}]  }
   0x1   :  { %15 = vsyncpa [#allocation6], 0 }
   0x2   :  { %16 = vsyncpa [#allocation9], 0 }
   0x3   :  { %17 = vsyncpa [#allocation12], 0 }
   0x4   :  { %18 = vsyncpa [#allocation4], 0  ;;  %s4637_s27 = smov [#allocation5]  }
   0x5   :  { %s36_s28 = sshll.u32 %s4637_s27, 4  ;;  %s37_s28 = int_to_ptr.vmem [resolvable:$true] %s36_s28 }
   0x6   :  { %s4475_s29 = scalar_lea.vmem %s37_s28, 512  ;;  %p4480_p1 = scmp.lt.s32.totalorder %s37_s28, %s37_s28 }
   0x7   :  { %p4476_p0 = scmp.ne.s32.totalorder %s37_s28, %s4475_s29  ;;  %p4481_p2 = scmp.lt.s32.totalorder %s4475_s29, %s4475_s29 }
   0x9   :  { %p4482_p3 = por %p4481_p2, %p4480_p1 }
   0xb   :  { %p4483_p4 = pnand %p4482_p3, %p4476_p0 }
   0xd   :  { %4486 = shalt.err (!%p4483_p4)
}
   0xe   :  { %s4638_s30 = smov 128   ;;  %s4639_s9 = smov 8  }
   0xf   :  { %42 = dma.hbm_to_vmem [thread:$0]  %s5607_s1, 512, %s37_s28, [#allocation6], %s4638_s30, %s4638_s30, %s4639_s9  }
  0x10   :  { %s4640_s12 = smov [#allocation8]   ;;  %s4641_s14 = smov [#allocation11]  }
  0x11   :  { %s60_s13 = sshll.u32 %s4640_s12, 4  ;;  %s84_s15 = sshll.u32 %s4641_s14, 4  ;;  %s61_s13 = int_to_ptr.vmem [resolvable:$true] %s60_s13  ;;  %s85_s15 = int_to_ptr.vmem [resolvable:$true] %s84_s15 }
  0x12   :  { %s4495_s16 = scalar_lea.vmem %s61_s13, 256  ;;  %p4500_p6 = scmp.lt.s32.totalorder %s61_s13, %s61_s13 }
  0x13   :  { %p4496_p5 = scmp.ne.s32.totalorder %s61_s13, %s4495_s16  ;;  %p4501_p7 = scmp.lt.s32.totalorder %s4495_s16, %s4495_s16 }
  0x15   :  { %p4502_p8 = por %p4501_p7, %p4500_p6 }
  0x17   :  { %p4503_p9 = pnand %p4502_p8, %p4496_p5 }
  0x19   :  { %4506 = shalt.err (!%p4503_p9)
}
  0x1a   :  { %s4642_s17 = smov 64   ;;  %s4643_s18 = smov 4  }
  0x1b   :  { %66 = dma.hbm_to_vmem [thread:$0]  %s5609_s3, 256, %s61_s13, [#allocation9], %s4642_s17, %s4642_s17, %s4643_s18  }
  0x1c   :  { %s4515_s1 = scalar_lea.vmem %s85_s15, 256  ;;  %p4520_p11 = scmp.lt.s32.totalorder %s85_s15, %s85_s15 }
  0x1d   :  { %p4516_p10 = scmp.ne.s32.totalorder %s85_s15, %s4515_s1  ;;  %p4521_p12 = scmp.lt.s32.totalorder %s4515_s1, %s4515_s1 }
  0x1f   :  { %p4522_p13 = por %p4521_p12, %p4520_p11 }
  0x21   :  { %p4523_p0 = pnand %p4522_p13, %p4516_p10 }
  0x23   :  { %4526 = shalt.err (!%p4523_p0)
}
  0x24   :  { %90 = dma.hbm_to_vmem [thread:$0]  %s5611_s5, 256, %s85_s15, [#allocation12], %s4642_s17, %s4642_s17, %s4643_s18  }
  0x25   :  { %s4644_s23 = smov [#allocation2]   ;;  %s4645_s25 = smov [#allocation7]  }
  0x26   :  { %s24_s24 = sshll.u32 %s4644_s23, 4  ;;  %s48_s3 = sshll.u32 %s4645_s25, 4  ;;  %s25_s24 = int_to_ptr.vmem [resolvable:$true] %s24_s24  ;;  %s49_s3 = int_to_ptr.vmem [resolvable:$true] %s48_s3 }
  0x27   :  { %s4535_s26 = scalar_lea.vmem %s25_s24, 1024  ;;  %p4540_p2 = scmp.lt.s32.totalorder %s25_s24, %s25_s24 }
  0x28   :  { %p4536_p1 = scmp.ne.s32.totalorder %s25_s24, %s4535_s26  ;;  %p4541_p3 = scmp.lt.s32.totalorder %s4535_s26, %s4535_s26 }
  0x2a   :  { %p4542_p4 = por %p4541_p3, %p4540_p2 }
  0x2c   :  { %p4543_p5 = pnand %p4542_p4, %p4536_p1 }
  0x2e   :  { %4546 = shalt.err (!%p4543_p5)
}
  0x2f   :  { %30 = dma.hbm_to_vmem [thread:$0]  %s5606_s0, 1024, %s25_s24, [#allocation3], %s4638_s30, %s4638_s30, %s4639_s9  }
  0x30   :  { %s4555_s5 = scalar_lea.vmem %s49_s3, 256  ;;  %p4560_p7 = scmp.lt.s32.totalorder %s49_s3, %s49_s3 }
  0x31   :  { %p4556_p6 = scmp.ne.s32.totalorder %s49_s3, %s4555_s5  ;;  %p4561_p8 = scmp.lt.s32.totalorder %s4555_s5, %s4555_s5 }
  0x33   :  { %p4562_p9 = por %p4561_p8, %p4560_p7 }
  0x35   :  { %p4563_p10 = pnand %p4562_p9, %p4556_p6 }
  0x37   :  { %4566 = shalt.err (!%p4563_p10)
}
  0x38   :  { %54 = dma.hbm_to_vmem [thread:$0]  %s5608_s2, 256, %s49_s3, [#allocation6], %s4642_s17, %s4642_s17, %s4643_s18  }
  0x39   :  { %s4646_s11 = smov [#allocation10]   ;;  %s4647_s13 = smov [#allocation13]  }
  0x3a   :  { %s72_s12 = sshll.u32 %s4646_s11, 4  ;;  %s96_s0 = sshll.u32 %s4647_s13, 4  ;;  %s73_s12 = int_to_ptr.vmem [resolvable:$true] %s72_s12  ;;  %s97_s0 = int_to_ptr.vmem [resolvable:$true] %s96_s0 }
  0x3b   :  { %s4575_s14 = scalar_lea.vmem %s73_s12, 512  ;;  %p4580_p12 = scmp.lt.s32.totalorder %s73_s12, %s73_s12 }
  0x3c   :  { %p4576_p11 = scmp.ne.s32.totalorder %s73_s12, %s4575_s14  ;;  %p4581_p13 = scmp.lt.s32.totalorder %s4575_s14, %s4575_s14 }
  0x3e   :  { %p4582_p0 = por %p4581_p13, %p4580_p12 }
  0x40   :  { %p4583_p1 = pnand %p4582_p0, %p4576_p11 }
  0x42   :  { %4586 = shalt.err (!%p4583_p1)
}
  0x43   :  { %78 = dma.hbm_to_vmem [thread:$0]  %s5610_s4, 512, %s73_s12, [#allocation9], %s4642_s17, %s4642_s17, %s4643_s18  }
  0x44   :  { %s4595_s2 = scalar_lea.vmem %s97_s0, 256  ;;  %p4600_p3 = scmp.lt.s32.totalorder %s97_s0, %s97_s0 }
  0x45   :  { %p4596_p2 = scmp.ne.s32.totalorder %s97_s0, %s4595_s2  ;;  %p4601_p4 = scmp.lt.s32.totalorder %s4595_s2, %s4595_s2 }
  0x47   :  { %p4602_p5 = por %p4601_p4, %p4600_p3 }
  0x49   :  { %p4603_p6 = pnand %p4602_p5, %p4596_p2 }
  0x4b   :  { %4606 = shalt.err (!%p4603_p6)
}
  0x4c   :  { %102 = dma.hbm_to_vmem [thread:$0]  %s5612_s6, 256, %s97_s0, [#allocation12], %s4638_s30, %s4638_s30, %s4639_s9  }
  0x4d   :  { %4627 = dma.done.wait [#allocation3], 1024  }
  0x4e   :  { %4628 = vsyncadd [#allocation3], 4294966272 }
  0x4f   :  { %4629 = dma.done.wait [#allocation6], 768  }
  0x50   :  { %4630 = vsyncadd [#allocation6], 4294966528 }
  0x51   :  { %4631 = dma.done.wait [#allocation9], 768  }
  0x52   :  { %4632 = vsyncadd [#allocation9], 4294966528 }
  0x53   :  { %4633 = dma.done.wait [#allocation12], 512  }
  0x54   :  { %4634 = vsyncadd [#allocation12], 4294966784  ;;  %vm203_vm0 = vcmask 261120   ;;  %v195_v0 = vld [vmem:[#allocation2] sm:$0xff]  ;;  %v197_v1 = vld [vmem:[#allocation2 + $0x10] sm:$0xff]  ;;  %s4648_s4 = smov 32  }
  0x55   :  { %v196_v2 = vld [vmem:[#allocation2 + $0x8] sm:$0xff]  ;;  %v204_v3 = vsel %vm203_vm0, %v195_v0, 0.0  ;;  %v210_v4 = vsel %vm203_vm0, %v197_v1, 0.0  ;;  %v198_v5 = vld [vmem:[#allocation2 + $0x18] sm:$0xff]  ;;  %v199_v6 = vld [vmem:[#allocation2 + $0x20] sm:$0xff]  ;;  %s4649_s6 = smov 96  }
  0x56   :  { %v200_v7 = vld [vmem:[#allocation2 + $0x28] sm:$0xff]  ;;  %205 = vadd.xlane.f32.xlu0 %v204_v3  ;;  %211 = vadd.xlane.f32.xlu1 %v210_v4  ;;  %v207_v8 = vsel %vm203_vm0, %v196_v2, 0.0  ;;  %v213_v9 = vsel %vm203_vm0, %v198_v5, 0.0  ;;  %v216_v10 = vsel %vm203_vm0, %v199_v6, 0.0  ;;  %v201_v12 = vld [vmem:[#allocation2 + $0x30] sm:$0xff]  ;;  %v202_v13 = vld [vmem:[#allocation2 + $0x38] sm:$0xff] }
  0x57   :  { %v219_v11 = vsel %vm203_vm0, %v200_v7, 0.0  ;;  %v222_v14 = vsel %vm203_vm0, %v201_v12, 0.0  ;;  %v225_v15 = vsel %vm203_vm0, %v202_v13, 0.0  ;;  %v4786_v54 = vld [vmem:[#allocation5] sm:$0xff]  ;;  %v4792_v58 = vld [vmem:[#allocation5 + $0x10] sm:$0xff]  ;;  %v4794_v59 = vld [vmem:[#allocation5 + $0x8] sm:$0xff] }
  0x58   :  { %v878_v57 = vsel %vm203_vm0, %v4786_v54, 0.0  ;;  %v884_v60 = vsel %vm203_vm0, %v4792_v58, 0.0  ;;  %v881_v61 = vsel %vm203_vm0, %v4794_v59, 0.0  ;;  %v4800_v62 = vld [vmem:[#allocation5 + $0x18] sm:$0xff]  ;;  %vm4651_vm1 = vmmov 0  }
  0x59   :  { %v887_v63 = vsel %vm203_vm0, %v4800_v62, 0.0  ;;  %vm1114_vm2 = vcmask 130048   ;;  %vm1453_vm3 = vcmask 523264  }
  0x5a   :  { %208 = vadd.xlane.f32.xlu0 %v207_v8  ;;  %214 = vadd.xlane.f32.xlu1 %v213_v9 }
  0x5e   :  { %217 = vadd.xlane.f32.xlu0 %v216_v10  ;;  %220 = vadd.xlane.f32.xlu1 %v219_v11 }
  0x62   :  { %223 = vadd.xlane.f32.xlu0 %v222_v14  ;;  %226 = vadd.xlane.f32.xlu1 %v225_v15 }
  0xdf   :  { %v206_v16 = vpop.xlane.xlu0 %205  ;;  %v212_v17 = vpop.xlane.xlu1 %211 }
  0xe0   :  { %v229_v18 = vmul.f32 0.03125, %v206_v16  ;;  %v231_v19 = vmul.f32 0.03125, %v212_v17 }
  0xe2   :  { %v4748_v20 = vsub.f32 %v195_v0, %v229_v18  ;;  %v4750_v21 = vsub.f32 %v197_v1, %v231_v19  ;;  %v4183_v0 = vld [vmem:[#allocation7 + $0x8] sm:$0xff]   ;;  %v4184_v1 = vld [vmem:[#allocation7] sm:$0xff]  }
  0xe3   :  { %v209_v22 = vpop.xlane.xlu0 %208  ;;  %v215_v23 = vpop.xlane.xlu1 %214  ;;  %3875 = vmatprep.subr.bf16.mxu0 %v4183_v0 }
  0xe4   :  { %v230_v24 = vmul.f32 0.03125, %v209_v22  ;;  %v232_v25 = vmul.f32 0.03125, %v215_v23  ;;  %v245_v26 = vmul.f32 %v4748_v20, %v4748_v20  ;;  %v247_v27 = vmul.f32 %v4750_v21, %v4750_v21  ;;  %3876 = vmatpush3.bf16.msra.mxu0 %v4183_v0 }
  0xe5   :  { %3877 = vmatprep.subr.bf16.mxu0 %v4184_v1 }
  0xe6   :  { %v4756_v28 = vsub.f32 %v196_v2, %v230_v24  ;;  %v4758_v29 = vsub.f32 %v198_v5, %v232_v25  ;;  %v253_v30 = vsel %vm203_vm0, %v245_v26, 0.0  ;;  %v259_v33 = vsel %vm203_vm0, %v247_v27, 0.0 }
  0xe7   :  { %254 = vadd.xlane.f32.xlu0 %v253_v30  ;;  %v218_v31 = vpop.xlane.xlu0 %217  ;;  %v221_v32 = vpop.xlane.xlu1 %220 }
  0xe8   :  { %v233_v34 = vmul.f32 0.03125, %v218_v31  ;;  %v234_v35 = vmul.f32 0.03125, %v221_v32  ;;  %v246_v36 = vmul.f32 %v4756_v28, %v4756_v28  ;;  %v248_v37 = vmul.f32 %v4758_v29, %v4758_v29  ;;  %3878 = vmatpush3.bf16.msra.mxu0 %v4184_v1 }
  0xea   :  { %v4766_v38 = vsub.f32 %v199_v6, %v233_v34  ;;  %v4768_v39 = vsub.f32 %v200_v7, %v234_v35  ;;  %v256_v40 = vsel %vm203_vm0, %v246_v36, 0.0  ;;  %v262_v43 = vsel %vm203_vm0, %v248_v37, 0.0 }
  0xeb   :  { %260 = vadd.xlane.f32.xlu0 %v259_v33  ;;  %257 = vadd.xlane.f32.xlu1 %v256_v40  ;;  %v224_v41 = vpop.xlane.xlu0 %223  ;;  %v227_v42 = vpop.xlane.xlu1 %226  ;;  %v3669_v33 = vld [vmem:[#allocation13] ss:$0 sm:$0xff] }
  0xec   :  { %v235_v44 = vmul.f32 0.03125, %v224_v41  ;;  %v236_v45 = vmul.f32 0.03125, %v227_v42  ;;  %v249_v46 = vmul.f32 %v4766_v38, %v4766_v38  ;;  %v250_v47 = vmul.f32 %v4768_v39, %v4768_v39 }
  0xee   :  { %v4776_v48 = vsub.f32 %v201_v12, %v235_v44  ;;  %v4778_v49 = vsub.f32 %v202_v13, %v236_v45  ;;  %v265_v50 = vsel %vm203_vm0, %v249_v46, 0.0  ;;  %v268_v51 = vsel %vm203_vm0, %v250_v47, 0.0  ;;  %v3670_v46 = vld [vmem:[#allocation13 + $0x1] ss:$0 sm:$0xff] }
  0xef   :  { %263 = vadd.xlane.f32.xlu1 %v262_v43  ;;  %266 = vadd.xlane.f32.xlu0 %v265_v50 }
  0xf0   :  { %v251_v52 = vmul.f32 %v4776_v48, %v4776_v48  ;;  %v252_v53 = vmul.f32 %v4778_v49, %v4778_v49 }
  0xf2   :  { %v271_v55 = vsel %vm203_vm0, %v251_v52, 0.0  ;;  %v274_v56 = vsel %vm203_vm0, %v252_v53, 0.0 }
  0xf3   :  { %269 = vadd.xlane.f32.xlu1 %v268_v51  ;;  %272 = vadd.xlane.f32.xlu0 %v271_v55 }
  0xf7   :  { %275 = vadd.xlane.f32.xlu1 %v274_v56  ;;  %879 = vadd.xlane.f32.xlu0 %v878_v57 }
  0xfb   :  { %885 = vadd.xlane.f32.xlu0 %v884_v60  ;;  %882 = vadd.xlane.f32.xlu1 %v881_v61 }
  0xff   :  { %888 = vadd.xlane.f32.xlu1 %v887_v63 }
 0x170   :  { %v255_v2 = vpop.xlane.xlu0 %254 }
 0x171   :  { %v277_v3 = vmul.f32 0.03125, %v255_v2 }
 0x173   :  { %v285_v4 = vadd.f32 1e-05, %v277_v3 }
 0x174   :  { %v258_v5 = vpop.xlane.xlu1 %257  ;;  %v261_v6 = vpop.xlane.xlu0 %260 }
 0x175   :  { %4193 = vrsqrt.f32 %v285_v4  ;;  %v278_v7 = vmul.f32 0.03125, %v258_v5  ;;  %v279_v8 = vmul.f32 0.03125, %v261_v6 }
 0x177   :  { %v286_v9 = vadd.f32 1e-05, %v278_v7  ;;  %v287_v10 = vadd.f32 1e-05, %v279_v8 }
 0x178   :  { %v264_v11 = vpop.xlane.xlu1 %263  ;;  %v267_v12 = vpop.xlane.xlu0 %266 }
 0x179   :  { %4195 = vrsqrt.f32 %v286_v9  ;;  %v280_v13 = vmul.f32 0.03125, %v264_v11  ;;  %v281_v14 = vmul.f32 0.03125, %v267_v12 }
 0x17a   :  { %4197 = vrsqrt.f32 %v287_v10 }
 0x17b   :  { %v288_v15 = vadd.f32 1e-05, %v280_v13  ;;  %v289_v16 = vadd.f32 1e-05, %v281_v14 }
 0x17c   :  { %v270_v17 = vpop.xlane.xlu1 %269  ;;  %v273_v18 = vpop.xlane.xlu0 %272 }
 0x17d   :  { %4199 = vrsqrt.f32 %v288_v15  ;;  %v282_v19 = vmul.f32 0.03125, %v270_v17  ;;  %v283_v22 = vmul.f32 0.03125, %v273_v18 }
 0x17e   :  { %4201 = vrsqrt.f32 %v289_v16 }
 0x17f   :  { %v290_v23 = vadd.f32 1e-05, %v282_v19  ;;  %v291_v24 = vadd.f32 1e-05, %v283_v22 }
 0x180   :  { %v276_v25 = vpop.xlane.xlu1 %275  ;;  %v880_v26 = vpop.xlane.xlu0 %879 }
 0x181   :  { %4203 = vrsqrt.f32 %v290_v23  ;;  %v284_v27 = vmul.f32 0.03125, %v276_v25  ;;  %v890_v30 = vmul.f32 0.03125, %v880_v26 }
 0x182   :  { %v4194_v31 = vpop.eup %4193  ;;  %4205 = vrsqrt.f32 %v291_v24 }
 0x183   :  { %v292_v32 = vadd.f32 1e-05, %v284_v27  ;;  %v301_v34 = vmul.f32 %v4194_v31, %v4748_v20  ;;  %v4806_v35 = vsub.f32 %v4786_v54, %v890_v30  ;;  %v4841_v30 = vld [vmem:[#allocation8] sm:$0xff]  }
 0x184   :  { %v886_v36 = vpop.xlane.xlu0 %885  ;;  %v883_v37 = vpop.xlane.xlu1 %882  ;;  %3889 = vmatprep.mubr.msk.bf16.mxu1 %vm203_vm0, %v4841_v30 }
 0x185   :  { %4207 = vrsqrt.f32 %v292_v32  ;;  %v892_v40 = vmul.f32 0.03125, %v886_v36  ;;  %v898_v41 = vmul.f32 %v4806_v35, %v4806_v35  ;;  %v313_v43 = vmul.f32 %v3669_v33, %v301_v34 }
 0x186   :  { %v4196_v42 = vpop.eup %4195  ;;  %v891_v44 = vmul.f32 0.03125, %v883_v37  ;;  %v3677_v37 = vld [vmem:[#allocation13 + $0x6] ss:$0 sm:$0xff] }
 0x187   :  { %v4198_v45 = vpop.eup %4197  ;;  %v302_v47 = vmul.f32 %v4196_v42, %v4756_v28  ;;  %v4812_v50 = vsub.f32 %v4792_v58, %v892_v40  ;;  %v902_v20 = vsel %vm203_vm0, %v898_v41, 0.0  ;;  %v325_v61 = vadd.f32 %v3670_v46, %v313_v43 }
 0x188   :  { %v303_v51 = vmul.f32 %v4198_v45, %v4750_v21  ;;  %903 = vadd.xlane.f32.xlu0 %v902_v20  ;;  %v4817_v52 = vsub.f32 %v4794_v59, %v891_v44  ;;  %v889_v53 = vpop.xlane.xlu1 %888 }
 0x189   :  { %v314_v55 = vmul.f32 %v3669_v33, %v302_v47  ;;  %v900_v56 = vmul.f32 %v4812_v50, %v4812_v50  ;;  %v893_v57 = vmul.f32 0.03125, %v889_v53 }
 0x18a   :  { %v4200_v60 = vpop.eup %4199  ;;  %v315_v28 = vmul.f32 %v3669_v33, %v303_v51  ;;  %v899_v63 = vmul.f32 %v4817_v52, %v4817_v52 }
 0x18b   :  { %v4202_v0 = vpop.eup %4201  ;;  %v326_v1 = vadd.f32 %v3670_v46, %v314_v55  ;;  %v304_v21 = vmul.f32 %v4200_v60, %v4758_v29  ;;  %v908_v2 = vsel %vm203_vm0, %v900_v56, 0.0  ;;  %v4826_v3 = vsub.f32 %v4800_v62, %v893_v57 }
 0x18c   :  { %v305_v4 = vmul.f32 %v4202_v0, %v4766_v38  ;;  %909 = vadd.xlane.f32.xlu0 %v908_v2  ;;  %v905_v5 = vsel %vm203_vm0, %v899_v63, 0.0  ;;  %v327_v10 = vadd.f32 %v3670_v46, %v315_v28 }
 0x18d   :  { %v333_v6 = vpack.c.bf16 %v326_v1, %v325_v61  ;;  %v316_v7 = vmul.f32 %v3669_v33, %v304_v21  ;;  %906 = vadd.xlane.f32.xlu1 %v905_v5  ;;  %v901_v8 = vmul.f32 %v4826_v3, %v4826_v3  ;;  %v4186_v5 = vld [vmem:[#allocation8 + $0x8] sm:$0xff]  }
 0x18e   :  { %v4204_v9 = vpop.eup %4203  ;;  %v317_v13 = vmul.f32 %v3669_v33, %v305_v4 }
 0x18f   :  { %v4206_v11 = vpop.eup %4205  ;;  %3879 = vmatprep.mubr.msk.bf16.mxu0 %vm203_vm0, %v333_v6  ;;  %v328_v29 = vadd.f32 %v3670_v46, %v316_v7  ;;  %v306_v12 = vmul.f32 %v4204_v9, %v4768_v39  ;;  %v911_v38 = vsel %vm203_vm0, %v901_v8, 0.0 }
 0x190   :  { %v307_v14 = vmul.f32 %v4206_v11, %v4776_v48  ;;  %v329_v18 = vadd.f32 %v3670_v46, %v317_v13  ;;  %v3678_v48 = vld [vmem:[#allocation13 + $0x7] ss:$0 sm:$0xff] }
 0x191   :  { %v334_v15 = vpack.c.bf16 %v328_v29, %v327_v10  ;;  %v318_v16 = vmul.f32 %v3669_v33, %v306_v12  ;;  %912 = vadd.xlane.f32.xlu1 %v911_v38  ;;  %v4650_v38 = vmov 0.0  }
 0x192   :  { %v4208_v17 = vpop.eup %4207  ;;  %v319_v23 = vmul.f32 %v3669_v33, %v307_v14 }
 0x193   :  { %3880 = vmatmul.mubr.msk.bf16.vlgmr.msra.gmra.mxu0 %vm203_vm0, %v334_v15  ;;  %v330_v19 = vadd.f32 %v3670_v46, %v318_v16  ;;  %v308_v22 = vmul.f32 %v4208_v17, %v4778_v49  ;;  %v149_v15 = vld [vmem:[#allocation13 + $0x8] sm:$0x1] }
 0x194   :  { %v331_v39 = vadd.f32 %v3670_v46, %v319_v23 }
 0x195   :  { %v335_v24 = vpack.c.bf16 %v330_v19, %v329_v18  ;;  %v320_v25 = vmul.f32 %v3669_v33, %v308_v22 }
 0x197   :  { %3883 = vmatprep.mubr.msk.bf16.mxu0 %vm203_vm0, %v335_v24  ;;  %v332_v26 = vadd.f32 %v3670_v46, %v320_v25 }
 0x199   :  { %v336_v27 = vpack.c.bf16 %v332_v26, %v331_v39 }
 0x19b   :  { %3884 = vmatmul.mubr.msk.bf16.gmra.mxu0 %vm203_vm0, %v336_v27 }
 0x19c   :  { %3901 = vmatprep.mubr.msk.bf16.mxu0 %vm203_vm0, %v4841_v30 }
 0x1a2   :  { %443 = vrot.lane.b32.xlu0 %v3678_v48, %s4648_s4 }
 0x211   :  { %v4847_v49 = vpop.xlane.xlu0 %903 }
 0x215   :  { %v4849_v31 = vpop.xlane.xlu0 %909 }
 0x216   :  { %v907_v17 = vpop.xlane.xlu1 %906  ;;  %v916_v19 = vmul.f32 0.03125, %v4849_v31  ;;  %v3661_v31 = vld [vmem:[#allocation13 + $0x3] ss:$0 sm:$0xff] }
 0x217   :  { %v915_v18 = vmul.f32 0.03125, %v907_v17 }
 0x218   :  { %v920_v23 = vadd.f32 1e-05, %v916_v19 }
 0x219   :  { %v444_v33 = vpop.permute.xlu0 %443  ;;  %v919_v22 = vadd.f32 1e-05, %v915_v18 }
 0x21a   :  { %v913_v24 = vpop.xlane.xlu1 %912 }
 0x21b   :  { %v917_v25 = vmul.f32 0.03125, %v913_v24 }
 0x21d   :  { %v921_v39 = vadd.f32 1e-05, %v917_v25 }
 0x253   :  { %v3881_v32 = vpop.f32.mrf.mxu0 }
 0x254   :  { %v448_v40 = vadd.f32 %v3881_v32, %v444_v33  ;;  %v432_v53 = vadd.f32 %v3881_v32, %v3677_v37 }
 0x255   :  { %v395_v34 = vpop.f32.mrf.mxu0 }
 0x256   :  { %v430_v42 = vadd.f32 %v3677_v37, %v395_v34  ;;  %v4851_v43 = vadd.f32 %v444_v33, %v395_v34 }
 0x257   :  { %v3882_v36 = vpop.f32.mrf.mxu0 }
 0x258   :  { %v449_v41 = vadd.f32 %v3882_v36, %v444_v33  ;;  %v433_v45 = vadd.f32 %v3882_v36, %v3677_v37 }
 0x259   :  { %v398_v44 = vpop.f32.mrf.mxu0 }
 0x25a   :  { %v455_v46 = vpack.c.bf16 %v449_v41, %v448_v40  ;;  %v431_v47 = vadd.f32 %v3677_v37, %v398_v44  ;;  %v4853_v20 = vadd.f32 %v444_v33, %v398_v44  ;;  %v459_v60 = vpack.c.bf16 %v433_v45, %v432_v53 }
 0x25b   :  { %v3885_v51 = vpop.f32.mrf.mxu0 }
 0x25c   :  { %v454_v55 = vpack.c.bf16 %v4853_v20, %v4851_v43  ;;  %1267 = vrot.lane.b32.xlu0 %v455_v46, %s4649_s6  ;;  %v458_v56 = vpack.c.bf16 %v431_v47, %v430_v42  ;;  %v436_v6 = vadd.f32 %v3885_v51, %v3677_v37  ;;  %v452_v10 = vadd.f32 %v3885_v51, %v444_v33 }
 0x25d   :  { %v411_v57 = vpop.f32.mrf.mxu0  ;;  %v531_v29 = vsel %vm203_vm0, %v459_v60, 0 }
 0x25e   :  { %4163 = vmatprep.subr.msk.bf16.mxu1 %vm203_vm0, %v458_v56  ;;  %v479_v61 = vsel %vm203_vm0, %v458_v56, 0  ;;  %v434_v63 = vadd.f32 %v3677_v37, %v411_v57  ;;  %v450_v1 = vadd.f32 %v444_v33, %v411_v57 }
 0x25f   :  { %v3886_v28 = vpop.f32.mrf.mxu0  ;;  %3888 = vmatpush3.bf16.xpose.msra.mxu1 %v479_v61 }
 0x260   :  { %4164 = vmatprep.subr.msk.bf16.mxu1 %vm203_vm0, %v459_v60  ;;  %v437_v21 = vadd.f32 %v3886_v28, %v3677_v37  ;;  %v453_v7 = vadd.f32 %v3886_v28, %v444_v33 }
 0x261   :  { %v414_v0 = vpop.f32.mrf.mxu0 }
 0x262   :  { %v435_v2 = vadd.f32 %v3677_v37, %v414_v0  ;;  %v451_v4 = vadd.f32 %v444_v33, %v414_v0  ;;  %v461_v11 = vpack.c.bf16 %v437_v21, %v436_v6  ;;  %v457_v13 = vpack.c.bf16 %v453_v7, %v452_v10 }
 0x264   :  { %v456_v8 = vpack.c.bf16 %v451_v4, %v450_v1  ;;  %v460_v9 = vpack.c.bf16 %v435_v2, %v434_v63  ;;  %v635_v14 = vsel %vm203_vm0, %v461_v11, 0 }
 0x266   :  { %3890 = vmatmul.mubr.msk.bf16.vlgmr.msra.gmra.mxu1 %vm203_vm0, %v4186_v5  ;;  %1314 = vrot.lane.b32.xlu0 %v456_v8, %s4649_s6  ;;  %v583_v12 = vsel %vm203_vm0, %v460_v9, 0 }
 0x267   :  { %4165 = vmatprep.subr.msk.bf16.mxu0 %vm203_vm0, %v460_v9  ;;  %3894 = vmatpush3.bf16.xpose.msra.mxu1 %v531_v29 }
 0x268   :  { %3900 = vmatpush3.bf16.xpose.msra.mxu0 %v583_v12  ;;  %4166 = vmatprep.subr.msk.bf16.mxu1 %vm203_vm0, %v461_v11 }
 0x269   :  { %3895 = vmatprep.mubr.msk.bf16.mxu1 %vm203_vm0, %v4841_v30  ;;  %3911 = vmatprep.subr.bf16.mxu0 %v4650_v38 }
 0x26a   :  { %1361 = vrot.lane.b32.xlu0 %v457_v13, %s4649_s6 }
 0x26e   :  { %3896 = vmatmul.mubr.msk.bf16.vlgmr.msra.gmra.mxu1 %vm203_vm0, %v4186_v5  ;;  %1413 = vrot.lane.b32.xlu0 %v4794_v59, %s4648_s4  ;;  %v694_v59 = vpack.c.bf16 %v149_v15, %v149_v15 }
 0x26f   :  { %3902 = vmatmul.mubr.msk.bf16.vlgmr.msra.gmra.mxu0 %vm203_vm0, %v4186_v5  ;;  %3906 = vmatpush3.bf16.xpose.msra.mxu1 %v635_v14 }
 0x270   :  { %3912 = vmatpush3.bf16.xpose.msra.mxu0 %v479_v61  ;;  %3907 = vmatprep.mubr.msk.bf16.mxu1 %vm203_vm0, %v4841_v30  ;;  %v3660_v30 = vld [vmem:[#allocation13 + $0x2] ss:$0 sm:$0xff] }
 0x271   :  { %3913 = vmatprep.mubr.msk.bf16.mxu0 %vm4651_vm1, %v4650_v38  ;;  %3917 = vmatprep.subr.bf16.mxu1 %v4650_v38 }
 0x272   :  { %3923 = vmatprep.subr.bf16.mxu0 %v4650_v38  ;;  %1417 = vrot.lane.b32.xlu0 %v4800_v62, %s4648_s4  ;;  %v914_v62 = vmul.f32 0.03125, %v4847_v49 }
 0x274   :  { %v918_v16 = vadd.f32 1e-05, %v914_v62 }
 0x276   :  { %3908 = vmatmul.mubr.msk.bf16.vlgmr.msra.gmra.mxu1 %vm203_vm0, %v4186_v5  ;;  %4209 = vrsqrt.f32 %v918_v16 }
 0x277   :  { %3914 = vmatmul.mubr.msk.bf16.vlgmr.msra.gmra.mxu0 %vm203_vm0, %v694_v59  ;;  %3918 = vmatpush3.bf16.xpose.msra.mxu1 %v531_v29  ;;  %4211 = vrsqrt.f32 %v919_v22 }
 0x278   :  { %3924 = vmatpush3.bf16.xpose.msra.mxu0 %v583_v12  ;;  %3919 = vmatprep.mubr.msk.bf16.mxu1 %vm4651_vm1, %v4650_v38  ;;  %4213 = vrsqrt.f32 %v920_v23 }
 0x279   :  { %3929 = vmatprep.subr.bf16.mxu1 %v4650_v38  ;;  %3925 = vmatprep.mubr.msk.bf16.mxu0 %vm4651_vm1, %v4650_v38  ;;  %4215 = vrsqrt.f32 %v921_v39 }
 0x27a   :  { %3935 = vmatprep.subr.bf16.mxu0 %v4650_v38 }
 0x27e   :  { %3920 = vmatmul.mubr.msk.bf16.vlgmr.msra.gmra.mxu1 %vm203_vm0, %v694_v59 }
 0x27f   :  { %3930 = vmatpush3.bf16.xpose.msra.mxu1 %v635_v14  ;;  %3926 = vmatmul.mubr.msk.bf16.vlgmr.msra.gmra.mxu0 %vm203_vm0, %v694_v59 }
 0x280   :  { %3931 = vmatprep.mubr.msk.bf16.mxu1 %vm4651_vm1, %v4650_v38  ;;  %3939 = vmatprep.mubr.msk.bf16.mxu0 %vm4651_vm1, %v4650_v38 }
 0x281   :  { %3943 = vmatprep.subr.bf16.mxu1 %v4650_v38 }
 0x283   :  { %v4210_v26 = vpop.eup %4209 }
 0x284   :  { %v926_v48 = vmul.f32 %v4210_v26, %v4806_v35  ;;  %v4212_v34 = vpop.eup %4211 }
 0x285   :  { %v4214_v37 = vpop.eup %4213  ;;  %v927_v44 = vmul.f32 %v4212_v34, %v4817_v52 }
 0x286   :  { %3932 = vmatmul.mubr.msk.bf16.vlgmr.msra.gmra.mxu1 %vm203_vm0, %v694_v59  ;;  %v930_v33 = vmul.f32 %v3660_v30, %v926_v48  ;;  %v928_v46 = vmul.f32 %v4214_v37, %v4812_v50  ;;  %v4216_v60 = vpop.eup %4215 }
 0x287   :  { %3947 = vmatprep.mubr.msk.bf16.mxu1 %vm4651_vm1, %v4650_v38  ;;  %v931_v57 = vmul.f32 %v3660_v30, %v927_v44  ;;  %v929_v2 = vmul.f32 %v4216_v60, %v4826_v3 }
 0x288   :  { %v934_v42 = vadd.f32 %v3661_v31, %v930_v33  ;;  %v932_v63 = vmul.f32 %v3660_v30, %v928_v46 }
 0x289   :  { %v935_v21 = vadd.f32 %v3661_v31, %v931_v57  ;;  %v933_v29 = vmul.f32 %v3660_v30, %v929_v2 }
 0x28a   :  { %v938_v56 = vpack.c.bf16 %v934_v42, %v934_v42  ;;  %v936_v5 = vadd.f32 %v3661_v31, %v932_v63 }
 0x28b   :  { %v939_v11 = vpack.c.bf16 %v935_v21, %v935_v21  ;;  %v937_v59 = vadd.f32 %v3661_v31, %v933_v29 }
 0x28c   :  { %v940_v12 = vpack.c.bf16 %v936_v5, %v936_v5 }
 0x28d   :  { %v941_v22 = vpack.c.bf16 %v937_v59, %v937_v59 }
 0x2ce   :  { %v4949_v25 = vpop.permute.xlu0 %1267 }
 0x2d8   :  { %v4990_v43 = vpop.permute.xlu0 %1314 }
 0x326   :  { %v3891_v27 = vpop.f32.mrf.mxu1 }
 0x328   :  { %v515_v49 = vpop.f32.mrf.mxu1 }
 0x32a   :  { %v3892_v32 = vpop.f32.mrf.mxu1 }
 0x32b   :  { %v4905_v36 = vpack.c.bf16 %v3892_v32, %v3891_v27  ;;  %v858_v32 = vlaneseq }
 0x32c   :  { %v518_v40 = vpop.f32.mrf.mxu1 }
 0x32d   :  { %3936 = vmatpush3.bf16.msra.mxu0 %v4905_v36  ;;  %v4910_v45 = vpack.c.bf16 %v518_v40, %v515_v49  ;;  %v859_v33 = vshrl.u32 %v858_v32, 7 }
 0x32e   :  { %v3897_v41 = vpop.f32.mrf.mxu1  ;;  %3937 = vmatprep.subr.bf16.mxu0 %v4650_v38 }
 0x32f   :  { %v3903_v35 = vpop.f32.mrf.mxu0  ;;  %v860_v34 = vsub.s32 0, %v859_v33 }
 0x330   :  { %v567_v47 = vpop.f32.mrf.mxu1 }
 0x331   :  { %v619_v51 = vpop.f32.mrf.mxu0  ;;  %3938 = vmatpush3.bf16.msra.mxu0 %v4910_v45 }
 0x332   :  { %v3898_v53 = vpop.f32.mrf.mxu1  ;;  %3951 = vmatprep.subr.bf16.mxu0 %v4650_v38 }
 0x333   :  { %v4915_v61 = vpack.c.bf16 %v3898_v53, %v3897_v41  ;;  %v3904_v28 = vpop.f32.mrf.mxu0 }
 0x334   :  { %v4917_v52 = vpack.c.bf16 %v3904_v28, %v3903_v35  ;;  %v570_v0 = vpop.f32.mrf.mxu1  ;;  %3940 = vmatmul.mubr.msk.bf16.vlgmr.msra.gmra.mxu0 %vm203_vm0, %v938_v56 }
 0x335   :  { %v622_v50 = vpop.f32.mrf.mxu0  ;;  %3944 = vmatpush3.bf16.msra.mxu1 %v4915_v61  ;;  %3955 = vmatprep.mubr.msk.bf16.mxu0 %vm4651_vm1, %v4650_v38  ;;  %v4926_v4 = vpack.c.bf16 %v570_v0, %v567_v47 }
 0x336   :  { %3952 = vmatpush3.bf16.msra.mxu0 %v4917_v52  ;;  %v3909_v1 = vpop.f32.mrf.mxu1  ;;  %3945 = vmatprep.subr.bf16.mxu1 %v4650_v38  ;;  %v4929_v7 = vpack.c.bf16 %v622_v50, %v619_v51 }
 0x337   :  { %3953 = vmatprep.subr.bf16.mxu0 %v4650_v38  ;;  %v732_v6 = vpop.f32.mrf.mxu0 }
 0x338   :  { %v671_v8 = vpop.f32.mrf.mxu1  ;;  %v4956_v31 = vrot.slane %v732_v6, %v860_v34 }
 0x339   :  { %3946 = vmatpush3.bf16.msra.mxu1 %v4926_v4  ;;  %v3915_v9 = vpop.f32.mrf.mxu0 }
 0x33a   :  { %3954 = vmatpush3.bf16.msra.mxu0 %v4929_v7  ;;  %v3910_v10 = vpop.f32.mrf.mxu1  ;;  %3959 = vmatprep.subr.bf16.mxu1 %v4650_v38 }
 0x33b   :  { %v4934_v3 = vpack.c.bf16 %v3910_v10, %v3909_v1  ;;  %v735_v13 = vpop.f32.mrf.mxu0  ;;  %3967 = vmatprep.subr.bf16.mxu0 %v4650_v38 }
 0x33c   :  { %v674_v14 = vpop.f32.mrf.mxu1  ;;  %3948 = vmatmul.mubr.msk.bf16.vlgmr.msra.gmra.mxu1 %vm203_vm0, %v939_v11 }
 0x33d   :  { %3956 = vmatmul.mubr.msk.bf16.vlgmr.msra.gmra.mxu0 %vm203_vm0, %v940_v12  ;;  %3960 = vmatpush3.bf16.msra.mxu1 %v4934_v3  ;;  %v3916_v15 = vpop.f32.mrf.mxu0  ;;  %v4943_v16 = vpack.c.bf16 %v674_v14, %v671_v8 }
 0x33e   :  { %3961 = vmatprep.subr.bf16.mxu1 %v4650_v38  ;;  %3963 = vmatprep.mubr.msk.bf16.mxu1 %vm4651_vm1, %v4650_v38  ;;  %v772_v62 = vpop.f32.mrf.mxu1 }
 0x33f   :  { %v812_v17 = vpop.f32.mrf.mxu0  ;;  %3969 = vmatprep.mubr.msk.bf16.mxu0 %vm4651_vm1, %v4650_v38  ;;  %v4960_v51 = vrot.slane %v772_v62, %v860_v34 }
 0x340   :  { %v3921_v18 = vpop.f32.mrf.mxu1  ;;  %v4962_v53 = vrot.slane %v812_v17, %v860_v34 }
 0x341   :  { %3962 = vmatpush3.bf16.msra.mxu1 %v4943_v16  ;;  %v3927_v19 = vpop.f32.mrf.mxu0 }
 0x342   :  { %3973 = vmatprep.subr.bf16.mxu1 %v4650_v38  ;;  %v775_v23 = vpop.f32.mrf.mxu1 }
 0x343   :  { %v815_v24 = vpop.f32.mrf.mxu0 }
 0x344   :  { %3964 = vmatmul.mubr.msk.bf16.vlgmr.msra.gmra.mxu1 %vm203_vm0, %v941_v22  ;;  %v3922_v39 = vpop.f32.mrf.mxu1 }
 0x345   :  { %3974 = vmatpush3.bf16.msra.mxu1 %v4949_v25  ;;  %v3928_v26 = vpop.f32.mrf.mxu0  ;;  %3975 = vmatprep.mubr.msk.bf16.mxu1 %vm4651_vm1, %v4650_v38 }
 0x346   :  { %v852_v27 = vpop.f32.mrf.mxu1  ;;  %3985 = vmatprep.subr.bf16.mxu1 %v4650_v38 }
 0x347   :  { %v4968_v13 = vrot.slane %v852_v27, %v860_v34 }
 0x348   :  { %v3933_v48 = vpop.f32.mrf.mxu1 }
 0x34a   :  { %v855_v30 = vpop.f32.mrf.mxu1 }
 0x34c   :  { %v3934_v49 = vpop.f32.mrf.mxu1 }
 0x3f4   :  { %v979_v37 = vpop.f32.mrf.mxu0 }
 0x3f5   :  { %v980_v40 = vadd.f32 %v979_v37, %v4956_v31 }
 0x3f6   :  { %v3941_v41 = vpop.f32.mrf.mxu0 }
 0x3f7   :  { %v1115_v42 = vsel %vm1114_vm2, %v980_v40, -inf }
 0x3f8   :  { %v1116_v44 = vrot.slane %v1115_v42, 4  ;;  %v982_v35 = vpop.f32.mrf.mxu0 }
 0x3fa   :  { %v1117_v46 = vmax.f32 %v1115_v42, %v1116_v44  ;;  %v3942_v47 = vpop.f32.mrf.mxu0 }
 0x3fc   :  { %v1118_v56 = vrot.slane %v1117_v46, 2  ;;  %v1022_v57 = vpop.f32.mrf.mxu1 }
 0x3fd   :  { %v1023_v60 = vadd.f32 %v1022_v57, %v4960_v51  ;;  %v1065_v28 = vpop.f32.mrf.mxu0 }
 0x3fe   :  { %v1119_v63 = vmax.f32 %v1117_v46, %v1118_v56  ;;  %v1066_v0 = vadd.f32 %v1065_v28, %v4962_v53  ;;  %v3949_v50 = vpop.f32.mrf.mxu1 }
 0x3ff   :  { %v1122_v1 = vsel %vm1114_vm2, %v1023_v60, -inf  ;;  %v3957_v21 = vpop.f32.mrf.mxu0 }
 0x400   :  { %v1120_v2 = vrot.slane %v1119_v63, 1  ;;  %v1123_v5 = vrot.slane %v1122_v1, 4  ;;  %v1129_v6 = vsel %vm1114_vm2, %v1066_v0, -inf  ;;  %v1025_v8 = vpop.f32.mrf.mxu1 }
 0x401   :  { %v1130_v9 = vrot.slane %v1129_v6, 4  ;;  %v1068_v10 = vpop.f32.mrf.mxu0 }
 0x402   :  { %v1121_v11 = vmax.f32 %v1119_v63, %v1120_v2  ;;  %v1124_v29 = vmax.f32 %v1122_v1, %v1123_v5  ;;  %v3950_v12 = vpop.f32.mrf.mxu1 }
 0x403   :  { %v1131_v14 = vmax.f32 %v1129_v6, %v1130_v9  ;;  %v3958_v15 = vpop.f32.mrf.mxu0 }
 0x404   :  { %v1143_v59 = vsub.f32 %v980_v40, %v1121_v11  ;;  %v1125_v62 = vrot.slane %v1124_v29, 2  ;;  %v1108_v17 = vpop.f32.mrf.mxu1 }
 0x405   :  { %v1132_v18 = vrot.slane %v1131_v14, 2  ;;  %v1109_v19 = vadd.f32 %v1108_v17, %v4968_v13 }
 0x406   :  { %v1147_v22 = vmul.f32 1.442695, %v1143_v59  ;;  %v1126_v23 = vmax.f32 %v1124_v29, %v1125_v62  ;;  %v3965_v24 = vpop.f32.mrf.mxu1 }
 0x407   :  { %v1133_v39 = vmax.f32 %v1131_v14, %v1132_v18  ;;  %v1136_v26 = vsel %vm1114_vm2, %v1109_v19, -inf }
 0x408   :  { %4217 = vpow2.f32 %v1147_v22  ;;  %v1127_v48 = vrot.slane %v1126_v23, 1  ;;  %v1137_v30 = vrot.slane %v1136_v26, 4  ;;  %v1111_v49 = vpop.f32.mrf.mxu1 }
 0x409   :  { %v1134_v27 = vrot.slane %v1133_v39, 1 }
 0x40a   :  { %v1128_v32 = vmax.f32 %v1126_v23, %v1127_v48  ;;  %v1138_v33 = vmax.f32 %v1136_v26, %v1137_v30  ;;  %v3966_v34 = vpop.f32.mrf.mxu1 }
 0x40b   :  { %v1135_v37 = vmax.f32 %v1133_v39, %v1134_v27 }
 0x40c   :  { %v1144_v40 = vsub.f32 %v1023_v60, %v1128_v32  ;;  %v1139_v41 = vrot.slane %v1138_v33, 2 }
 0x40d   :  { %v1145_v42 = vsub.f32 %v1066_v0, %v1135_v37 }
 0x40e   :  { %v1149_v44 = vmul.f32 1.442695, %v1144_v40  ;;  %v1140_v35 = vmax.f32 %v1138_v33, %v1139_v41 }
 0x40f   :  { %v1151_v46 = vmul.f32 1.442695, %v1145_v42 }
 0x410   :  { %4219 = vpow2.f32 %v1149_v44  ;;  %v1141_v47 = vrot.slane %v1140_v35, 1 }
 0x411   :  { %4221 = vpow2.f32 %v1151_v46 }
 0x412   :  { %v1142_v56 = vmax.f32 %v1140_v35, %v1141_v47 }
 0x414   :  { %v1146_v57 = vsub.f32 %v1109_v19, %v1142_v56 }
 0x415   :  { %v4218_v28 = vpop.eup %4217 }
 0x416   :  { %v1155_v63 = vsel %vm1114_vm2, %v4218_v28, 0.0  ;;  %v1153_v50 = vmul.f32 1.442695, %v1146_v57 }
 0x417   :  { %v1156_v1 = vrot.slane %v1155_v63, 4 }
 0x418   :  { %4223 = vpow2.f32 %v1153_v50 }
 0x419   :  { %v1157_v21 = vadd.f32 %v1156_v1, %v1155_v63 }
 0x41b   :  { %v1158_v2 = vrot.slane %v1157_v21, 2 }
 0x41d   :  { %v4220_v5 = vpop.eup %4219  ;;  %v1159_v60 = vadd.f32 %v1158_v2, %v1157_v21 }
 0x41e   :  { %v4222_v6 = vpop.eup %4221  ;;  %v1162_v0 = vsel %vm1114_vm2, %v4220_v5, 0.0 }
 0x41f   :  { %v1163_v8 = vrot.slane %v1162_v0, 4  ;;  %v1169_v9 = vsel %vm1114_vm2, %v4222_v6, 0.0  ;;  %v1160_v10 = vrot.slane %v1159_v60, 1 }
 0x420   :  { %v1170_v11 = vrot.slane %v1169_v9, 4 }
 0x421   :  { %v1164_v29 = vadd.f32 %v1163_v8, %v1162_v0  ;;  %v1161_v12 = vadd.f32 %v1160_v10, %v1159_v60 }
 0x422   :  { %v1171_v14 = vadd.f32 %v1170_v11, %v1169_v9  ;;  %v4998_v11 = vpop.permute.xlu0 %1361 }
 0x423   :  { %v1165_v15 = vrot.slane %v1164_v29, 2  ;;  %4225 = vrcp.f32 %v1161_v12 }
 0x424   :  { %v1172_v59 = vrot.slane %v1171_v14, 2 }
 0x425   :  { %v4224_v62 = vpop.eup %4223  ;;  %v1166_v17 = vadd.f32 %v1165_v15, %v1164_v29 }
 0x426   :  { %v1176_v18 = vsel %vm1114_vm2, %v4224_v62, 0.0  ;;  %v1173_v19 = vadd.f32 %v1172_v59, %v1171_v14 }
 0x427   :  { %v1177_v22 = vrot.slane %v1176_v18, 4  ;;  %v1167_v23 = vrot.slane %v1166_v17, 1 }
 0x428   :  { %v1174_v24 = vrot.slane %v1173_v19, 1 }
 0x429   :  { %v1178_v39 = vadd.f32 %v1177_v22, %v1176_v18  ;;  %v1168_v26 = vadd.f32 %v1167_v23, %v1166_v17  ;;  %v4189_v17 = vld [vmem:[#allocation10 + $0x8] sm:$0xff]   ;;  %v4190_v18 = vld [vmem:[#allocation10] sm:$0xff]  }
 0x42a   :  { %v1175_v48 = vadd.f32 %v1174_v24, %v1173_v19  ;;  %v3667_v19 = vld [vmem:[#allocation13 + $0xc] ss:$0 sm:$0xff]  ;;  %v5010_v24 = vpop.permute.xlu0 %1413 }
 0x42b   :  { %v1179_v30 = vrot.slane %v1178_v39, 2  ;;  %4227 = vrcp.f32 %v1168_v26 }
 0x42c   :  { %4229 = vrcp.f32 %v1175_v48 }
 0x42d   :  { %v1180_v49 = vadd.f32 %v1179_v30, %v1178_v39 }
 0x42f   :  { %v1181_v27 = vrot.slane %v1180_v49, 1 }
 0x430   :  { %v4226_v32 = vpop.eup %4225 }
 0x431   :  { %v1187_v33 = vmul.f32 %v4226_v32, %v4218_v28  ;;  %v1182_v34 = vadd.f32 %v1181_v27, %v1180_v49 }
 0x433   :  { %v1191_v37 = vadd.f32 1e-08, %v1187_v33  ;;  %4231 = vrcp.f32 %v1182_v34 }
 0x435   :  { %v1195_v40 = vsel %vm1114_vm2, %v1191_v37, 0.0 }
 0x436   :  { %1196 = vadd.xlane.f32.xlu1 %v1195_v40 }
 0x438   :  { %v4228_v41 = vpop.eup %4227 }
 0x439   :  { %v4230_v42 = vpop.eup %4229  ;;  %v1188_v44 = vmul.f32 %v4228_v41, %v4220_v5 }
 0x43a   :  { %v1189_v35 = vmul.f32 %v4230_v42, %v4222_v6  ;;  %v5019_v42 = vpop.permute.xlu0 %1417 }
 0x43b   :  { %v1192_v46 = vadd.f32 1e-08, %v1188_v44 }
 0x43c   :  { %v1193_v56 = vadd.f32 1e-08, %v1189_v35 }
 0x43d   :  { %v1198_v47 = vsel %vm1114_vm2, %v1192_v46, 0.0 }
 0x43e   :  { %1199 = vadd.xlane.f32.xlu1 %v1198_v47  ;;  %v1201_v63 = vsel %vm1114_vm2, %v1193_v56, 0.0 }
 0x440   :  { %v4232_v57 = vpop.eup %4231 }
 0x441   :  { %v1190_v50 = vmul.f32 %v4232_v57, %v4224_v62  ;;  %v4188_v62 = vld [vmem:[#allocation10 + $0x10] sm:$0xff]  }
 0x442   :  { %1202 = vadd.xlane.f32.xlu1 %v1201_v63 }
 0x443   :  { %v1194_v28 = vadd.f32 1e-08, %v1190_v50 }
 0x445   :  { %v1204_v1 = vsel %vm1114_vm2, %v1194_v28, 0.0 }
 0x446   :  { %1205 = vadd.xlane.f32.xlu1 %v1204_v1 }
 0x457   :  { %1220 = vrot.lane.b32.xlu1 %v454_v55, %s4649_s6 }
 0x45b   :  { %1411 = vrot.lane.b32.xlu1 %v4786_v54, %s4648_s4 }
 0x45f   :  { %1415 = vrot.lane.b32.xlu1 %v4792_v58, %s4648_s4  ;;  %v4187_v58 = vld [vmem:[#allocation10 + $0x18] sm:$0xff]  }
 0x463   :  { %1578 = vrot.lane.b32.xlu1 %v3667_v19, %s4649_s6 }
 0x4bf   :  { %v1197_v21 = vpop.xlane.xlu1 %1196 }
 0x4c0   :  { %4233 = vrcp.f32 %v1197_v21 }
 0x4c7   :  { %v1200_v2 = vpop.xlane.xlu1 %1199 }
 0x4c8   :  { %4235 = vrcp.f32 %v1200_v2 }
 0x4cb   :  { %v1203_v5 = vpop.xlane.xlu1 %1202 }
 0x4cc   :  { %4237 = vrcp.f32 %v1203_v5 }
 0x4cd   :  { %v4234_v60 = vpop.eup %4233 }
 0x4ce   :  { %v1208_v0 = vmul.f32 %v4234_v60, %v1191_v37 }
 0x4cf   :  { %v1206_v6 = vpop.xlane.xlu1 %1205 }
 0x4d0   :  { %4239 = vrcp.f32 %v1206_v6  ;;  %v1215_v20 = vpack.c.bf16 %v1208_v0, %v1208_v0 }
 0x4d3   :  { %v4988_v8 = vpop.permute.xlu1 %1220 }
 0x4d4   :  { %3968 = vmatpush3.bf16.msra.mxu0 %v4988_v8 }
 0x4d5   :  { %v4236_v54 = vpop.eup %4235  ;;  %3979 = vmatprep.subr.bf16.mxu0 %v4650_v38 }
 0x4d6   :  { %v1210_v55 = vmul.f32 %v4236_v54, %v1192_v46 }
 0x4d7   :  { %3970 = vmatmul.mubr.msk.bf16.vlgmr.msra.gmra.mxu0 %vm1114_vm2, %v1215_v20  ;;  %v5008_v23 = vpop.permute.xlu1 %1411 }
 0x4d8   :  { %3980 = vmatpush3.bf16.msra.mxu0 %v4990_v43  ;;  %v1216_v9 = vpack.c.bf16 %v1210_v55, %v1210_v55  ;;  %3981 = vmatprep.mubr.msk.bf16.mxu0 %vm4651_vm1, %v4650_v38 }
 0x4d9   :  { %v4238_v10 = vpop.eup %4237  ;;  %3991 = vmatprep.subr.bf16.mxu0 %v4187_v58 }
 0x4da   :  { %3976 = vmatmul.mubr.msk.bf16.vlgmr.msra.gmra.mxu1 %vm1114_vm2, %v1216_v9  ;;  %v1212_v29 = vmul.f32 %v4238_v10, %v1193_v56  ;;  %v3664_v9 = vld [vmem:[#allocation13 + $0x9] ss:$0 sm:$0xff] }
 0x4db   :  { %3986 = vmatpush3.bf16.msra.mxu1 %v4998_v11  ;;  %3987 = vmatprep.mubr.msk.bf16.mxu1 %vm4651_vm1, %v4650_v38  ;;  %v5017_v37 = vpop.permute.xlu1 %1415 }
 0x4dc   :  { %v1217_v12 = vpack.c.bf16 %v1212_v29, %v1212_v29 }
 0x4dd   :  { %v4240_v14 = vpop.eup %4239 }
 0x4de   :  { %v1214_v15 = vmul.f32 %v4240_v14, %v1194_v28 }
 0x4df   :  { %3982 = vmatmul.mubr.msk.bf16.vlgmr.msra.gmra.mxu0 %vm1114_vm2, %v1217_v12  ;;  %v5034_v2 = vpop.permute.xlu1 %1578 }
 0x4e0   :  { %v1218_v59 = vpack.c.bf16 %v1214_v15, %v1214_v15  ;;  %3992 = vmatpush3.bf16.msra.mxu0 %v4187_v58  ;;  %v3666_v58 = vld [vmem:[#allocation13 + $0xb] ss:$0 sm:$0xff] }
 0x4e1   :  { %3993 = vmatprep.subr.bf16.mxu0 %v4188_v62 }
 0x4e2   :  { %3988 = vmatmul.mubr.msk.bf16.vlgmr.msra.gmra.mxu1 %vm1114_vm2, %v1218_v59 }
 0x4e4   :  { %3994 = vmatpush3.bf16.msra.mxu0 %v4188_v62 }
 0x4e5   :  { %3995 = vmatprep.subr.bf16.mxu0 %v4189_v17 }
 0x4e8   :  { %3996 = vmatpush3.bf16.msra.mxu0 %v4189_v17 }
 0x4e9   :  { %3997 = vmatprep.subr.bf16.mxu0 %v4190_v18 }
 0x4ec   :  { %3998 = vmatpush3.bf16.msra.mxu0 %v4190_v18 }
 0x4ed   :  { %4019 = vmatprep.subr.bf16.mxu0 %v4650_v38 }
 0x597   :  { %v1260_v22 = vpop.f32.mrf.mxu0 }
 0x598   :  { %v1423_v48 = vsel %vm203_vm0, %v1260_v22, %v5008_v23 }
 0x599   :  { %v3971_v39 = vpop.f32.mrf.mxu0 }
 0x59a   :  { %v1307_v26 = vpop.f32.mrf.mxu1 }
 0x59b   :  { %v1424_v30 = vsel %vm203_vm0, %v1307_v26, %v5010_v24  ;;  %v1263_v49 = vpop.f32.mrf.mxu0 }
 0x59c   :  { %v1427_v27 = vpack.c.bf16 %v1424_v30, %v1423_v48  ;;  %v3977_v32 = vpop.f32.mrf.mxu1 }
 0x59d   :  { %v3972_v33 = vpop.f32.mrf.mxu0 }
 0x59e   :  { %v1310_v34 = vpop.f32.mrf.mxu1  ;;  %3999 = vmatprep.mubr.msk.bf16.mxu0 %vm1453_vm3, %v1427_v27 }
 0x59f   :  { %v1354_v40 = vpop.f32.mrf.mxu0 }
 0x5a0   :  { %v3978_v41 = vpop.f32.mrf.mxu1  ;;  %v1425_v46 = vsel %vm203_vm0, %v1354_v40, %v5017_v37 }
 0x5a1   :  { %v3983_v44 = vpop.f32.mrf.mxu0 }
 0x5a2   :  { %v1401_v35 = vpop.f32.mrf.mxu1 }
 0x5a3   :  { %v1426_v47 = vsel %vm203_vm0, %v1401_v35, %v5019_v42  ;;  %v1357_v56 = vpop.f32.mrf.mxu0 }
 0x5a4   :  { %v1428_v57 = vpack.c.bf16 %v1426_v47, %v1425_v46  ;;  %v3989_v63 = vpop.f32.mrf.mxu1 }
 0x5a5   :  { %v3984_v50 = vpop.f32.mrf.mxu0 }
 0x5a6   :  { %v1404_v28 = vpop.f32.mrf.mxu1  ;;  %4000 = vmatmul.mubr.msk.bf16.vlgmr.msra.gmra.mxu0 %vm1453_vm3, %v1428_v57  ;;  %v3665_v57 = vld [vmem:[#allocation13 + $0xa] ss:$0 sm:$0xff] }
 0x5a7   :  { %4020 = vmatpush3.bf16.msra.mxu0 %v4915_v61  ;;  %4023 = vmatprep.mubr.msk.bf16.mxu0 %vm4651_vm1, %v4650_v38 }
 0x5a8   :  { %v3990_v1 = vpop.f32.mrf.mxu1  ;;  %4021 = vmatprep.subr.bf16.mxu0 %v4650_v38 }
 0x5ab   :  { %4022 = vmatpush3.bf16.msra.mxu0 %v4926_v4 }
 0x5ac   :  { %4035 = vmatprep.subr.bf16.mxu0 %v4650_v38 }
 0x666   :  { %v5032_v21 = vpop.f32.mrf.mxu0 }
 0x667   :  { %v1583_v54 = vadd.f32 %v5032_v21, %v5034_v2  ;;  %v1511_v29 = vadd.f32 %v5032_v21, %v3664_v9 }
 0x668   :  { %v5036_v5 = vpop.f32.mrf.mxu0 }
 0x669   :  { %v1581_v60 = vadd.f32 %v5034_v2, %v5036_v5  ;;  %v1509_v10 = vadd.f32 %v3664_v9, %v5036_v5  ;;  %v3709_v15 = vmul.f32 -1.442695, %v1511_v29 }
 0x66a   :  { %v5040_v6 = vpop.f32.mrf.mxu0 }
 0x66b   :  { %1589 = vrot.lane.b32.xlu0 %v1581_v60, %s4648_s4  ;;  %v1584_v55 = vadd.f32 %v5040_v6, %v5034_v2  ;;  %v3707_v12 = vmul.f32 -1.442695, %v1509_v10  ;;  %v1512_v59 = vadd.f32 %v5040_v6, %v3664_v9 }
 0x66c   :  { %v5043_v0 = vpop.f32.mrf.mxu0 }
 0x66d   :  { %v1582_v20 = vadd.f32 %v5034_v2, %v5043_v0  ;;  %v1510_v14 = vadd.f32 %v3664_v9, %v5043_v0  ;;  %4241 = vpow2.f32 %v3707_v12  ;;  %v3710_v17 = vmul.f32 -1.442695, %v1512_v59 }
 0x66e   :  { %4243 = vpow2.f32 %v3709_v15 }
 0x66f   :  { %1593 = vrot.lane.b32.xlu0 %v1583_v54, %s4648_s4  ;;  %1591 = vrot.lane.b32.xlu1 %v1582_v20, %s4648_s4  ;;  %v3708_v62 = vmul.f32 -1.442695, %v1510_v14 }
 0x671   :  { %4245 = vpow2.f32 %v3708_v62 }
 0x672   :  { %4247 = vpow2.f32 %v3710_v17 }
 0x673   :  { %1570 = vrot.lane.b32.xlu0 %v3666_v58, %s4642_s17  ;;  %1595 = vrot.lane.b32.xlu1 %v1584_v55, %s4648_s4 }
 0x67a   :  { %v4242_v18 = vpop.eup %4241 }
 0x67b   :  { %v4244_v19 = vpop.eup %4243  ;;  %v1525_v22 = vadd.f32 1.0, %v4242_v18 }
 0x67c   :  { %v1527_v26 = vadd.f32 1.0, %v4244_v19 }
 0x67d   :  { %4249 = vrcp.f32 %v1525_v22 }
 0x67e   :  { %v4246_v39 = vpop.eup %4245  ;;  %4251 = vrcp.f32 %v1527_v26 }
 0x67f   :  { %v1526_v48 = vadd.f32 1.0, %v4246_v39  ;;  %v4248_v30 = vpop.eup %4247 }
 0x680   :  { %v1528_v49 = vadd.f32 1.0, %v4248_v30 }
 0x681   :  { %4253 = vrcp.f32 %v1526_v48 }
 0x682   :  { %4255 = vrcp.f32 %v1528_v49 }
 0x68a   :  { %v4250_v27 = vpop.eup %4249 }
 0x68b   :  { %v4252_v34 = vpop.eup %4251 }
 0x68e   :  { %v4254_v40 = vpop.eup %4253 }
 0x68f   :  { %v4256_v47 = vpop.eup %4255 }
 0x6dd   :  { %v1590_v32 = vpop.permute.xlu0 %1589 }
 0x6de   :  { %v1601_v33 = vmul.f32 %v4250_v27, %v1590_v32 }
 0x6e0   :  { %1609 = vrot.lane.b32.xlu1 %v1601_v33, %s4642_s17 }
 0x6e1   :  { %v1594_v41 = vpop.permute.xlu0 %1593  ;;  %v1592_v44 = vpop.permute.xlu1 %1591 }
 0x6e2   :  { %v1603_v35 = vmul.f32 %v4252_v34, %v1594_v41  ;;  %v1602_v46 = vmul.f32 %v4254_v40, %v1592_v44 }
 0x6e4   :  { %1613 = vrot.lane.b32.xlu1 %v1603_v35, %s4642_s17  ;;  %1611 = vrot.lane.b32.xlu0 %v1602_v46, %s4642_s17 }
 0x6e5   :  { %v1596_v56 = vpop.permute.xlu1 %1595  ;;  %v5064_v50 = vpop.permute.xlu0 %1570 }
 0x6e6   :  { %v1604_v63 = vmul.f32 %v4256_v47, %v1596_v56  ;;  %v1573_v28 = vadd.f32 %v5064_v50, %v5036_v5  ;;  %v1575_v54 = vadd.f32 %v5032_v21, %v5064_v50  ;;  %v1574_v20 = vadd.f32 %v5064_v50, %v5043_v0 }
 0x6e7   :  { %v1576_v29 = vadd.f32 %v5040_v6, %v5064_v50 }
 0x6e8   :  { %1538 = vrot.lane.b32.xlu1 %v3665_v57, %s4648_s4  ;;  %1615 = vrot.lane.b32.xlu0 %v1604_v63, %s4642_s17 }
 0x752   :  { %v1610_v1 = vpop.permute.xlu1 %1609 }
 0x753   :  { %v1621_v60 = vadd.f32 %v1610_v1, %v1573_v28 }
 0x755   :  { %4257 = vtanh.f32 %v1621_v60 }
 0x756   :  { %v1614_v58 = vpop.permute.xlu1 %1613  ;;  %v1612_v55 = vpop.permute.xlu0 %1611 }
 0x757   :  { %v1623_v9 = vadd.f32 %v1614_v58, %v1575_v54  ;;  %v1622_v10 = vadd.f32 %v1612_v55, %v1574_v20 }
 0x759   :  { %4259 = vtanh.f32 %v1623_v9 }
 0x75a   :  { %4261 = vtanh.f32 %v1622_v10  ;;  %v1616_v12 = vpop.permute.xlu0 %1615  ;;  %v5078_v18 = vpop.permute.xlu1 %1538 }
 0x75b   :  { %v1624_v14 = vadd.f32 %v1616_v12, %v1576_v29  ;;  %v1541_v19 = vadd.f32 %v5078_v18, %v5036_v5  ;;  %v1543_v39 = vadd.f32 %v5032_v21, %v5078_v18  ;;  %v1542_v26 = vadd.f32 %v5078_v18, %v5043_v0 }
 0x75c   :  { %v1544_v49 = vadd.f32 %v5040_v6, %v5078_v18 }
 0x75d   :  { %4263 = vtanh.f32 %v1624_v14  ;;  %v3711_v22 = vmul.f32 -1.442695, %v1541_v19  ;;  %v3713_v48 = vmul.f32 -1.442695, %v1543_v39  ;;  %v3712_v30 = vmul.f32 -1.442695, %v1542_v26 }
 0x75e   :  { %v3714_v27 = vmul.f32 -1.442695, %v1544_v49 }
 0x75f   :  { %4265 = vpow2.f32 %v3711_v22 }
 0x760   :  { %4267 = vpow2.f32 %v3713_v48 }
 0x761   :  { %4269 = vpow2.f32 %v3712_v30 }
 0x762   :  { %v4258_v15 = vpop.eup %4257  ;;  %4271 = vpow2.f32 %v3714_v27 }
 0x763   :  { %1637 = vrot.lane.b32.xlu0 %v4258_v15, %s4649_s6 }
 0x766   :  { %v4260_v59 = vpop.eup %4259 }
 0x767   :  { %v4262_v62 = vpop.eup %4261  ;;  %1641 = vrot.lane.b32.xlu0 %v4260_v59, %s4649_s6 }
 0x768   :  { %1639 = vrot.lane.b32.xlu1 %v4262_v62, %s4649_s6 }
 0x76a   :  { %v4264_v17 = vpop.eup %4263 }
 0x76c   :  { %1643 = vrot.lane.b32.xlu1 %v4264_v17, %s4649_s6  ;;  %v4266_v32 = vpop.eup %4265 }
 0x76d   :  { %v1557_v33 = vadd.f32 1.0, %v4266_v32  ;;  %v4268_v5 = vpop.eup %4267 }
 0x76e   :  { %v4270_v34 = vpop.eup %4269  ;;  %v1559_v40 = vadd.f32 1.0, %v4268_v5 }
 0x76f   :  { %4273 = vrcp.f32 %v1557_v33  ;;  %v1558_v21 = vadd.f32 1.0, %v4270_v34  ;;  %v4272_v41 = vpop.eup %4271 }
 0x770   :  { %4275 = vrcp.f32 %v1559_v40  ;;  %v1560_v0 = vadd.f32 1.0, %v4272_v41 }
 0x771   :  { %4277 = vrcp.f32 %v1558_v21 }
 0x772   :  { %4279 = vrcp.f32 %v1560_v0 }
 0x77c   :  { %v4274_v44 = vpop.eup %4273 }
 0x77d   :  { %v1629_v35 = vsub.f32 1.0, %v4274_v44  ;;  %v4276_v46 = vpop.eup %4275  ;;  %v1653_v56 = vmul.f32 %v4274_v44, %v5008_v23 }
 0x77e   :  { %v4278_v47 = vpop.eup %4277  ;;  %v1631_v28 = vsub.f32 1.0, %v4276_v46  ;;  %v1655_v58 = vmul.f32 %v4276_v46, %v5017_v37 }
 0x77f   :  { %v1630_v1 = vsub.f32 1.0, %v4278_v47  ;;  %v4280_v54 = vpop.eup %4279  ;;  %v1654_v9 = vmul.f32 %v4278_v47, %v5010_v24 }
 0x780   :  { %v1632_v14 = vsub.f32 1.0, %v4280_v54  ;;  %v1656_v23 = vmul.f32 %v4280_v54, %v5019_v42 }
 0x7d5   :  { %v1638_v6 = vpop.permute.xlu0 %1637 }
 0x7d6   :  { %v1649_v57 = vmul.f32 %v1638_v6, %v1629_v35 }
 0x7d8   :  { %v1657_v63 = vadd.f32 %v1653_v56, %v1649_v57 }
 0x7d9   :  { %v1642_v60 = vpop.permute.xlu0 %1641 }
 0x7da   :  { %v1640_v20 = vpop.permute.xlu1 %1639  ;;  %v1651_v55 = vmul.f32 %v1642_v60, %v1631_v28  ;;  %1665 = vrot.lane.b32.xlu0 %v1657_v63, %s4649_s6 }
 0x7db   :  { %v1650_v10 = vmul.f32 %v1640_v20, %v1630_v1  ;;  %v3663_v20 = vld [vmem:[#allocation13 + $0x5] ss:$0 sm:$0xff] }
 0x7dc   :  { %v1659_v29 = vadd.f32 %v1655_v58, %v1651_v55  ;;  %v3662_v58 = vld [vmem:[#allocation13 + $0x4] ss:$0 sm:$0xff]  ;;  %v5126_v55 = vld [vmem:[#allocation11 + $0x8] sm:$0xff]  }
 0x7dd   :  { %v1658_v12 = vadd.f32 %v1654_v9, %v1650_v10  ;;  %v5128_v9 = vld [vmem:[#allocation11] sm:$0xff]   ;;  %4003 = vmatprep.subr.bf16.mxu1 %v5126_v55 }
 0x7de   :  { %v1644_v15 = vpop.permute.xlu1 %1643  ;;  %1669 = vrot.lane.b32.xlu0 %v1659_v29, %s4649_s6  ;;  %4004 = vmatpush3.bf16.msra.mxu1 %v5126_v55 }
 0x7df   :  { %v1652_v59 = vmul.f32 %v1644_v15, %v1632_v14  ;;  %1667 = vrot.lane.b32.xlu1 %v1658_v12, %s4649_s6  ;;  %4005 = vmatprep.subr.bf16.mxu1 %v5128_v9 }
 0x7e1   :  { %v1660_v62 = vadd.f32 %v1656_v23, %v1652_v59 }
 0x7e2   :  { %4006 = vmatpush3.bf16.msra.mxu1 %v5128_v9 }
 0x7e3   :  { %1671 = vrot.lane.b32.xlu1 %v1660_v62, %s4649_s6  ;;  %4011 = vmatprep.subr.bf16.mxu1 %v4650_v38 }
 0x84c   :  { %v5096_v37 = vpop.permute.xlu0 %1665 }
 0x84d   :  { %v1677_v24 = vsel %vm203_vm0, %v5096_v37, 0.0 }
 0x84e   :  { %1678 = vadd.xlane.f32.xlu0 %v1677_v24 }
 0x850   :  { %v5100_v17 = vpop.permute.xlu0 %1669 }
 0x851   :  { %v5102_v19 = vpop.permute.xlu1 %1667  ;;  %v1683_v22 = vsel %vm203_vm0, %v5100_v17, 0.0 }
 0x852   :  { %v1680_v42 = vsel %vm203_vm0, %v5102_v19, 0.0  ;;  %1684 = vadd.xlane.f32.xlu0 %v1683_v22 }
 0x853   :  { %1681 = vadd.xlane.f32.xlu1 %v1680_v42 }
 0x855   :  { %v5108_v39 = vpop.permute.xlu1 %1671 }
 0x856   :  { %v1686_v26 = vsel %vm203_vm0, %v5108_v39, 0.0 }
 0x857   :  { %1687 = vadd.xlane.f32.xlu0 %v1686_v26 }
 0x8d7   :  { %v1679_v48 = vpop.xlane.xlu0 %1678 }
 0x8d8   :  { %v1689_v30 = vmul.f32 0.03125, %v1679_v48 }
 0x8da   :  { %v5112_v49 = vsub.f32 %v1657_v63, %v1689_v30 }
 0x8db   :  { %v1685_v27 = vpop.xlane.xlu0 %1684 }
 0x8dc   :  { %v1682_v32 = vpop.xlane.xlu1 %1681  ;;  %v1691_v33 = vmul.f32 0.03125, %v1685_v27  ;;  %v1697_v5 = vmul.f32 %v5112_v49, %v5112_v49 }
 0x8dd   :  { %v1690_v34 = vmul.f32 0.03125, %v1682_v32 }
 0x8de   :  { %v1695_v40 = vsub.f32 %v1659_v29, %v1691_v33  ;;  %1705 = vrot.lane.b32.xlu0 %v1697_v5, %s4649_s6 }
 0x8df   :  { %v1694_v21 = vsub.f32 %v1658_v12, %v1690_v34 }
 0x8e0   :  { %v1688_v41 = vpop.xlane.xlu0 %1687  ;;  %v1699_v0 = vmul.f32 %v1695_v40, %v1695_v40 }
 0x8e1   :  { %v1692_v44 = vmul.f32 0.03125, %v1688_v41  ;;  %v1698_v46 = vmul.f32 %v1694_v21, %v1694_v21 }
 0x8e2   :  { %1709 = vrot.lane.b32.xlu1 %v1699_v0, %s4649_s6 }
 0x8e3   :  { %v1696_v35 = vsub.f32 %v1660_v62, %v1692_v44 }
 0x8e5   :  { %v1700_v6 = vmul.f32 %v1696_v35, %v1696_v35 }
 0x8e6   :  { %1707 = vrot.lane.b32.xlu1 %v1698_v46, %s4649_s6 }
 0x8ea   :  { %1711 = vrot.lane.b32.xlu1 %v1700_v6, %s4649_s6 }
 0x950   :  { %v1706_v57 = vpop.permute.xlu0 %1705 }
 0x951   :  { %v1717_v1 = vsel %vm203_vm0, %v1706_v57, 0.0 }
 0x954   :  { %v1710_v47 = vpop.permute.xlu1 %1709 }
 0x955   :  { %v1723_v56 = vsel %vm203_vm0, %v1710_v47, 0.0 }
 0x956   :  { %1724 = vadd.xlane.f32.xlu0 %v1723_v56 }
 0x958   :  { %v1708_v63 = vpop.permute.xlu1 %1707 }
 0x959   :  { %v1720_v28 = vsel %vm203_vm0, %v1708_v63, 0.0 }
 0x95a   :  { %1721 = vadd.xlane.f32.xlu1 %v1720_v28  ;;  %1718 = vadd.xlane.f32.xlu0 %v1717_v1 }
 0x95c   :  { %v1712_v60 = vpop.permute.xlu1 %1711 }
 0x95d   :  { %v1726_v54 = vsel %vm203_vm0, %v1712_v60, 0.0  ;;  %v3668_v60 = vld [vmem:[#allocation13 + $0xd] ss:$0 sm:$0xff] }
 0x95e   :  { %1727 = vadd.xlane.f32.xlu0 %v1726_v54 }
 0x96b   :  { %1754 = vrot.lane.b32.xlu1 %v3663_v20, %s4648_s4 }
 0x974   :  { %1746 = vrot.lane.b32.xlu0 %v3662_v58, %s4648_s4 }
 0x9df   :  { %v1725_v10 = vpop.xlane.xlu0 %1724 }
 0x9e0   :  { %v1731_v29 = vmul.f32 0.03125, %v1725_v10 }
 0x9e2   :  { %v1735_v12 = vadd.f32 1e-05, %v1731_v29 }
 0x9e3   :  { %v1722_v14 = vpop.xlane.xlu1 %1721  ;;  %v1719_v15 = vpop.xlane.xlu0 %1718 }
 0x9e4   :  { %v1730_v23 = vmul.f32 0.03125, %v1722_v14  ;;  %v1729_v59 = vmul.f32 0.03125, %v1719_v15  ;;  %4281 = vrsqrt.f32 %v1735_v12 }
 0x9e6   :  { %v1734_v62 = vadd.f32 1e-05, %v1730_v23  ;;  %v1733_v24 = vadd.f32 1e-05, %v1729_v59 }
 0x9e7   :  { %v1728_v22 = vpop.xlane.xlu0 %1727  ;;  %v5139_v44 = vpop.permute.xlu1 %1754 }
 0x9e8   :  { %4283 = vrsqrt.f32 %v1734_v62  ;;  %v1732_v42 = vmul.f32 0.03125, %v1728_v22 }
 0x9e9   :  { %4285 = vrsqrt.f32 %v1733_v24 }
 0x9ea   :  { %v1736_v26 = vadd.f32 1e-05, %v1732_v42 }
 0x9eb   :  { %v5135_v5 = vpop.permute.xlu0 %1746 }
 0x9ec   :  { %4287 = vrsqrt.f32 %v1736_v26 }
 0x9f1   :  { %v4282_v48 = vpop.eup %4281 }
 0x9f2   :  { %v1743_v33 = vmul.f32 %v4282_v48, %v1695_v40 }
 0x9f4   :  { %v1751_v56 = vmul.f32 %v5135_v5, %v1743_v33 }
 0x9f5   :  { %v4284_v30 = vpop.eup %4283 }
 0x9f6   :  { %v4286_v27 = vpop.eup %4285  ;;  %v1742_v32 = vmul.f32 %v4284_v30, %v1694_v21  ;;  %v1759_v63 = vadd.f32 %v5139_v44, %v1751_v56 }
 0x9f7   :  { %v1741_v34 = vmul.f32 %v4286_v27, %v5112_v49 }
 0x9f8   :  { %v1750_v41 = vmul.f32 %v5135_v5, %v1742_v32 }
 0x9f9   :  { %v4288_v0 = vpop.eup %4287  ;;  %v1749_v46 = vmul.f32 %v5135_v5, %v1741_v34 }
 0x9fa   :  { %v1758_v6 = vadd.f32 %v5139_v44, %v1750_v41  ;;  %v1744_v47 = vmul.f32 %v4288_v0, %v1696_v35 }
 0x9fb   :  { %v1757_v57 = vadd.f32 %v5139_v44, %v1749_v46 }
 0x9fc   :  { %v1752_v40 = vmul.f32 %v5135_v5, %v1744_v47 }
 0x9fd   :  { %v1761_v21 = vpack.c.bf16 %v1758_v6, %v1757_v57 }
 0x9fe   :  { %v1760_v49 = vadd.f32 %v5139_v44, %v1752_v40 }
 0x9ff   :  { %1765 = vrot.lane.b32.xlu1 %v1761_v21, %s4649_s6 }
 0xa00   :  { %v1762_v28 = vpack.c.bf16 %v1760_v49, %v1759_v63 }
 0xa03   :  { %1767 = vrot.lane.b32.xlu1 %v1762_v28, %s4649_s6 }
 0xa71   :  { %v1766_v1 = vpop.permute.xlu1 %1765 }
 0xa72   :  { %4007 = vmatprep.mubr.msk.bf16.mxu1 %vm203_vm0, %v1766_v1 }
 0xa75   :  { %v1768_v35 = vpop.permute.xlu1 %1767 }
 0xa76   :  { %4008 = vmatmul.mubr.msk.bf16.vlgmr.msra.gmra.mxu1 %vm203_vm0, %v1768_v35 }
 0xa77   :  { %4012 = vmatpush3.bf16.msra.mxu1 %v4905_v36  ;;  %4015 = vmatprep.mubr.msk.bf16.mxu1 %vm4651_vm1, %v4650_v38 }
 0xa78   :  { %4013 = vmatprep.subr.bf16.mxu1 %v4650_v38 }
 0xa7b   :  { %4014 = vmatpush3.bf16.msra.mxu1 %v4910_v45 }
 0xa7c   :  { %4027 = vmatprep.subr.bf16.mxu1 %v4650_v38 }
 0xb36   :  { %v4009_v54 = vpop.f32.mrf.mxu1 }
 0xb37   :  { %v1830_v20 = vadd.f32 %v4009_v54, %v3668_v60 }
 0xb38   :  { %v1821_v58 = vpop.f32.mrf.mxu1 }
 0xb39   :  { %v1822_v10 = vadd.f32 %v3668_v60, %v1821_v58  ;;  %v1838_v12 = vmax.f32 %v1830_v20, 0.0 }
 0xb3a   :  { %v4010_v29 = vpop.f32.mrf.mxu1 }
 0xb3b   :  { %v1836_v14 = vmax.f32 %v1822_v10, 0.0  ;;  %v1833_v15 = vadd.f32 %v4010_v29, %v3668_v60  ;;  %v5162_v24 = vadd.f32 %v1838_v12, %v5100_v17 }
 0xb3c   :  { %v1824_v23 = vpop.f32.mrf.mxu1 }
 0xb3d   :  { %v5159_v59 = vadd.f32 %v1836_v14, %v5096_v37  ;;  %v1825_v62 = vadd.f32 %v3668_v60, %v1824_v23  ;;  %v1839_v22 = vmax.f32 %v1833_v15, 0.0  ;;  %v1850_v27 = vsel %vm203_vm0, %v5162_v24, 0.0 }
 0xb3f   :  { %v1837_v42 = vmax.f32 %v1825_v62, 0.0  ;;  %v1844_v26 = vsel %vm203_vm0, %v5159_v59, 0.0  ;;  %v5170_v30 = vadd.f32 %v1839_v22, %v5108_v39 }
 0xb40   :  { %1845 = vadd.xlane.f32.xlu0 %v1844_v26 }
 0xb41   :  { %v5167_v48 = vadd.f32 %v1837_v42, %v5102_v19  ;;  %v1853_v17 = vsel %vm203_vm0, %v5170_v30, 0.0 }
 0xb43   :  { %v1847_v37 = vsel %vm203_vm0, %v5167_v48, 0.0 }
 0xb44   :  { %1848 = vadd.xlane.f32.xlu1 %v1847_v37  ;;  %1851 = vadd.xlane.f32.xlu0 %v1850_v27  ;;  %v4449_v27 = vld [vmem:[#allocation13 + $0x2] ss:$0 sm:$0xff] }
 0xb48   :  { %1854 = vadd.xlane.f32.xlu0 %v1853_v17 }
 0xbc9   :  { %v1846_v32 = vpop.xlane.xlu0 %1845 }
 0xbca   :  { %v1856_v33 = vmul.f32 0.03125, %v1846_v32 }
 0xbcc   :  { %v1860_v19 = vsub.f32 %v5159_v59, %v1856_v33 }
 0xbcd   :  { %v1849_v34 = vpop.xlane.xlu1 %1848  ;;  %v1852_v41 = vpop.xlane.xlu0 %1851 }
 0xbce   :  { %v1857_v39 = vmul.f32 0.03125, %v1849_v34  ;;  %v1858_v0 = vmul.f32 0.03125, %v1852_v41  ;;  %v1864_v46 = vmul.f32 %v1860_v19, %v1860_v19  ;;  %v4450_v41 = vld [vmem:[#allocation13 + $0x3] ss:$0 sm:$0xff] }
 0xbd0   :  { %v1861_v6 = vsub.f32 %v5167_v48, %v1857_v39  ;;  %v1862_v47 = vsub.f32 %v5162_v24, %v1858_v0  ;;  %v1868_v56 = vsel %vm203_vm0, %v1864_v46, 0.0 }
 0xbd1   :  { %1869 = vadd.xlane.f32.xlu0 %v1868_v56  ;;  %v1855_v57 = vpop.xlane.xlu0 %1854 }
 0xbd2   :  { %v1859_v40 = vmul.f32 0.03125, %v1855_v57  ;;  %v1865_v21 = vmul.f32 %v1861_v6, %v1861_v6  ;;  %v1866_v63 = vmul.f32 %v1862_v47, %v1862_v47 }
 0xbd4   :  { %v1863_v49 = vsub.f32 %v5170_v30, %v1859_v40  ;;  %v1871_v28 = vsel %vm203_vm0, %v1865_v21, 0.0  ;;  %v1874_v1 = vsel %vm203_vm0, %v1866_v63, 0.0 }
 0xbd5   :  { %1872 = vadd.xlane.f32.xlu1 %v1871_v28  ;;  %1875 = vadd.xlane.f32.xlu0 %v1874_v1 }
 0xbd6   :  { %v1867_v35 = vmul.f32 %v1863_v49, %v1863_v49 }
 0xbd8   :  { %v1877_v60 = vsel %vm203_vm0, %v1867_v35, 0.0 }
 0xbd9   :  { %1878 = vadd.xlane.f32.xlu1 %v1877_v60 }
 0xc5a   :  { %v1870_v54 = vpop.xlane.xlu0 %1869 }
 0xc5b   :  { %v1880_v20 = vmul.f32 0.03125, %v1870_v54 }
 0xc5d   :  { %v1884_v58 = vadd.f32 1e-05, %v1880_v20 }
 0xc5e   :  { %v1873_v10 = vpop.xlane.xlu1 %1872  ;;  %v1876_v29 = vpop.xlane.xlu0 %1875 }
 0xc5f   :  { %4289 = vrsqrt.f32 %v1884_v58  ;;  %v1881_v12 = vmul.f32 0.03125, %v1873_v10  ;;  %v1882_v14 = vmul.f32 0.03125, %v1876_v29 }
 0xc61   :  { %v1885_v15 = vadd.f32 1e-05, %v1881_v12  ;;  %v1886_v23 = vadd.f32 1e-05, %v1882_v14 }
 0xc62   :  { %v1879_v62 = vpop.xlane.xlu1 %1878 }
 0xc63   :  { %4291 = vrsqrt.f32 %v1885_v15  ;;  %v1883_v22 = vmul.f32 0.03125, %v1879_v62 }
 0xc64   :  { %4293 = vrsqrt.f32 %v1886_v23 }
 0xc65   :  { %v1887_v42 = vadd.f32 1e-05, %v1883_v22 }
 0xc67   :  { %4295 = vrsqrt.f32 %v1887_v42 }
 0xc6c   :  { %v4290_v26 = vpop.eup %4289 }
 0xc6d   :  { %v1892_v37 = vmul.f32 %v4290_v26, %v1860_v19 }
 0xc6f   :  { %v1896_v17 = vmul.f32 %v4449_v27, %v1892_v37 }
 0xc70   :  { %v4292_v32 = vpop.eup %4291 }
 0xc71   :  { %v4294_v33 = vpop.eup %4293  ;;  %v1893_v34 = vmul.f32 %v4292_v32, %v1861_v6  ;;  %v1900_v39 = vadd.f32 %v4450_v41, %v1896_v17 }
 0xc72   :  { %v1894_v0 = vmul.f32 %v4294_v33, %v1862_v47 }
 0xc73   :  { %v1904_v46 = vpack.c.bf16 %v1900_v39, %v1900_v39  ;;  %v1897_v56 = vmul.f32 %v4449_v27, %v1893_v34 }
 0xc74   :  { %v4296_v57 = vpop.eup %4295  ;;  %v1898_v40 = vmul.f32 %v4449_v27, %v1894_v0 }
 0xc75   :  { %v1895_v21 = vmul.f32 %v4296_v57, %v1863_v49  ;;  %4016 = vmatmul.mubr.msk.bf16.vlgmr.msra.gmra.mxu1 %vm203_vm0, %v1904_v46  ;;  %v1901_v63 = vadd.f32 %v4450_v41, %v1897_v56 }
 0xc76   :  { %4028 = vmatpush3.bf16.msra.mxu1 %v4917_v52  ;;  %4031 = vmatprep.mubr.msk.bf16.mxu1 %vm4651_vm1, %v4650_v38  ;;  %v1902_v6 = vadd.f32 %v4450_v41, %v1898_v40 }
 0xc77   :  { %4029 = vmatprep.subr.bf16.mxu1 %v4650_v38  ;;  %v1905_v19 = vpack.c.bf16 %v1901_v63, %v1901_v63  ;;  %v1899_v28 = vmul.f32 %v4449_v27, %v1895_v21 }
 0xc78   :  { %v1906_v47 = vpack.c.bf16 %v1902_v6, %v1902_v6 }
 0xc79   :  { %4024 = vmatmul.mubr.msk.bf16.vlgmr.msra.gmra.mxu0 %vm203_vm0, %v1905_v19  ;;  %v1903_v49 = vadd.f32 %v4450_v41, %v1899_v28 }
 0xc7a   :  { %4030 = vmatpush3.bf16.msra.mxu1 %v4929_v7  ;;  %4036 = vmatpush3.bf16.msra.mxu0 %v4934_v3 }
 0xc7b   :  { %4037 = vmatprep.subr.bf16.mxu0 %v4650_v38  ;;  %4043 = vmatprep.subr.bf16.mxu1 %v4650_v38  ;;  %v1907_v1 = vpack.c.bf16 %v1903_v49, %v1903_v49 }
 0xc7c   :  { %4039 = vmatprep.mubr.msk.bf16.mxu0 %vm4651_vm1, %v4650_v38 }
 0xc7d   :  { %4032 = vmatmul.mubr.msk.bf16.vlgmr.msra.gmra.mxu1 %vm203_vm0, %v1906_v47 }
 0xc7e   :  { %4038 = vmatpush3.bf16.msra.mxu0 %v4943_v16  ;;  %4044 = vmatpush3.bf16.msra.mxu1 %v4988_v8 }
 0xc7f   :  { %4049 = vmatprep.subr.bf16.mxu0 %v4650_v38  ;;  %4045 = vmatprep.mubr.msk.bf16.mxu1 %vm4651_vm1, %v4650_v38 }
 0xc80   :  { %4055 = vmatprep.subr.bf16.mxu1 %v4650_v38 }
 0xc81   :  { %4040 = vmatmul.mubr.msk.bf16.vlgmr.msra.gmra.mxu0 %vm203_vm0, %v1907_v1 }
 0xc82   :  { %4050 = vmatpush3.bf16.msra.mxu0 %v4949_v25  ;;  %4051 = vmatprep.mubr.msk.bf16.mxu0 %vm4651_vm1, %v4650_v38 }
 0xc83   :  { %4061 = vmatprep.subr.bf16.mxu0 %v4650_v38 }
 0xd35   :  { %v1945_v35 = vpop.f32.mrf.mxu1 }
 0xd36   :  { %v1946_v60 = vadd.f32 %v1945_v35, %v4956_v31 }
 0xd37   :  { %v4017_v54 = vpop.f32.mrf.mxu1 }
 0xd38   :  { %v2080_v20 = vsel %vm1114_vm2, %v1946_v60, -inf }
 0xd39   :  { %v2081_v58 = vrot.slane %v2080_v20, 4  ;;  %v1948_v10 = vpop.f32.mrf.mxu1  ;;  %v1988_v29 = vpop.f32.mrf.mxu0 }
 0xd3a   :  { %v1989_v12 = vadd.f32 %v1988_v29, %v4960_v51 }
 0xd3b   :  { %v2082_v14 = vmax.f32 %v2080_v20, %v2081_v58  ;;  %v4018_v15 = vpop.f32.mrf.mxu1  ;;  %v4025_v23 = vpop.f32.mrf.mxu0 }
 0xd3c   :  { %v2087_v62 = vsel %vm1114_vm2, %v1989_v12, -inf }
 0xd3d   :  { %v2083_v22 = vrot.slane %v2082_v14, 2  ;;  %v2088_v42 = vrot.slane %v2087_v62, 4  ;;  %v1991_v26 = vpop.f32.mrf.mxu0  ;;  %v2031_v37 = vpop.f32.mrf.mxu1 }
 0xd3e   :  { %v2032_v27 = vadd.f32 %v2031_v37, %v4962_v53 }
 0xd3f   :  { %v2084_v17 = vmax.f32 %v2082_v14, %v2083_v22  ;;  %v2089_v32 = vmax.f32 %v2087_v62, %v2088_v42  ;;  %v4026_v33 = vpop.f32.mrf.mxu0  ;;  %v4033_v34 = vpop.f32.mrf.mxu1 }
 0xd40   :  { %v2094_v41 = vsel %vm1114_vm2, %v2032_v27, -inf }
 0xd41   :  { %v2085_v39 = vrot.slane %v2084_v17, 1  ;;  %v2090_v0 = vrot.slane %v2089_v32, 2  ;;  %v2095_v46 = vrot.slane %v2094_v41, 4  ;;  %v2034_v56 = vpop.f32.mrf.mxu1  ;;  %v2074_v57 = vpop.f32.mrf.mxu0 }
 0xd42   :  { %v2075_v40 = vadd.f32 %v2074_v57, %v4968_v13 }
 0xd43   :  { %v2086_v21 = vmax.f32 %v2084_v17, %v2085_v39  ;;  %v2091_v63 = vmax.f32 %v2089_v32, %v2090_v0  ;;  %v2096_v19 = vmax.f32 %v2094_v41, %v2095_v46  ;;  %v4034_v6 = vpop.f32.mrf.mxu1  ;;  %v4041_v28 = vpop.f32.mrf.mxu0 }
 0xd44   :  { %v2101_v47 = vsel %vm1114_vm2, %v2075_v40, -inf }
 0xd45   :  { %v2108_v49 = vsub.f32 %v1946_v60, %v2086_v21  ;;  %v2092_v1 = vrot.slane %v2091_v63, 1  ;;  %v2097_v35 = vrot.slane %v2096_v19, 2  ;;  %v2102_v54 = vrot.slane %v2101_v47, 4  ;;  %v2077_v20 = vpop.f32.mrf.mxu0 }
 0xd47   :  { %v2112_v58 = vmul.f32 1.442695, %v2108_v49  ;;  %v2093_v10 = vmax.f32 %v2091_v63, %v2092_v1  ;;  %v2098_v29 = vmax.f32 %v2096_v19, %v2097_v35  ;;  %v2103_v14 = vmax.f32 %v2101_v47, %v2102_v54  ;;  %v4042_v15 = vpop.f32.mrf.mxu0 }
 0xd49   :  { %4297 = vpow2.f32 %v2112_v58  ;;  %v2109_v23 = vsub.f32 %v1989_v12, %v2093_v10  ;;  %v2099_v62 = vrot.slane %v2098_v29, 1  ;;  %v2104_v22 = vrot.slane %v2103_v14, 2 }
 0xd4b   :  { %v2114_v42 = vmul.f32 1.442695, %v2109_v23  ;;  %v2100_v26 = vmax.f32 %v2098_v29, %v2099_v62  ;;  %v2105_v37 = vmax.f32 %v2103_v14, %v2104_v22 }
 0xd4d   :  { %4299 = vpow2.f32 %v2114_v42  ;;  %v2110_v17 = vsub.f32 %v2032_v27, %v2100_v26  ;;  %v2106_v32 = vrot.slane %v2105_v37, 1 }
 0xd4f   :  { %v2116_v60 = vmul.f32 1.442695, %v2110_v17  ;;  %v2107_v33 = vmax.f32 %v2105_v37, %v2106_v32 }
 0xd51   :  { %4301 = vpow2.f32 %v2116_v60  ;;  %v2111_v34 = vsub.f32 %v2075_v40, %v2107_v33 }
 0xd53   :  { %v2118_v41 = vmul.f32 1.442695, %v2111_v34 }
 0xd55   :  { %4303 = vpow2.f32 %v2118_v41 }
 0xd56   :  { %v4298_v39 = vpop.eup %4297 }
 0xd57   :  { %v2120_v0 = vsel %vm1114_vm2, %v4298_v39, 0.0 }
 0xd58   :  { %v2121_v46 = vrot.slane %v2120_v0, 4 }
 0xd5a   :  { %v4300_v56 = vpop.eup %4299  ;;  %v2122_v12 = vadd.f32 %v2121_v46, %v2120_v0 }
 0xd5b   :  { %v2127_v57 = vsel %vm1114_vm2, %v4300_v56, 0.0 }
 0xd5c   :  { %v2123_v21 = vrot.slane %v2122_v12, 2  ;;  %v2128_v63 = vrot.slane %v2127_v57, 4 }
 0xd5e   :  { %v4302_v19 = vpop.eup %4301  ;;  %v2129_v6 = vadd.f32 %v2128_v63, %v2127_v57  ;;  %v2124_v27 = vadd.f32 %v2123_v21, %v2122_v12 }
 0xd5f   :  { %v2134_v28 = vsel %vm1114_vm2, %v4302_v19, 0.0 }
 0xd60   :  { %v2130_v47 = vrot.slane %v2129_v6, 2  ;;  %v2135_v49 = vrot.slane %v2134_v28, 4  ;;  %v2125_v40 = vrot.slane %v2124_v27, 1 }
 0xd62   :  { %v4304_v1 = vpop.eup %4303  ;;  %v2136_v35 = vadd.f32 %v2135_v49, %v2134_v28  ;;  %v2126_v54 = vadd.f32 %v2125_v40, %v2124_v27  ;;  %v2131_v20 = vadd.f32 %v2130_v47, %v2129_v6 }
 0xd63   :  { %v2141_v58 = vsel %vm1114_vm2, %v4304_v1, 0.0 }
 0xd64   :  { %v2137_v10 = vrot.slane %v2136_v35, 2  ;;  %v2142_v29 = vrot.slane %v2141_v58, 4  ;;  %4305 = vrcp.f32 %v2126_v54  ;;  %v2132_v14 = vrot.slane %v2131_v20, 1 }
 0xd66   :  { %v2143_v15 = vadd.f32 %v2142_v29, %v2141_v58  ;;  %v2133_v23 = vadd.f32 %v2132_v14, %v2131_v20  ;;  %v2138_v62 = vadd.f32 %v2137_v10, %v2136_v35 }
 0xd68   :  { %v2144_v22 = vrot.slane %v2143_v15, 2  ;;  %4307 = vrcp.f32 %v2133_v23  ;;  %v2139_v42 = vrot.slane %v2138_v62, 1 }
 0xd6a   :  { %v2140_v26 = vadd.f32 %v2139_v42, %v2138_v62  ;;  %v2145_v37 = vadd.f32 %v2144_v22, %v2143_v15  ;;  %v4452_v62 = vld [vmem:[#allocation10 + $0x10] sm:$0xff]   ;;  %v4453_v22 = vld [vmem:[#allocation10 + $0x8] sm:$0xff]   ;;  %v4454_v42 = vld [vmem:[#allocation10] sm:$0xff]  }
 0xd6c   :  { %4309 = vrcp.f32 %v2140_v26  ;;  %v2146_v17 = vrot.slane %v2145_v37, 1 }
 0xd6e   :  { %v2147_v32 = vadd.f32 %v2146_v17, %v2145_v37 }
 0xd70   :  { %4311 = vrcp.f32 %v2147_v32 }
 0xd71   :  { %v4306_v60 = vpop.eup %4305 }
 0xd72   :  { %v2152_v33 = vmul.f32 %v4306_v60, %v4298_v39 }
 0xd74   :  { %v2156_v34 = vadd.f32 1e-08, %v2152_v33 }
 0xd75   :  { %v4308_v41 = vpop.eup %4307 }
 0xd76   :  { %v2160_v0 = vsel %vm1114_vm2, %v2156_v34, 0.0  ;;  %v2153_v46 = vmul.f32 %v4308_v41, %v4300_v56 }
 0xd77   :  { %2161 = vadd.xlane.f32.xlu0 %v2160_v0 }
 0xd78   :  { %v2157_v12 = vadd.f32 1e-08, %v2153_v46 }
 0xd79   :  { %v4310_v57 = vpop.eup %4309 }
 0xd7a   :  { %v2163_v21 = vsel %vm1114_vm2, %v2157_v12, 0.0  ;;  %v2154_v63 = vmul.f32 %v4310_v57, %v4302_v19 }
 0xd7b   :  { %2164 = vadd.xlane.f32.xlu1 %v2163_v21 }
 0xd7c   :  { %v2158_v6 = vadd.f32 1e-08, %v2154_v63 }
 0xd7d   :  { %v4312_v27 = vpop.eup %4311 }
 0xd7e   :  { %v2166_v28 = vsel %vm1114_vm2, %v2158_v6, 0.0  ;;  %v2155_v47 = vmul.f32 %v4312_v27, %v4304_v1 }
 0xd7f   :  { %2167 = vadd.xlane.f32.xlu0 %v2166_v28 }
 0xd80   :  { %v2159_v49 = vadd.f32 1e-08, %v2155_v47 }
 0xd82   :  { %v2169_v39 = vsel %vm1114_vm2, %v2159_v49, 0.0 }
 0xd83   :  { %2170 = vadd.xlane.f32.xlu1 %v2169_v39 }
 0xd94   :  { %2362 = vrot.lane.b32.xlu1 %v5167_v48, %s4648_s4 }
 0xd95   :  { %2360 = vrot.lane.b32.xlu0 %v5159_v59, %s4648_s4 }
 0xd98   :  { %2364 = vrot.lane.b32.xlu1 %v5162_v24, %s4648_s4 }
 0xd9c   :  { %2366 = vrot.lane.b32.xlu1 %v5170_v30, %s4648_s4  ;;  %v4451_v30 = vld [vmem:[#allocation10 + $0x18] sm:$0xff]  }
 0xe00   :  { %v2162_v56 = vpop.xlane.xlu0 %2161 }
 0xe01   :  { %4313 = vrcp.f32 %v2162_v56 }
 0xe04   :  { %v2165_v19 = vpop.xlane.xlu1 %2164 }
 0xe05   :  { %4315 = vrcp.f32 %v2165_v19 }
 0xe08   :  { %v2168_v40 = vpop.xlane.xlu0 %2167 }
 0xe09   :  { %4317 = vrcp.f32 %v2168_v40 }
 0xe0c   :  { %v2171_v1 = vpop.xlane.xlu1 %2170  ;;  %v5252_v32 = vpop.permute.xlu0 %2360 }
 0xe0d   :  { %4319 = vrcp.f32 %v2171_v1 }
 0xe0e   :  { %v4314_v35 = vpop.eup %4313 }
 0xe0f   :  { %v2173_v54 = vmul.f32 %v4314_v35, %v2156_v34 }
 0xe10   :  { %v5250_v26 = vpop.permute.xlu1 %2362 }
 0xe11   :  { %v2180_v48 = vpack.c.bf16 %v2173_v54, %v2173_v54 }
 0xe12   :  { %v4316_v20 = vpop.eup %4315 }
 0xe13   :  { %4046 = vmatmul.mubr.msk.bf16.vlgmr.msra.gmra.mxu1 %vm1114_vm2, %v2180_v48  ;;  %v2175_v59 = vmul.f32 %v4316_v20, %v2157_v12 }
 0xe14   :  { %4056 = vmatpush3.bf16.msra.mxu1 %v4990_v43  ;;  %4057 = vmatprep.mubr.msk.bf16.mxu1 %vm4651_vm1, %v4650_v38  ;;  %v5254_v33 = vpop.permute.xlu1 %2364 }
 0xe15   :  { %v2181_v24 = vpack.c.bf16 %v2175_v59, %v2175_v59  ;;  %4067 = vmatprep.subr.bf16.mxu1 %v4451_v30 }
 0xe16   :  { %v4318_v58 = vpop.eup %4317 }
 0xe17   :  { %4052 = vmatmul.mubr.msk.bf16.vlgmr.msra.gmra.mxu0 %vm1114_vm2, %v2181_v24  ;;  %v2177_v10 = vmul.f32 %v4318_v58, %v2158_v6 }
 0xe18   :  { %4062 = vmatpush3.bf16.msra.mxu0 %v4998_v11  ;;  %4063 = vmatprep.mubr.msk.bf16.mxu0 %vm4651_vm1, %v4650_v38  ;;  %v5261_v6 = vpop.permute.xlu1 %2366 }
 0xe19   :  { %v2182_v29 = vpack.c.bf16 %v2177_v10, %v2177_v10  ;;  %4079 = vmatprep.subr.bf16.mxu0 %v5126_v55 }
 0xe1a   :  { %v4320_v14 = vpop.eup %4319 }
 0xe1b   :  { %4058 = vmatmul.mubr.msk.bf16.vlgmr.msra.gmra.mxu1 %vm1114_vm2, %v2182_v29  ;;  %v2179_v15 = vmul.f32 %v4320_v14, %v2159_v49 }
 0xe1c   :  { %4068 = vmatpush3.bf16.msra.mxu1 %v4451_v30  ;;  %v4455_v30 = vld [vmem:[#allocation13 + $0x9] ss:$0 sm:$0xff] }
 0xe1d   :  { %v2183_v23 = vpack.c.bf16 %v2179_v15, %v2179_v15  ;;  %4069 = vmatprep.subr.bf16.mxu1 %v4452_v62 }
 0xe1f   :  { %4064 = vmatmul.mubr.msk.bf16.vlgmr.msra.gmra.mxu0 %vm1114_vm2, %v2183_v23 }
 0xe20   :  { %4070 = vmatpush3.bf16.msra.mxu1 %v4452_v62  ;;  %4080 = vmatpush3.bf16.msra.mxu0 %v5126_v55 }
 0xe21   :  { %4071 = vmatprep.subr.bf16.mxu1 %v4453_v22  ;;  %4081 = vmatprep.subr.bf16.mxu0 %v5128_v9 }
 0xe24   :  { %4072 = vmatpush3.bf16.msra.mxu1 %v4453_v22  ;;  %4082 = vmatpush3.bf16.msra.mxu0 %v5128_v9 }
 0xe25   :  { %4073 = vmatprep.subr.bf16.mxu1 %v4454_v42  ;;  %4087 = vmatprep.subr.bf16.mxu0 %v4650_v38 }
 0xe28   :  { %4074 = vmatpush3.bf16.msra.mxu1 %v4454_v42 }
 0xe29   :  { %4095 = vmatprep.subr.bf16.mxu1 %v4650_v38 }
 0xed3   :  { %v2221_v37 = vpop.f32.mrf.mxu1 }
 0xed4   :  { %v2372_v9 = vsel %vm203_vm0, %v2221_v37, %v5252_v32 }
 0xed5   :  { %v4047_v17 = vpop.f32.mrf.mxu1 }
 0xed7   :  { %v2224_v55 = vpop.f32.mrf.mxu1  ;;  %v2264_v60 = vpop.f32.mrf.mxu0 }
 0xed8   :  { %v2373_v34 = vsel %vm203_vm0, %v2264_v60, %v5250_v26 }
 0xed9   :  { %v2376_v41 = vpack.c.bf16 %v2373_v34, %v2372_v9  ;;  %v4048_v0 = vpop.f32.mrf.mxu1  ;;  %v4053_v46 = vpop.f32.mrf.mxu0 }
 0xedb   :  { %v2267_v12 = vpop.f32.mrf.mxu0  ;;  %v2307_v57 = vpop.f32.mrf.mxu1  ;;  %4075 = vmatprep.mubr.msk.bf16.mxu1 %vm1453_vm3, %v2376_v41 }
 0xedc   :  { %v2374_v47 = vsel %vm203_vm0, %v2307_v57, %v5254_v33 }
 0xedd   :  { %v4054_v21 = vpop.f32.mrf.mxu0  ;;  %v4059_v63 = vpop.f32.mrf.mxu1 }
 0xedf   :  { %v2310_v27 = vpop.f32.mrf.mxu1  ;;  %v2350_v28 = vpop.f32.mrf.mxu0 }
 0xee0   :  { %v2375_v49 = vsel %vm203_vm0, %v2350_v28, %v5261_v6 }
 0xee1   :  { %v2377_v39 = vpack.c.bf16 %v2375_v49, %v2374_v47  ;;  %v4060_v56 = vpop.f32.mrf.mxu1  ;;  %v4065_v19 = vpop.f32.mrf.mxu0 }
 0xee3   :  { %v2353_v40 = vpop.f32.mrf.mxu0  ;;  %4076 = vmatmul.mubr.msk.bf16.vlgmr.msra.gmra.mxu1 %vm1453_vm3, %v2377_v39 }
 0xee4   :  { %4096 = vmatpush3.bf16.msra.mxu1 %v4915_v61  ;;  %4099 = vmatprep.mubr.msk.bf16.mxu1 %vm4651_vm1, %v4650_v38 }
 0xee5   :  { %v4066_v1 = vpop.f32.mrf.mxu0  ;;  %4097 = vmatprep.subr.bf16.mxu1 %v4650_v38 }
 0xee8   :  { %4098 = vmatpush3.bf16.msra.mxu1 %v4926_v4 }
 0xee9   :  { %4111 = vmatprep.subr.bf16.mxu1 %v4650_v38 }
 0xfa3   :  { %v5274_v35 = vpop.f32.mrf.mxu1 }
 0xfa4   :  { %v2495_v59 = vadd.f32 %v5274_v35, %v5034_v2  ;;  %v2435_v10 = vadd.f32 %v4455_v30, %v5274_v35 }
 0xfa5   :  { %v5276_v54 = vpop.f32.mrf.mxu1 }
 0xfa6   :  { %v2493_v20 = vadd.f32 %v5276_v54, %v5034_v2  ;;  %v2433_v58 = vadd.f32 %v4455_v30, %v5276_v54  ;;  %v3731_v15 = vmul.f32 -1.442695, %v2435_v10  ;;  %v2489_v19 = vadd.f32 %v5276_v54, %v5064_v50 }
 0xfa7   :  { %v5278_v48 = vpop.f32.mrf.mxu1 }
 0xfa8   :  { %2501 = vrot.lane.b32.xlu0 %v2493_v20, %s4648_s4  ;;  %v2496_v24 = vadd.f32 %v5278_v48, %v5034_v2  ;;  %v3729_v29 = vmul.f32 -1.442695, %v2433_v58  ;;  %v2436_v23 = vadd.f32 %v4455_v30, %v5278_v48  ;;  %v2491_v20 = vadd.f32 %v5274_v35, %v5064_v50 }
 0xfa9   :  { %v5283_v61 = vpop.f32.mrf.mxu1  ;;  %v2492_v10 = vadd.f32 %v5278_v48, %v5064_v50 }
 0xfaa   :  { %v2494_v4 = vadd.f32 %v5283_v61, %v5034_v2  ;;  %v2434_v14 = vadd.f32 %v4455_v30, %v5283_v61  ;;  %4321 = vpow2.f32 %v3729_v29  ;;  %v3732_v22 = vmul.f32 -1.442695, %v2436_v23 }
 0xfab   :  { %4323 = vpow2.f32 %v3731_v15 }
 0xfac   :  { %2505 = vrot.lane.b32.xlu0 %v2495_v59, %s4648_s4  ;;  %2503 = vrot.lane.b32.xlu1 %v2494_v4, %s4648_s4  ;;  %v3730_v62 = vmul.f32 -1.442695, %v2434_v14  ;;  %v2490_v59 = vadd.f32 %v5283_v61, %v5064_v50 }
 0xfae   :  { %4325 = vpow2.f32 %v3730_v62 }
 0xfaf   :  { %4327 = vpow2.f32 %v3732_v22 }
 0xfb0   :  { %2507 = vrot.lane.b32.xlu1 %v2496_v24, %s4648_s4 }
 0xfb7   :  { %v4322_v42 = vpop.eup %4321 }
 0xfb8   :  { %v4324_v37 = vpop.eup %4323  ;;  %v2449_v17 = vadd.f32 1.0, %v4322_v42  ;;  %v2461_v42 = vadd.f32 %v5276_v54, %v5078_v18 }
 0xfb9   :  { %v2451_v60 = vadd.f32 1.0, %v4324_v37  ;;  %v2463_v37 = vadd.f32 %v5274_v35, %v5078_v18 }
 0xfba   :  { %4329 = vrcp.f32 %v2449_v17  ;;  %v3733_v17 = vmul.f32 -1.442695, %v2461_v42 }
 0xfbb   :  { %v4326_v55 = vpop.eup %4325  ;;  %4331 = vrcp.f32 %v2451_v60  ;;  %v3735_v60 = vmul.f32 -1.442695, %v2463_v37 }
 0xfbc   :  { %v2450_v9 = vadd.f32 1.0, %v4326_v55  ;;  %v4328_v34 = vpop.eup %4327  ;;  %v2462_v55 = vadd.f32 %v5283_v61, %v5078_v18 }
 0xfbd   :  { %v2452_v41 = vadd.f32 1.0, %v4328_v34 }
 0xfbe   :  { %4333 = vrcp.f32 %v2450_v9  ;;  %v2464_v9 = vadd.f32 %v5278_v48, %v5078_v18  ;;  %v3734_v34 = vmul.f32 -1.442695, %v2462_v55 }
 0xfbf   :  { %4335 = vrcp.f32 %v2452_v41 }
 0xfc0   :  { %v3736_v41 = vmul.f32 -1.442695, %v2464_v9 }
 0xfc7   :  { %v4330_v0 = vpop.eup %4329 }
 0xfc8   :  { %v4332_v57 = vpop.eup %4331 }
 0xfcb   :  { %v4334_v21 = vpop.eup %4333 }
 0xfcc   :  { %v4336_v49 = vpop.eup %4335 }
0x101a   :  { %v2502_v46 = vpop.permute.xlu0 %2501 }
0x101b   :  { %v2513_v12 = vmul.f32 %v4330_v0, %v2502_v46 }
0x101d   :  { %2521 = vrot.lane.b32.xlu0 %v2513_v12, %s4642_s17 }
0x101e   :  { %v2506_v63 = vpop.permute.xlu0 %2505  ;;  %v2504_v27 = vpop.permute.xlu1 %2503 }
0x101f   :  { %v2515_v28 = vmul.f32 %v4332_v57, %v2506_v63  ;;  %v2514_v47 = vmul.f32 %v4334_v21, %v2504_v27 }
0x1021   :  { %2525 = vrot.lane.b32.xlu0 %v2515_v28, %s4642_s17  ;;  %2523 = vrot.lane.b32.xlu1 %v2514_v47, %s4642_s17 }
0x1022   :  { %v2508_v39 = vpop.permute.xlu1 %2507 }
0x1023   :  { %v2516_v56 = vmul.f32 %v4336_v49, %v2508_v39 }
0x1025   :  { %2527 = vrot.lane.b32.xlu1 %v2516_v56, %s4642_s17 }
0x108f   :  { %v2522_v40 = vpop.permute.xlu0 %2521 }
0x1090   :  { %v2533_v1 = vadd.f32 %v2522_v40, %v2489_v19 }
0x1092   :  { %4337 = vtanh.f32 %v2533_v1 }
0x1093   :  { %v2526_v4 = vpop.permute.xlu0 %2525  ;;  %v2524_v24 = vpop.permute.xlu1 %2523 }
0x1094   :  { %v2535_v30 = vadd.f32 %v2526_v4, %v2491_v20  ;;  %v2534_v58 = vadd.f32 %v2524_v24, %v2490_v59 }
0x1096   :  { %4339 = vtanh.f32 %v2535_v30 }
0x1097   :  { %4341 = vtanh.f32 %v2534_v58  ;;  %v2528_v29 = vpop.permute.xlu1 %2527 }
0x1098   :  { %v2536_v14 = vadd.f32 %v2528_v29, %v2492_v10 }
0x109a   :  { %4343 = vtanh.f32 %v2536_v14 }
0x109b   :  { %4345 = vpow2.f32 %v3733_v17 }
0x109c   :  { %4347 = vpow2.f32 %v3735_v60 }
0x109d   :  { %4349 = vpow2.f32 %v3734_v34 }
0x109e   :  { %4351 = vpow2.f32 %v3736_v41 }
0x109f   :  { %v4338_v15 = vpop.eup %4337 }
0x10a0   :  { %2549 = vrot.lane.b32.xlu0 %v4338_v15, %s4649_s6 }
0x10a3   :  { %v4340_v23 = vpop.eup %4339 }
0x10a4   :  { %v4342_v62 = vpop.eup %4341  ;;  %2553 = vrot.lane.b32.xlu0 %v4340_v23, %s4649_s6 }
0x10a5   :  { %2551 = vrot.lane.b32.xlu1 %v4342_v62, %s4649_s6 }
0x10a7   :  { %v4344_v22 = vpop.eup %4343 }
0x10a8   :  { %v4346_v0 = vpop.eup %4345 }
0x10a9   :  { %2555 = vrot.lane.b32.xlu1 %v4344_v22, %s4649_s6  ;;  %v2477_v46 = vadd.f32 1.0, %v4346_v0  ;;  %v4348_v54 = vpop.eup %4347 }
0x10aa   :  { %v4350_v12 = vpop.eup %4349  ;;  %v2479_v57 = vadd.f32 1.0, %v4348_v54 }
0x10ab   :  { %4353 = vrcp.f32 %v2477_v46  ;;  %v2478_v35 = vadd.f32 1.0, %v4350_v12  ;;  %v4352_v21 = vpop.eup %4351 }
0x10ac   :  { %4355 = vrcp.f32 %v2479_v57  ;;  %v2480_v61 = vadd.f32 1.0, %v4352_v21 }
0x10ad   :  { %4357 = vrcp.f32 %v2478_v35 }
0x10ae   :  { %4359 = vrcp.f32 %v2480_v61 }
0x10b8   :  { %v4354_v63 = vpop.eup %4353 }
0x10b9   :  { %v2541_v27 = vsub.f32 1.0, %v4354_v63  ;;  %v4356_v48 = vpop.eup %4355  ;;  %v2565_v49 = vmul.f32 %v4354_v63, %v5252_v32 }
0x10ba   :  { %v4358_v47 = vpop.eup %4357  ;;  %v2543_v19 = vsub.f32 1.0, %v4356_v48  ;;  %v2567_v59 = vmul.f32 %v4356_v48, %v5254_v33 }
0x10bb   :  { %v2542_v1 = vsub.f32 1.0, %v4358_v47  ;;  %v4360_v20 = vpop.eup %4359  ;;  %v2566_v30 = vmul.f32 %v4358_v47, %v5250_v26 }
0x10bc   :  { %v2544_v14 = vsub.f32 1.0, %v4360_v20  ;;  %v2568_v32 = vmul.f32 %v4360_v20, %v5261_v6 }
0x1112   :  { %v2550_v28 = vpop.permute.xlu0 %2549 }
0x1113   :  { %v2561_v39 = vmul.f32 %v2550_v28, %v2541_v27 }
0x1115   :  { %v2569_v56 = vadd.f32 %v2565_v49, %v2561_v39 }
0x1116   :  { %v2554_v40 = vpop.permute.xlu0 %2553 }
0x1117   :  { %v2563_v4 = vmul.f32 %v2554_v40, %v2543_v19  ;;  %v2552_v24 = vpop.permute.xlu1 %2551  ;;  %2577 = vrot.lane.b32.xlu0 %v2569_v56, %s4649_s6 }
0x1118   :  { %v2562_v58 = vmul.f32 %v2552_v24, %v2542_v1 }
0x1119   :  { %v2571_v10 = vadd.f32 %v2567_v59, %v2563_v4 }
0x111a   :  { %v2570_v29 = vadd.f32 %v2566_v30, %v2562_v58 }
0x111b   :  { %v2556_v15 = vpop.permute.xlu1 %2555  ;;  %2581 = vrot.lane.b32.xlu0 %v2571_v10, %s4649_s6 }
0x111c   :  { %v2564_v23 = vmul.f32 %v2556_v15, %v2544_v14  ;;  %2579 = vrot.lane.b32.xlu1 %v2570_v29, %s4649_s6 }
0x111e   :  { %v2572_v62 = vadd.f32 %v2568_v32, %v2564_v23 }
0x1120   :  { %2583 = vrot.lane.b32.xlu1 %v2572_v62, %s4649_s6 }
0x1189   :  { %v5330_v33 = vpop.permute.xlu0 %2577 }
0x118a   :  { %v2589_v26 = vsel %vm203_vm0, %v5330_v33, 0.0 }
0x118b   :  { %2590 = vadd.xlane.f32.xlu0 %v2589_v26 }
0x118d   :  { %v5334_v22 = vpop.permute.xlu0 %2581 }
0x118e   :  { %v5336_v42 = vpop.permute.xlu1 %2579  ;;  %v2595_v37 = vsel %vm203_vm0, %v5334_v22, 0.0 }
0x118f   :  { %2596 = vadd.xlane.f32.xlu0 %v2595_v37  ;;  %v2592_v6 = vsel %vm203_vm0, %v5336_v42, 0.0 }
0x1190   :  { %2593 = vadd.xlane.f32.xlu1 %v2592_v6 }
0x1192   :  { %v5342_v17 = vpop.permute.xlu1 %2583 }
0x1193   :  { %v2598_v55 = vsel %vm203_vm0, %v5342_v17, 0.0 }
0x1194   :  { %2599 = vadd.xlane.f32.xlu0 %v2598_v55 }
0x1214   :  { %v2591_v60 = vpop.xlane.xlu0 %2590 }
0x1215   :  { %v2601_v9 = vmul.f32 0.03125, %v2591_v60 }
0x1217   :  { %v2605_v34 = vsub.f32 %v2569_v56, %v2601_v9 }
0x1218   :  { %v2597_v41 = vpop.xlane.xlu0 %2596 }
0x1219   :  { %v2609_v0 = vmul.f32 %v2605_v34, %v2605_v34  ;;  %v2603_v46 = vmul.f32 0.03125, %v2597_v41  ;;  %v2594_v54 = vpop.xlane.xlu1 %2593 }
0x121a   :  { %v2602_v12 = vmul.f32 0.03125, %v2594_v54 }
0x121b   :  { %v2607_v57 = vsub.f32 %v2571_v10, %v2603_v46  ;;  %2617 = vrot.lane.b32.xlu0 %v2609_v0, %s4649_s6 }
0x121c   :  { %v2606_v21 = vsub.f32 %v2570_v29, %v2602_v12 }
0x121d   :  { %v2611_v35 = vmul.f32 %v2607_v57, %v2607_v57  ;;  %v2600_v61 = vpop.xlane.xlu0 %2599 }
0x121e   :  { %v2604_v63 = vmul.f32 0.03125, %v2600_v61  ;;  %v2610_v27 = vmul.f32 %v2606_v21, %v2606_v21 }
0x121f   :  { %2621 = vrot.lane.b32.xlu1 %v2611_v35, %s4649_s6 }
0x1220   :  { %v2608_v48 = vsub.f32 %v2572_v62, %v2604_v63 }
0x1222   :  { %v2612_v28 = vmul.f32 %v2608_v48, %v2608_v48 }
0x1223   :  { %2619 = vrot.lane.b32.xlu1 %v2610_v27, %s4649_s6 }
0x1227   :  { %2623 = vrot.lane.b32.xlu1 %v2612_v28, %s4649_s6 }
0x128d   :  { %v2618_v47 = vpop.permute.xlu0 %2617 }
0x128e   :  { %v2629_v49 = vsel %vm203_vm0, %v2618_v47, 0.0 }
0x128f   :  { %2630 = vadd.xlane.f32.xlu0 %v2629_v49 }
0x1291   :  { %v2622_v39 = vpop.permute.xlu1 %2621 }
0x1292   :  { %v2635_v56 = vsel %vm203_vm0, %v2622_v39, 0.0  ;;  %v5372_v39 = vld [vmem:[#allocation13 + $0xd] ss:$0 sm:$0xff] }
0x1293   :  { %2636 = vadd.xlane.f32.xlu0 %v2635_v56 }
0x1295   :  { %v2620_v19 = vpop.permute.xlu1 %2619 }
0x1296   :  { %v2632_v40 = vsel %vm203_vm0, %v2620_v19, 0.0 }
0x1297   :  { %2633 = vadd.xlane.f32.xlu1 %v2632_v40 }
0x1299   :  { %v2624_v1 = vpop.permute.xlu1 %2623 }
0x129a   :  { %v2638_v20 = vsel %vm203_vm0, %v2624_v1, 0.0 }
0x129b   :  { %2639 = vadd.xlane.f32.xlu0 %v2638_v20 }
0x1318   :  { %v2631_v59 = vpop.xlane.xlu0 %2630 }
0x1319   :  { %v2641_v4 = vmul.f32 0.03125, %v2631_v59 }
0x131b   :  { %v2645_v24 = vadd.f32 1e-05, %v2641_v4 }
0x131c   :  { %v2637_v30 = vpop.xlane.xlu0 %2636 }
0x131d   :  { %v2643_v58 = vmul.f32 0.03125, %v2637_v30  ;;  %4361 = vrsqrt.f32 %v2645_v24 }
0x131f   :  { %v2647_v10 = vadd.f32 1e-05, %v2643_v58 }
0x1320   :  { %v2634_v29 = vpop.xlane.xlu1 %2633 }
0x1321   :  { %v2642_v14 = vmul.f32 0.03125, %v2634_v29  ;;  %4363 = vrsqrt.f32 %v2647_v10 }
0x1323   :  { %v2646_v15 = vadd.f32 1e-05, %v2642_v14 }
0x1324   :  { %v2640_v32 = vpop.xlane.xlu0 %2639 }
0x1325   :  { %4365 = vrsqrt.f32 %v2646_v15  ;;  %v2644_v23 = vmul.f32 0.03125, %v2640_v32 }
0x1327   :  { %v2648_v62 = vadd.f32 1e-05, %v2644_v23 }
0x1329   :  { %4367 = vrsqrt.f32 %v2648_v62 }
0x132a   :  { %v4362_v26 = vpop.eup %4361 }
0x132b   :  { %v2653_v37 = vmul.f32 %v4362_v26, %v2605_v34 }
0x132d   :  { %v2657_v9 = vmul.f32 %v2653_v37, %v5135_v5 }
0x132e   :  { %v4364_v6 = vpop.eup %4363 }
0x132f   :  { %v2655_v41 = vmul.f32 %v4364_v6, %v2607_v57  ;;  %v2661_v54 = vadd.f32 %v2657_v9, %v5139_v44 }
0x1331   :  { %v2659_v61 = vmul.f32 %v2655_v41, %v5135_v5 }
0x1332   :  { %v4366_v55 = vpop.eup %4365 }
0x1333   :  { %v2654_v60 = vmul.f32 %v4366_v55, %v2606_v21  ;;  %v2663_v34 = vadd.f32 %v2659_v61, %v5139_v44 }
0x1335   :  { %v2658_v0 = vmul.f32 %v2654_v60, %v5135_v5 }
0x1336   :  { %v4368_v46 = vpop.eup %4367 }
0x1337   :  { %v2662_v12 = vadd.f32 %v2658_v0, %v5139_v44  ;;  %v2656_v35 = vmul.f32 %v4368_v46, %v2608_v48 }
0x1339   :  { %v2665_v63 = vpack.c.bf16 %v2662_v12, %v2661_v54  ;;  %v2660_v27 = vmul.f32 %v2656_v35, %v5135_v5 }
0x133b   :  { %2669 = vrot.lane.b32.xlu0 %v2665_v63, %s4649_s6  ;;  %v2664_v21 = vadd.f32 %v2660_v27, %v5139_v44 }
0x133d   :  { %v2666_v57 = vpack.c.bf16 %v2664_v21, %v2663_v34 }
0x133f   :  { %2671 = vrot.lane.b32.xlu1 %v2666_v57, %s4649_s6 }
0x13ad   :  { %v2670_v28 = vpop.permute.xlu0 %2669 }
0x13ae   :  { %4083 = vmatprep.mubr.msk.bf16.mxu0 %vm203_vm0, %v2670_v28 }
0x13b1   :  { %v2672_v47 = vpop.permute.xlu1 %2671 }
0x13b2   :  { %4084 = vmatmul.mubr.msk.bf16.vlgmr.msra.gmra.mxu0 %vm203_vm0, %v2672_v47 }
0x13b3   :  { %4088 = vmatpush3.bf16.msra.mxu0 %v4905_v36  ;;  %4091 = vmatprep.mubr.msk.bf16.mxu0 %vm4651_vm1, %v4650_v38 }
0x13b4   :  { %4089 = vmatprep.subr.bf16.mxu0 %v4650_v38 }
0x13b7   :  { %4090 = vmatpush3.bf16.msra.mxu0 %v4910_v45 }
0x13b8   :  { %4103 = vmatprep.subr.bf16.mxu0 %v4650_v38 }
0x1472   :  { %v4085_v48 = vpop.f32.mrf.mxu0 }
0x1473   :  { %v2722_v40 = vadd.f32 %v5372_v39, %v4085_v48 }
0x1474   :  { %v2713_v49 = vpop.f32.mrf.mxu0 }
0x1475   :  { %v2714_v56 = vadd.f32 %v5372_v39, %v2713_v49  ;;  %v2730_v24 = vmax.f32 %v2722_v40, 0.0 }
0x1476   :  { %v4086_v19 = vpop.f32.mrf.mxu0 }
0x1477   :  { %v2728_v1 = vmax.f32 %v2714_v56, 0.0  ;;  %v2725_v36 = vadd.f32 %v5372_v39, %v4086_v19  ;;  %v5390_v14 = vadd.f32 %v2730_v24, %v5334_v22 }
0x1478   :  { %v2716_v20 = vpop.f32.mrf.mxu0 }
0x1479   :  { %v5378_v59 = vadd.f32 %v2728_v1, %v5330_v33  ;;  %v2731_v4 = vmax.f32 %v2725_v36, 0.0  ;;  %v2717_v45 = vadd.f32 %v5372_v39, %v2716_v20 }
0x147b   :  { %v5382_v30 = vadd.f32 %v2731_v4, %v5342_v17  ;;  %v2729_v58 = vmax.f32 %v2717_v45, 0.0  ;;  %v2736_v10 = vsel %vm203_vm0, %v5378_v59, 0.0  ;;  %v2742_v17 = vsel %vm203_vm0, %v5390_v14, 0.0  ;;  %v4457_v45 = vld [vmem:[#allocation13 + $0x2] ss:$0 sm:$0xff] }
0x147c   :  { %2737 = vadd.xlane.f32.xlu1 %v2736_v10 }
0x147d   :  { %v5387_v29 = vadd.f32 %v2729_v58, %v5336_v42  ;;  %v2745_v15 = vsel %vm203_vm0, %v5382_v30, 0.0 }
0x147f   :  { %v2739_v33 = vsel %vm203_vm0, %v5387_v29, 0.0 }
0x1480   :  { %2740 = vadd.xlane.f32.xlu0 %v2739_v33  ;;  %2746 = vadd.xlane.f32.xlu1 %v2745_v15  ;;  %v4458_v33 = vld [vmem:[#allocation13 + $0x3] ss:$0 sm:$0xff] }
0x1484   :  { %2743 = vadd.xlane.f32.xlu0 %v2742_v17 }
0x1505   :  { %v2738_v32 = vpop.xlane.xlu1 %2737 }
0x1506   :  { %v2748_v23 = vmul.f32 0.03125, %v2738_v32 }
0x1508   :  { %v2752_v42 = vsub.f32 %v5378_v59, %v2748_v23 }
0x1509   :  { %v2741_v62 = vpop.xlane.xlu0 %2740  ;;  %v2747_v26 = vpop.xlane.xlu1 %2746 }
0x150a   :  { %v2749_v22 = vmul.f32 0.03125, %v2741_v62  ;;  %v2751_v37 = vmul.f32 0.03125, %v2747_v26  ;;  %v2756_v6 = vmul.f32 %v2752_v42, %v2752_v42 }
0x150c   :  { %v2753_v55 = vsub.f32 %v5387_v29, %v2749_v22  ;;  %v2755_v60 = vsub.f32 %v5382_v30, %v2751_v37  ;;  %v2760_v9 = vsel %vm203_vm0, %v2756_v6, 0.0 }
0x150d   :  { %v2744_v41 = vpop.xlane.xlu0 %2743  ;;  %2761 = vadd.xlane.f32.xlu0 %v2760_v9 }
0x150e   :  { %v2750_v0 = vmul.f32 0.03125, %v2744_v41  ;;  %v2757_v46 = vmul.f32 %v2753_v55, %v2753_v55  ;;  %v2759_v35 = vmul.f32 %v2755_v60, %v2755_v60 }
0x1510   :  { %v2754_v54 = vsub.f32 %v5390_v14, %v2750_v0  ;;  %v2763_v12 = vsel %vm203_vm0, %v2757_v46, 0.0  ;;  %v2769_v27 = vsel %vm203_vm0, %v2759_v35, 0.0 }
0x1511   :  { %2764 = vadd.xlane.f32.xlu1 %v2763_v12 }
0x1512   :  { %v2758_v61 = vmul.f32 %v2754_v54, %v2754_v54 }
0x1514   :  { %v2766_v63 = vsel %vm203_vm0, %v2758_v61, 0.0 }
0x1515   :  { %2767 = vadd.xlane.f32.xlu0 %v2766_v63  ;;  %2770 = vadd.xlane.f32.xlu1 %v2769_v27 }
0x1596   :  { %v2762_v34 = vpop.xlane.xlu0 %2761 }
0x1597   :  { %v2772_v21 = vmul.f32 0.03125, %v2762_v34 }
0x1599   :  { %v2776_v57 = vadd.f32 1e-05, %v2772_v21 }
0x159a   :  { %v2765_v28 = vpop.xlane.xlu1 %2764 }
0x159b   :  { %4369 = vrsqrt.f32 %v2776_v57  ;;  %v2773_v47 = vmul.f32 0.03125, %v2765_v28 }
0x159d   :  { %v2777_v48 = vadd.f32 1e-05, %v2773_v47 }
0x159e   :  { %v2768_v49 = vpop.xlane.xlu0 %2767  ;;  %v2771_v56 = vpop.xlane.xlu1 %2770 }
0x159f   :  { %4371 = vrsqrt.f32 %v2777_v48  ;;  %v2774_v19 = vmul.f32 0.03125, %v2768_v49  ;;  %v2775_v40 = vmul.f32 0.03125, %v2771_v56 }
0x15a1   :  { %v2778_v1 = vadd.f32 1e-05, %v2774_v19  ;;  %v2779_v36 = vadd.f32 1e-05, %v2775_v40 }
0x15a3   :  { %4373 = vrsqrt.f32 %v2778_v1 }
0x15a4   :  { %4375 = vrsqrt.f32 %v2779_v36 }
0x15a8   :  { %v4370_v20 = vpop.eup %4369 }
0x15a9   :  { %v2784_v4 = vmul.f32 %v4370_v20, %v2752_v42 }
0x15ab   :  { %v2788_v24 = vmul.f32 %v4457_v45, %v2784_v4 }
0x15ac   :  { %v4372_v58 = vpop.eup %4371 }
0x15ad   :  { %v2785_v10 = vmul.f32 %v4372_v58, %v2753_v55  ;;  %v2792_v15 = vadd.f32 %v4458_v33, %v2788_v24 }
0x15af   :  { %v2796_v17 = vpack.c.bf16 %v2792_v15, %v2792_v15  ;;  %v2789_v32 = vmul.f32 %v4457_v45, %v2785_v10 }
0x15b0   :  { %v4374_v23 = vpop.eup %4373 }
0x15b1   :  { %v4376_v62 = vpop.eup %4375  ;;  %v2786_v26 = vmul.f32 %v4374_v23, %v2754_v54  ;;  %4092 = vmatmul.mubr.msk.bf16.vlgmr.msra.gmra.mxu0 %vm203_vm0, %v2796_v17  ;;  %v2793_v22 = vadd.f32 %v4458_v33, %v2789_v32 }
0x15b2   :  { %v2787_v37 = vmul.f32 %v4376_v62, %v2755_v60  ;;  %4104 = vmatpush3.bf16.msra.mxu0 %v4917_v52  ;;  %4107 = vmatprep.mubr.msk.bf16.mxu0 %vm4651_vm1, %v4650_v38 }
0x15b3   :  { %4105 = vmatprep.subr.bf16.mxu0 %v4650_v38  ;;  %v2797_v42 = vpack.c.bf16 %v2793_v22, %v2793_v22  ;;  %v2790_v6 = vmul.f32 %v4457_v45, %v2786_v26 }
0x15b4   :  { %v2791_v55 = vmul.f32 %v4457_v45, %v2787_v37 }
0x15b5   :  { %4100 = vmatmul.mubr.msk.bf16.vlgmr.msra.gmra.mxu1 %vm203_vm0, %v2797_v42  ;;  %v2794_v9 = vadd.f32 %v4458_v33, %v2790_v6 }
0x15b6   :  { %4106 = vmatpush3.bf16.msra.mxu0 %v4929_v7  ;;  %4112 = vmatpush3.bf16.msra.mxu1 %v4934_v3  ;;  %v2795_v60 = vadd.f32 %v4458_v33, %v2791_v55 }
0x15b7   :  { %4113 = vmatprep.subr.bf16.mxu1 %v4650_v38  ;;  %4119 = vmatprep.subr.bf16.mxu0 %v4650_v38  ;;  %v2798_v52 = vpack.c.bf16 %v2794_v9, %v2794_v9 }
0x15b8   :  { %4115 = vmatprep.mubr.msk.bf16.mxu1 %vm4651_vm1, %v4650_v38  ;;  %v2799_v7 = vpack.c.bf16 %v2795_v60, %v2795_v60 }
0x15b9   :  { %4108 = vmatmul.mubr.msk.bf16.vlgmr.msra.gmra.mxu0 %vm203_vm0, %v2798_v52 }
0x15ba   :  { %4114 = vmatpush3.bf16.msra.mxu1 %v4943_v16  ;;  %4120 = vmatpush3.bf16.msra.mxu0 %v4988_v8 }
0x15bb   :  { %4125 = vmatprep.subr.bf16.mxu1 %v4650_v38  ;;  %4121 = vmatprep.mubr.msk.bf16.mxu0 %vm4651_vm1, %v4650_v38 }
0x15bc   :  { %4131 = vmatprep.subr.bf16.mxu0 %v4650_v38 }
0x15bd   :  { %4116 = vmatmul.mubr.msk.bf16.vlgmr.msra.gmra.mxu1 %vm203_vm0, %v2799_v7 }
0x15be   :  { %4126 = vmatpush3.bf16.msra.mxu1 %v4949_v25  ;;  %4127 = vmatprep.mubr.msk.bf16.mxu1 %vm4651_vm1, %v4650_v38 }
0x15bf   :  { %4137 = vmatprep.subr.bf16.mxu1 %v4650_v38 }
0x1671   :  { %v2837_v3 = vpop.f32.mrf.mxu0 }
0x1672   :  { %v2838_v16 = vadd.f32 %v2837_v3, %v4956_v31 }
0x1673   :  { %v4093_v8 = vpop.f32.mrf.mxu0 }
0x1674   :  { %v2972_v41 = vsel %vm1114_vm2, %v2838_v16, -inf }
0x1675   :  { %v2973_v0 = vrot.slane %v2972_v41, 4  ;;  %v2840_v46 = vpop.f32.mrf.mxu0  ;;  %v2880_v54 = vpop.f32.mrf.mxu1 }
0x1676   :  { %v2881_v12 = vadd.f32 %v2880_v54, %v4960_v51 }
0x1677   :  { %v2974_v35 = vmax.f32 %v2972_v41, %v2973_v0  ;;  %v4094_v61 = vpop.f32.mrf.mxu0  ;;  %v4101_v63 = vpop.f32.mrf.mxu1 }
0x1678   :  { %v2979_v25 = vsel %vm1114_vm2, %v2881_v12, -inf }
0x1679   :  { %v2975_v27 = vrot.slane %v2974_v35, 2  ;;  %v2980_v34 = vrot.slane %v2979_v25, 4  ;;  %v2883_v21 = vpop.f32.mrf.mxu1  ;;  %v2923_v57 = vpop.f32.mrf.mxu0 }
0x167a   :  { %v2924_v28 = vadd.f32 %v2923_v57, %v4962_v53 }
0x167b   :  { %v2976_v31 = vmax.f32 %v2974_v35, %v2975_v27  ;;  %v2981_v47 = vmax.f32 %v2979_v25, %v2980_v34  ;;  %v4102_v48 = vpop.f32.mrf.mxu1  ;;  %v4109_v49 = vpop.f32.mrf.mxu0 }
0x167c   :  { %v2986_v56 = vsel %vm1114_vm2, %v2924_v28, -inf }
0x167d   :  { %v2977_v19 = vrot.slane %v2976_v31, 1  ;;  %v2982_v40 = vrot.slane %v2981_v47, 2  ;;  %v2987_v51 = vrot.slane %v2986_v56, 4  ;;  %v2926_v1 = vpop.f32.mrf.mxu0  ;;  %v2966_v36 = vpop.f32.mrf.mxu1 }
0x167e   :  { %v2967_v20 = vadd.f32 %v2966_v36, %v4968_v13 }
0x167f   :  { %v2978_v4 = vmax.f32 %v2976_v31, %v2977_v19  ;;  %v2983_v45 = vmax.f32 %v2981_v47, %v2982_v40  ;;  %v2988_v24 = vmax.f32 %v2986_v56, %v2987_v51  ;;  %v4110_v58 = vpop.f32.mrf.mxu0  ;;  %v4117_v10 = vpop.f32.mrf.mxu1 }
0x1680   :  { %v2993_v53 = vsel %vm1114_vm2, %v2967_v20, -inf }
0x1681   :  { %v3000_v33 = vsub.f32 %v2838_v16, %v2978_v4  ;;  %v2984_v15 = vrot.slane %v2983_v45, 1  ;;  %v2989_v17 = vrot.slane %v2988_v24, 2  ;;  %v2994_v32 = vrot.slane %v2993_v53, 4  ;;  %v2969_v23 = vpop.f32.mrf.mxu1 }
0x1683   :  { %v3004_v62 = vmul.f32 1.442695, %v3000_v33  ;;  %v2985_v26 = vmax.f32 %v2983_v45, %v2984_v15  ;;  %v2990_v22 = vmax.f32 %v2988_v24, %v2989_v17  ;;  %v2995_v37 = vmax.f32 %v2993_v53, %v2994_v32  ;;  %v4118_v42 = vpop.f32.mrf.mxu1 }
0x1685   :  { %4377 = vpow2.f32 %v3004_v62  ;;  %v3001_v6 = vsub.f32 %v2881_v12, %v2985_v26  ;;  %v2991_v13 = vrot.slane %v2990_v22, 1  ;;  %v2996_v55 = vrot.slane %v2995_v37, 2 }
0x1687   :  { %v3006_v9 = vmul.f32 1.442695, %v3001_v6  ;;  %v2992_v52 = vmax.f32 %v2990_v22, %v2991_v13  ;;  %v2997_v60 = vmax.f32 %v2995_v37, %v2996_v55 }
0x1689   :  { %4379 = vpow2.f32 %v3006_v9  ;;  %v3002_v7 = vsub.f32 %v2924_v28, %v2992_v52  ;;  %v2998_v3 = vrot.slane %v2997_v60, 1 }
0x168b   :  { %v3008_v16 = vmul.f32 1.442695, %v3002_v7  ;;  %v2999_v8 = vmax.f32 %v2997_v60, %v2998_v3 }
0x168d   :  { %4381 = vpow2.f32 %v3008_v16  ;;  %v3003_v41 = vsub.f32 %v2967_v20, %v2999_v8 }
0x168f   :  { %v3010_v0 = vmul.f32 1.442695, %v3003_v41 }
0x1691   :  { %4383 = vpow2.f32 %v3010_v0 }
0x1692   :  { %v4378_v46 = vpop.eup %4377 }
0x1693   :  { %v3012_v54 = vsel %vm1114_vm2, %v4378_v46, 0.0 }
0x1694   :  { %v3013_v35 = vrot.slane %v3012_v54, 4 }
0x1696   :  { %v4380_v61 = vpop.eup %4379  ;;  %v3014_v12 = vadd.f32 %v3013_v35, %v3012_v54 }
0x1697   :  { %v3019_v63 = vsel %vm1114_vm2, %v4380_v61, 0.0 }
0x1698   :  { %v3015_v25 = vrot.slane %v3014_v12, 2  ;;  %v3020_v27 = vrot.slane %v3019_v63, 4 }
0x169a   :  { %v4382_v34 = vpop.eup %4381  ;;  %v3016_v21 = vadd.f32 %v3015_v25, %v3014_v12  ;;  %v3021_v57 = vadd.f32 %v3020_v27, %v3019_v63  ;;  %v4460_v27 = vld [vmem:[#allocation11 + $0x8] sm:$0xff]  }
0x169b   :  { %v3026_v28 = vsel %vm1114_vm2, %v4382_v34, 0.0 }
0x169c   :  { %v3017_v31 = vrot.slane %v3016_v21, 1  ;;  %v3022_v47 = vrot.slane %v3021_v57, 2  ;;  %v3027_v48 = vrot.slane %v3026_v28, 4 }
0x169e   :  { %v4384_v49 = vpop.eup %4383  ;;  %v3023_v56 = vadd.f32 %v3022_v47, %v3021_v57  ;;  %v3028_v19 = vadd.f32 %v3027_v48, %v3026_v28  ;;  %v3018_v40 = vadd.f32 %v3017_v31, %v3016_v21  ;;  %v4461_v57 = vld [vmem:[#allocation10 + $0x10] sm:$0xff]   ;;  %v4462_v28 = vld [vmem:[#allocation10 + $0x8] sm:$0xff]  }
0x169f   :  { %v3033_v51 = vsel %vm1114_vm2, %v4384_v49, 0.0 }
0x16a0   :  { %v3024_v1 = vrot.slane %v3023_v56, 1  ;;  %v3029_v36 = vrot.slane %v3028_v19, 2  ;;  %v3034_v20 = vrot.slane %v3033_v51, 4  ;;  %4385 = vrcp.f32 %v3018_v40 }
0x16a2   :  { %v3030_v4 = vadd.f32 %v3029_v36, %v3028_v19  ;;  %v3035_v45 = vadd.f32 %v3034_v20, %v3033_v51  ;;  %v3025_v24 = vadd.f32 %v3024_v1, %v3023_v56 }
0x16a4   :  { %v3031_v58 = vrot.slane %v3030_v4, 1  ;;  %v3036_v10 = vrot.slane %v3035_v45, 2  ;;  %4387 = vrcp.f32 %v3025_v24 }
0x16a6   :  { %v3037_v53 = vadd.f32 %v3036_v10, %v3035_v45  ;;  %v3032_v33 = vadd.f32 %v3031_v58, %v3030_v4 }
0x16a8   :  { %v3038_v15 = vrot.slane %v3037_v53, 1  ;;  %4389 = vrcp.f32 %v3032_v33 }
0x16aa   :  { %v3039_v17 = vadd.f32 %v3038_v15, %v3037_v53 }
0x16ac   :  { %4391 = vrcp.f32 %v3039_v17 }
0x16ad   :  { %v4386_v32 = vpop.eup %4385 }
0x16ae   :  { %v3044_v23 = vmul.f32 %v4386_v32, %v4378_v46 }
0x16b0   :  { %v3048_v62 = vadd.f32 1e-08, %v3044_v23 }
0x16b1   :  { %v4388_v26 = vpop.eup %4387 }
0x16b2   :  { %v3052_v22 = vsel %vm1114_vm2, %v3048_v62, 0.0  ;;  %3632 = vst.msk [vmem:[%s5614_s8] sm:$0xff] %vm1114_vm2, %v3048_v62  ;;  %v3045_v37 = vmul.f32 %v4388_v26, %v4380_v61 }
0x16b3   :  { %3053 = vadd.xlane.f32.xlu0 %v3052_v22 }
0x16b4   :  { %v3049_v42 = vadd.f32 1e-08, %v3045_v37 }
0x16b5   :  { %v4390_v6 = vpop.eup %4389 }
0x16b6   :  { %v3055_v13 = vsel %vm1114_vm2, %v3049_v42, 0.0  ;;  %3633 = vst.msk [vmem:[%s5614_s8 + $0x8] sm:$0xff] %vm1114_vm2, %v3049_v42  ;;  %v3046_v55 = vmul.f32 %v4390_v6, %v4382_v34 }
0x16b7   :  { %3056 = vadd.xlane.f32.xlu1 %v3055_v13 }
0x16b8   :  { %v3050_v9 = vadd.f32 1e-08, %v3046_v55 }
0x16b9   :  { %v4392_v52 = vpop.eup %4391 }
0x16ba   :  { %v3058_v60 = vsel %vm1114_vm2, %v3050_v9, 0.0  ;;  %3634 = vst.msk [vmem:[%s5614_s8 + $0x10] sm:$0xff] %vm1114_vm2, %v3050_v9  ;;  %v3047_v7 = vmul.f32 %v4392_v52, %v4384_v49 }
0x16bb   :  { %3059 = vadd.xlane.f32.xlu0 %v3058_v60 }
0x16bc   :  { %v3051_v3 = vadd.f32 1e-08, %v3047_v7 }
0x16be   :  { %v3061_v16 = vsel %vm1114_vm2, %v3051_v3, 0.0  ;;  %3635 = vst.msk [vmem:[%s5614_s8 + $0x18] sm:$0xff] %vm1114_vm2, %v3051_v3  ;;  %s4652_s8 = smov [#allocation14]  }
0x16bf   :  { %3062 = vadd.xlane.f32.xlu1 %v3061_v16 }
0x16d0   :  { %3254 = vrot.lane.b32.xlu1 %v5387_v29, %s4648_s4 }
0x16d1   :  { %3252 = vrot.lane.b32.xlu0 %v5378_v59, %s4648_s4 }
0x16d4   :  { %3256 = vrot.lane.b32.xlu1 %v5390_v14, %s4648_s4  ;;  %v4459_v14 = vld [vmem:[#allocation10 + $0x18] sm:$0xff]  }
0x16d8   :  { %3258 = vrot.lane.b32.xlu1 %v5382_v30, %s4648_s4 }
0x173c   :  { %v3054_v8 = vpop.xlane.xlu0 %3053 }
0x173d   :  { %4393 = vrcp.f32 %v3054_v8 }
0x1740   :  { %v3057_v41 = vpop.xlane.xlu1 %3056 }
0x1741   :  { %4395 = vrcp.f32 %v3057_v41 }
0x1744   :  { %v3060_v0 = vpop.xlane.xlu0 %3059 }
0x1745   :  { %4397 = vrcp.f32 %v3060_v0 }
0x1748   :  { %v3063_v46 = vpop.xlane.xlu1 %3062  ;;  %v5482_v49 = vpop.permute.xlu0 %3252 }
0x1749   :  { %4399 = vrcp.f32 %v3063_v46 }
0x174a   :  { %v4394_v54 = vpop.eup %4393 }
0x174b   :  { %v3065_v35 = vmul.f32 %v4394_v54, %v3048_v62 }
0x174c   :  { %v5480_v31 = vpop.permute.xlu1 %3254 }
0x174d   :  { %v3072_v29 = vpack.c.bf16 %v3065_v35, %v3065_v35 }
0x174e   :  { %v4396_v61 = vpop.eup %4395 }
0x174f   :  { %4122 = vmatmul.mubr.msk.bf16.vlgmr.msra.gmra.mxu0 %vm1114_vm2, %v3072_v29  ;;  %v3067_v59 = vmul.f32 %v4396_v61, %v3049_v42 }
0x1750   :  { %4132 = vmatpush3.bf16.msra.mxu0 %v4990_v43  ;;  %4133 = vmatprep.mubr.msk.bf16.mxu0 %vm4651_vm1, %v4650_v38  ;;  %v5484_v40 = vpop.permute.xlu1 %3256 }
0x1751   :  { %v3073_v30 = vpack.c.bf16 %v3067_v59, %v3067_v59  ;;  %4143 = vmatprep.subr.bf16.mxu0 %v4459_v14 }
0x1752   :  { %v4398_v12 = vpop.eup %4397 }
0x1753   :  { %4128 = vmatmul.mubr.msk.bf16.vlgmr.msra.gmra.mxu1 %vm1114_vm2, %v3073_v30  ;;  %v3069_v63 = vmul.f32 %v4398_v12, %v3050_v9 }
0x1754   :  { %4138 = vmatpush3.bf16.msra.mxu1 %v4998_v11  ;;  %4139 = vmatprep.mubr.msk.bf16.mxu1 %vm4651_vm1, %v4650_v38  ;;  %v4463_v11 = vld [vmem:[#allocation11] sm:$0xff]   ;;  %v5491_v53 = vpop.permute.xlu1 %3258 }
0x1755   :  { %v3074_v25 = vpack.c.bf16 %v3069_v63, %v3069_v63  ;;  %4155 = vmatprep.subr.bf16.mxu1 %v4460_v27  ;;  %v4464_v38 = vld [vmem:[#allocation10] sm:$0xff]  }
0x1756   :  { %v4400_v34 = vpop.eup %4399 }
0x1757   :  { %4134 = vmatmul.mubr.msk.bf16.vlgmr.msra.gmra.mxu0 %vm1114_vm2, %v3074_v25  ;;  %v3071_v43 = vmul.f32 %v4400_v34, %v3051_v3  ;;  %v4465_v3 = vld [vmem:[#allocation13 + $0x9] ss:$0 sm:$0xff] }
0x1758   :  { %4144 = vmatpush3.bf16.msra.mxu0 %v4459_v14 }
0x1759   :  { %v3075_v21 = vpack.c.bf16 %v3071_v43, %v3071_v43  ;;  %4145 = vmatprep.subr.bf16.mxu0 %v4461_v57 }
0x175b   :  { %4140 = vmatmul.mubr.msk.bf16.vlgmr.msra.gmra.mxu1 %vm1114_vm2, %v3075_v21 }
0x175c   :  { %4146 = vmatpush3.bf16.msra.mxu0 %v4461_v57  ;;  %4156 = vmatpush3.bf16.msra.mxu1 %v4460_v27 }
0x175d   :  { %4147 = vmatprep.subr.bf16.mxu0 %v4462_v28  ;;  %4157 = vmatprep.subr.bf16.mxu1 %v4463_v11 }
0x1760   :  { %4148 = vmatpush3.bf16.msra.mxu0 %v4462_v28  ;;  %4158 = vmatpush3.bf16.msra.mxu1 %v4463_v11 }
0x1761   :  { %4149 = vmatprep.subr.bf16.mxu0 %v4464_v38 }
0x1764   :  { %4150 = vmatpush3.bf16.msra.mxu0 %v4464_v38 }
0x180f   :  { %v3113_v47 = vpop.f32.mrf.mxu0 }
0x1810   :  { %v3264_v51 = vsel %vm203_vm0, %v3113_v47, %v5482_v49 }
0x1811   :  { %v4123_v48 = vpop.f32.mrf.mxu0 }
0x1813   :  { %v3116_v56 = vpop.f32.mrf.mxu0  ;;  %v3156_v19 = vpop.f32.mrf.mxu1 }
0x1814   :  { %v3265_v1 = vsel %vm203_vm0, %v3156_v19, %v5480_v31 }
0x1815   :  { %v3268_v36 = vpack.c.bf16 %v3265_v1, %v3264_v51  ;;  %v4124_v20 = vpop.f32.mrf.mxu0  ;;  %v4129_v4 = vpop.f32.mrf.mxu1 }
0x1817   :  { %v3159_v45 = vpop.f32.mrf.mxu1  ;;  %v3199_v24 = vpop.f32.mrf.mxu0  ;;  %4151 = vmatprep.mubr.msk.bf16.mxu0 %vm1453_vm3, %v3268_v36 }
0x1818   :  { %v3266_v17 = vsel %vm203_vm0, %v3199_v24, %v5484_v40 }
0x1819   :  { %v4130_v58 = vpop.f32.mrf.mxu1  ;;  %v4135_v10 = vpop.f32.mrf.mxu0 }
0x181b   :  { %v3202_v33 = vpop.f32.mrf.mxu0  ;;  %v3242_v15 = vpop.f32.mrf.mxu1 }
0x181c   :  { %v3267_v32 = vsel %vm203_vm0, %v3242_v15, %v5491_v53 }
0x181d   :  { %v3269_v23 = vpack.c.bf16 %v3267_v32, %v3266_v17  ;;  %v4136_v62 = vpop.f32.mrf.mxu0  ;;  %v4141_v26 = vpop.f32.mrf.mxu1 }
0x181f   :  { %v3245_v22 = vpop.f32.mrf.mxu1  ;;  %4152 = vmatmul.mubr.msk.bf16.vlgmr.msra.gmra.mxu0 %vm1453_vm3, %v3269_v23 }
0x1821   :  { %v4142_v37 = vpop.f32.mrf.mxu1 }
0x18df   :  { %v5498_v42 = vpop.f32.mrf.mxu0 }
0x18e0   :  { %v3387_v52 = vadd.f32 %v5498_v42, %v5034_v2  ;;  %v3327_v8 = vadd.f32 %v4465_v3, %v5498_v42  ;;  %v3383_v20 = vadd.f32 %v5498_v42, %v5064_v50 }
0x18e1   :  { %v5500_v6 = vpop.f32.mrf.mxu0 }
0x18e2   :  { %v3385_v13 = vadd.f32 %v5500_v6, %v5034_v2  ;;  %v3325_v16 = vadd.f32 %v4465_v3, %v5500_v6  ;;  %v3751_v46 = vmul.f32 -1.442695, %v3327_v8  ;;  %v3381_v51 = vadd.f32 %v5500_v6, %v5064_v50 }
0x18e3   :  { %v5504_v55 = vpop.f32.mrf.mxu0  ;;  %v3353_v22 = vadd.f32 %v5500_v6, %v5078_v18 }
0x18e4   :  { %3393 = vrot.lane.b32.xlu0 %v3385_v13, %s4648_s4  ;;  %v3388_v7 = vadd.f32 %v5504_v55, %v5034_v2  ;;  %v3749_v41 = vmul.f32 -1.442695, %v3325_v16  ;;  %v3328_v54 = vadd.f32 %v4465_v3, %v5504_v55  ;;  %v3384_v33 = vadd.f32 %v5504_v55, %v5064_v50 }
0x18e5   :  { %v5507_v9 = vpop.f32.mrf.mxu0  ;;  %v3753_v37 = vmul.f32 -1.442695, %v3353_v22 }
0x18e6   :  { %v3386_v60 = vadd.f32 %v5507_v9, %v5034_v2  ;;  %v3326_v0 = vadd.f32 %v4465_v3, %v5507_v9  ;;  %4401 = vpow2.f32 %v3749_v41  ;;  %v3752_v29 = vmul.f32 -1.442695, %v3328_v54 }
0x18e7   :  { %4403 = vpow2.f32 %v3751_v46  ;;  %v3382_v4 = vadd.f32 %v5507_v9, %v5064_v50  ;;  %v3355_v50 = vadd.f32 %v5498_v42, %v5078_v18  ;;  %v3354_v13 = vadd.f32 %v5507_v9, %v5078_v18 }
0x18e8   :  { %3397 = vrot.lane.b32.xlu0 %v3387_v52, %s4648_s4  ;;  %3395 = vrot.lane.b32.xlu1 %v3386_v60, %s4648_s4  ;;  %v3750_v35 = vmul.f32 -1.442695, %v3326_v0  ;;  %v3356_v60 = vadd.f32 %v5504_v55, %v5078_v18 }
0x18e9   :  { %v3755_v52 = vmul.f32 -1.442695, %v3355_v50 }
0x18ea   :  { %4405 = vpow2.f32 %v3750_v35  ;;  %v3756_v3 = vmul.f32 -1.442695, %v3356_v60 }
0x18eb   :  { %4407 = vpow2.f32 %v3752_v29 }
0x18ec   :  { %3399 = vrot.lane.b32.xlu1 %v3388_v7, %s4648_s4  ;;  %v3754_v7 = vmul.f32 -1.442695, %v3354_v13 }
0x18f3   :  { %v4402_v2 = vpop.eup %4401 }
0x18f4   :  { %v4404_v61 = vpop.eup %4403  ;;  %v3341_v59 = vadd.f32 1.0, %v4402_v2 }
0x18f5   :  { %v3343_v14 = vadd.f32 1.0, %v4404_v61 }
0x18f6   :  { %4409 = vrcp.f32 %v3341_v59 }
0x18f7   :  { %v4406_v30 = vpop.eup %4405  ;;  %4411 = vrcp.f32 %v3343_v14 }
0x18f8   :  { %v3342_v12 = vadd.f32 1.0, %v4406_v30  ;;  %v4408_v63 = vpop.eup %4407 }
0x18f9   :  { %v3344_v25 = vadd.f32 1.0, %v4408_v63 }
0x18fa   :  { %4413 = vrcp.f32 %v3342_v12 }
0x18fb   :  { %4415 = vrcp.f32 %v3344_v25 }
0x1903   :  { %v4410_v27 = vpop.eup %4409 }
0x1904   :  { %v4412_v21 = vpop.eup %4411 }
0x1907   :  { %v4414_v57 = vpop.eup %4413 }
0x1908   :  { %v4416_v48 = vpop.eup %4415 }
0x1956   :  { %v3394_v34 = vpop.permute.xlu0 %3393 }
0x1957   :  { %v3405_v43 = vmul.f32 %v4410_v27, %v3394_v34 }
0x1959   :  { %3413 = vrot.lane.b32.xlu0 %v3405_v43, %s4642_s17 }
0x195a   :  { %v3398_v28 = vpop.permute.xlu0 %3397  ;;  %v3396_v11 = vpop.permute.xlu1 %3395 }
0x195b   :  { %v3407_v38 = vmul.f32 %v4412_v21, %v3398_v28  ;;  %v3406_v47 = vmul.f32 %v4414_v57, %v3396_v11 }
0x195d   :  { %3417 = vrot.lane.b32.xlu0 %v3407_v38, %s4642_s17  ;;  %3415 = vrot.lane.b32.xlu1 %v3406_v47, %s4642_s17 }
0x195e   :  { %v3400_v56 = vpop.permute.xlu1 %3399 }
0x195f   :  { %v3408_v19 = vmul.f32 %v4416_v48, %v3400_v56 }
0x1961   :  { %3419 = vrot.lane.b32.xlu1 %v3408_v19, %s4642_s17  ;;  %s3641_s17 = sshll.u32 %s4652_s8, 4  ;;  %s3642_s17 = int_to_ptr.vmem [resolvable:$true] %s3641_s17 }
0x1962   :  { %s4607_s26 = scalar_lea.vmem %s3642_s17, 512  ;;  %p4612_p8 = scmp.lt.s32.totalorder %s3642_s17, %s3642_s17 }
0x1963   :  { %p4608_p7 = scmp.ne.s32.totalorder %s3642_s17, %s4607_s26  ;;  %p4613_p9 = scmp.lt.s32.totalorder %s4607_s26, %s4607_s26 }
0x1965   :  { %p4614_p10 = por %p4613_p9, %p4612_p8 }
0x1967   :  { %p4615_p11 = pnand %p4614_p10, %p4608_p7 }
0x19cb   :  { %v3414_v1 = vpop.permute.xlu0 %3413 }
0x19cc   :  { %v3425_v36 = vadd.f32 %v3414_v1, %v3381_v51 }
0x19ce   :  { %4417 = vtanh.f32 %v3425_v36 }
0x19cf   :  { %v3418_v45 = vpop.permute.xlu0 %3417  ;;  %v3416_v24 = vpop.permute.xlu1 %3415 }
0x19d0   :  { %v3427_v58 = vadd.f32 %v3418_v45, %v3383_v20  ;;  %v3426_v10 = vadd.f32 %v3416_v24, %v3382_v4 }
0x19d2   :  { %4419 = vtanh.f32 %v3427_v58 }
0x19d3   :  { %4421 = vtanh.f32 %v3426_v10  ;;  %v3420_v15 = vpop.permute.xlu1 %3419 }
0x19d4   :  { %v3428_v17 = vadd.f32 %v3420_v15, %v3384_v33 }
0x19d6   :  { %4423 = vtanh.f32 %v3428_v17 }
0x19d7   :  { %4425 = vpow2.f32 %v3753_v37 }
0x19d8   :  { %4427 = vpow2.f32 %v3755_v52 }
0x19d9   :  { %4429 = vpow2.f32 %v3754_v7 }
0x19da   :  { %4431 = vpow2.f32 %v3756_v3 }
0x19db   :  { %v4418_v32 = vpop.eup %4417 }
0x19dc   :  { %3441 = vrot.lane.b32.xlu0 %v4418_v32, %s4649_s6 }
0x19df   :  { %v4420_v23 = vpop.eup %4419 }
0x19e0   :  { %v4422_v62 = vpop.eup %4421  ;;  %3445 = vrot.lane.b32.xlu0 %v4420_v23, %s4649_s6 }
0x19e1   :  { %3443 = vrot.lane.b32.xlu1 %v4422_v62, %s4649_s6 }
0x19e3   :  { %v4424_v26 = vpop.eup %4423 }
0x19e4   :  { %v4426_v16 = vpop.eup %4425 }
0x19e5   :  { %3447 = vrot.lane.b32.xlu1 %v4424_v26, %s4649_s6  ;;  %v3369_v8 = vadd.f32 1.0, %v4426_v16  ;;  %v4428_v6 = vpop.eup %4427 }
0x19e6   :  { %v4430_v41 = vpop.eup %4429  ;;  %v3371_v0 = vadd.f32 1.0, %v4428_v6 }
0x19e7   :  { %4433 = vrcp.f32 %v3369_v8  ;;  %v3370_v42 = vadd.f32 1.0, %v4430_v41  ;;  %v4432_v46 = vpop.eup %4431 }
0x19e8   :  { %4435 = vrcp.f32 %v3371_v0  ;;  %v3372_v9 = vadd.f32 1.0, %v4432_v46 }
0x19e9   :  { %4437 = vrcp.f32 %v3370_v42 }
0x19ea   :  { %4439 = vrcp.f32 %v3372_v9 }
0x19f4   :  { %v4434_v54 = vpop.eup %4433 }
0x19f5   :  { %v3433_v35 = vsub.f32 1.0, %v4434_v54  ;;  %v4436_v18 = vpop.eup %4435  ;;  %v3457_v2 = vmul.f32 %v4434_v54, %v5482_v49 }
0x19f6   :  { %v4438_v29 = vpop.eup %4437  ;;  %v3435_v30 = vsub.f32 1.0, %v4436_v18  ;;  %v3459_v25 = vmul.f32 %v4436_v18, %v5484_v40 }
0x19f7   :  { %v3434_v12 = vsub.f32 1.0, %v4438_v29  ;;  %v4440_v63 = vpop.eup %4439  ;;  %v3458_v43 = vmul.f32 %v4438_v29, %v5480_v31 }
0x19f8   :  { %v3436_v11 = vsub.f32 1.0, %v4440_v63  ;;  %v3460_v49 = vmul.f32 %v4440_v63, %v5491_v53 }
0x1a4e   :  { %v3442_v55 = vpop.permute.xlu0 %3441 }
0x1a4f   :  { %v3453_v61 = vmul.f32 %v3442_v55, %v3433_v35 }
0x1a51   :  { %v3461_v59 = vadd.f32 %v3457_v2, %v3453_v61 }
0x1a52   :  { %v3446_v14 = vpop.permute.xlu0 %3445 }
0x1a53   :  { %v3455_v27 = vmul.f32 %v3446_v14, %v3435_v30  ;;  %v3444_v34 = vpop.permute.xlu1 %3443  ;;  %3469 = vrot.lane.b32.xlu0 %v3461_v59, %s4649_s6 }
0x1a54   :  { %v3454_v21 = vmul.f32 %v3444_v34, %v3434_v12 }
0x1a55   :  { %v3463_v57 = vadd.f32 %v3459_v25, %v3455_v27 }
0x1a56   :  { %v3462_v28 = vadd.f32 %v3458_v43, %v3454_v21 }
0x1a57   :  { %v3448_v38 = vpop.permute.xlu1 %3447  ;;  %3473 = vrot.lane.b32.xlu0 %v3463_v57, %s4649_s6 }
0x1a58   :  { %v3456_v47 = vmul.f32 %v3448_v38, %v3436_v11  ;;  %3471 = vrot.lane.b32.xlu1 %v3462_v28, %s4649_s6 }
0x1a5a   :  { %v3464_v48 = vadd.f32 %v3460_v49, %v3456_v47 }
0x1a5c   :  { %3475 = vrot.lane.b32.xlu1 %v3464_v48, %s4649_s6 }
0x1ac5   :  { %v5554_v40 = vpop.permute.xlu0 %3469 }
0x1ac6   :  { %v3481_v31 = vsel %vm203_vm0, %v5554_v40, 0.0 }
0x1ac7   :  { %3482 = vadd.xlane.f32.xlu0 %v3481_v31 }
0x1ac9   :  { %v5558_v56 = vpop.permute.xlu0 %3473 }
0x1aca   :  { %v5560_v19 = vpop.permute.xlu1 %3471  ;;  %v3487_v51 = vsel %vm203_vm0, %v5558_v56, 0.0 }
0x1acb   :  { %3488 = vadd.xlane.f32.xlu0 %v3487_v51  ;;  %v3484_v53 = vsel %vm203_vm0, %v5560_v19, 0.0 }
0x1acc   :  { %3485 = vadd.xlane.f32.xlu1 %v3484_v53 }
0x1ace   :  { %v5566_v1 = vpop.permute.xlu1 %3475 }
0x1acf   :  { %v3490_v36 = vsel %vm203_vm0, %v5566_v1, 0.0 }
0x1ad0   :  { %3491 = vadd.xlane.f32.xlu0 %v3490_v36 }
0x1b50   :  { %v3483_v20 = vpop.xlane.xlu0 %3482 }
0x1b51   :  { %v3493_v4 = vmul.f32 0.03125, %v3483_v20 }
0x1b53   :  { %v3497_v45 = vsub.f32 %v3461_v59, %v3493_v4 }
0x1b54   :  { %v3489_v24 = vpop.xlane.xlu0 %3488 }
0x1b55   :  { %v3501_v58 = vmul.f32 %v3497_v45, %v3497_v45  ;;  %v3495_v10 = vmul.f32 0.03125, %v3489_v24  ;;  %v3486_v33 = vpop.xlane.xlu1 %3485 }
0x1b56   :  { %v3494_v15 = vmul.f32 0.03125, %v3486_v33 }
0x1b57   :  { %v3499_v17 = vsub.f32 %v3463_v57, %v3495_v10  ;;  %3509 = vrot.lane.b32.xlu0 %v3501_v58, %s4649_s6  ;;  %v4466_v10 = vld [vmem:[#allocation13 + $0xd] ss:$0 sm:$0xff] }
0x1b58   :  { %v3498_v23 = vsub.f32 %v3462_v28, %v3494_v15 }
0x1b59   :  { %v3503_v32 = vmul.f32 %v3499_v17, %v3499_v17  ;;  %v3492_v62 = vpop.xlane.xlu0 %3491 }
0x1b5a   :  { %v3496_v26 = vmul.f32 0.03125, %v3492_v62  ;;  %v3502_v22 = vmul.f32 %v3498_v23, %v3498_v23 }
0x1b5b   :  { %3513 = vrot.lane.b32.xlu1 %v3503_v32, %s4649_s6 }
0x1b5c   :  { %v3500_v50 = vsub.f32 %v3464_v48, %v3496_v26 }
0x1b5e   :  { %v3504_v37 = vmul.f32 %v3500_v50, %v3500_v50 }
0x1b5f   :  { %3511 = vrot.lane.b32.xlu1 %v3502_v22, %s4649_s6 }
0x1b63   :  { %3515 = vrot.lane.b32.xlu1 %v3504_v37, %s4649_s6 }
0x1bc9   :  { %v3510_v13 = vpop.permute.xlu0 %3509 }
0x1bca   :  { %v3521_v52 = vsel %vm203_vm0, %v3510_v13, 0.0 }
0x1bcb   :  { %3522 = vadd.xlane.f32.xlu0 %v3521_v52 }
0x1bcd   :  { %v3514_v60 = vpop.permute.xlu1 %3513 }
0x1bce   :  { %v3527_v7 = vsel %vm203_vm0, %v3514_v60, 0.0 }
0x1bcf   :  { %3528 = vadd.xlane.f32.xlu0 %v3527_v7 }
0x1bd1   :  { %v3512_v3 = vpop.permute.xlu1 %3511 }
0x1bd2   :  { %v3524_v16 = vsel %vm203_vm0, %v3512_v3, 0.0 }
0x1bd3   :  { %3525 = vadd.xlane.f32.xlu1 %v3524_v16 }
0x1bd5   :  { %v3516_v8 = vpop.permute.xlu1 %3515 }
0x1bd6   :  { %v3530_v6 = vsel %vm203_vm0, %v3516_v8, 0.0 }
0x1bd7   :  { %3531 = vadd.xlane.f32.xlu0 %v3530_v6 }
0x1c54   :  { %v3523_v41 = vpop.xlane.xlu0 %3522 }
0x1c55   :  { %v3533_v0 = vmul.f32 0.03125, %v3523_v41 }
0x1c57   :  { %v3537_v42 = vadd.f32 1e-05, %v3533_v0 }
0x1c58   :  { %v3529_v46 = vpop.xlane.xlu0 %3528 }
0x1c59   :  { %v3535_v9 = vmul.f32 0.03125, %v3529_v46  ;;  %4441 = vrsqrt.f32 %v3537_v42 }
0x1c5b   :  { %v3539_v54 = vadd.f32 1e-05, %v3535_v9 }
0x1c5c   :  { %v3526_v35 = vpop.xlane.xlu1 %3525 }
0x1c5d   :  { %v3534_v18 = vmul.f32 0.03125, %v3526_v35  ;;  %4443 = vrsqrt.f32 %v3539_v54 }
0x1c5f   :  { %v3538_v55 = vadd.f32 1e-05, %v3534_v18 }
0x1c60   :  { %v3532_v29 = vpop.xlane.xlu0 %3531 }
0x1c61   :  { %4445 = vrsqrt.f32 %v3538_v55  ;;  %v3536_v2 = vmul.f32 0.03125, %v3532_v29 }
0x1c63   :  { %v3540_v61 = vadd.f32 1e-05, %v3536_v2 }
0x1c65   :  { %4447 = vrsqrt.f32 %v3540_v61 }
0x1c66   :  { %v4442_v59 = vpop.eup %4441 }
0x1c67   :  { %v3545_v30 = vmul.f32 %v4442_v59, %v3497_v45 }
0x1c69   :  { %v3549_v25 = vmul.f32 %v3545_v30, %v5135_v5 }
0x1c6a   :  { %v4444_v14 = vpop.eup %4443 }
0x1c6b   :  { %v3547_v27 = vmul.f32 %v4444_v14, %v3499_v17  ;;  %v3553_v21 = vadd.f32 %v3549_v25, %v5139_v44 }
0x1c6d   :  { %v3551_v11 = vmul.f32 %v3547_v27, %v5135_v5 }
0x1c6e   :  { %v4446_v12 = vpop.eup %4445 }
0x1c6f   :  { %v3546_v63 = vmul.f32 %v4446_v12, %v3498_v23  ;;  %v3555_v47 = vadd.f32 %v3551_v11, %v5139_v44 }
0x1c71   :  { %v3550_v34 = vmul.f32 %v3546_v63, %v5135_v5 }
0x1c72   :  { %v4448_v43 = vpop.eup %4447 }
0x1c73   :  { %v3554_v57 = vadd.f32 %v3550_v34, %v5139_v44  ;;  %v3548_v28 = vmul.f32 %v4448_v43, %v3500_v50 }
0x1c75   :  { %v3557_v38 = vpack.c.bf16 %v3554_v57, %v3553_v21  ;;  %v3552_v49 = vmul.f32 %v3548_v28, %v5135_v5 }
0x1c77   :  { %3561 = vrot.lane.b32.xlu0 %v3557_v38, %s4649_s6  ;;  %v3556_v48 = vadd.f32 %v3552_v49, %v5139_v44 }
0x1c79   :  { %v3558_v31 = vpack.c.bf16 %v3556_v48, %v3555_v47 }
0x1c7b   :  { %3563 = vrot.lane.b32.xlu1 %v3558_v31, %s4649_s6 }
0x1ce9   :  { %v3562_v51 = vpop.permute.xlu0 %3561 }
0x1cea   :  { %4159 = vmatprep.mubr.msk.bf16.mxu1 %vm203_vm0, %v3562_v51 }
0x1ced   :  { %v3564_v53 = vpop.permute.xlu1 %3563 }
0x1cee   :  { %4160 = vmatmul.mubr.msk.bf16.vlgmr.msra.gmra.mxu1 %vm203_vm0, %v3564_v53 }
0x1dae   :  { %v4161_v36 = vpop.f32.mrf.mxu1 }
0x1daf   :  { %v3614_v20 = vadd.f32 %v5372_v39, %v4161_v36 }
0x1db0   :  { %v3605_v4 = vpop.f32.mrf.mxu1 }
0x1db1   :  { %v3622_v5 = vmax.f32 %v3614_v20, 0.0  ;;  %v3606_v45 = vadd.f32 %v5372_v39, %v3605_v4 }
0x1db2   :  { %v4162_v24 = vpop.f32.mrf.mxu1 }
0x1db3   :  { %v3626_v58 = vadd.f32 %v3622_v5, %v5558_v56  ;;  %v3620_v44 = vmax.f32 %v3606_v45, 0.0  ;;  %v3617_v33 = vadd.f32 %v4466_v10, %v4162_v24 }
0x1db4   :  { %v3608_v15 = vpop.f32.mrf.mxu1 }
0x1db5   :  { %3630 = vst.msk [vmem:[#allocation14 + $0x10] sm:$0xff] %vm203_vm0, %v3626_v58  ;;  %v3624_v17 = vadd.f32 %v3620_v44, %v5554_v40  ;;  %v3623_v32 = vmax.f32 %v3617_v33, 0.0  ;;  %v3609_v23 = vadd.f32 %v4466_v10, %v3608_v15 }
0x1db7   :  { %3628 = vst.msk [vmem:[#allocation14] sm:$0xff] %vm203_vm0, %v3624_v17  ;;  %v3627_v62 = vadd.f32 %v3623_v32, %v5566_v1  ;;  %v3621_v39 = vmax.f32 %v3609_v23, 0.0 }
0x1db9   :  { %3631 = vst.msk [vmem:[#allocation14 + $0x18] sm:$0xff] %vm203_vm0, %v3627_v62  ;;  %v3625_v56 = vadd.f32 %v3621_v39, %v5560_v19 }
0x1dbb   :  { %3629 = vst.msk [vmem:[#allocation14 + $0x8] sm:$0xff] %vm203_vm0, %v3625_v56 }
0x1dbc   :  { %4618 = shalt.err (!%p4615_p11)
}
0x1dbd   :  { %3647 = dma.vmem_to_hbm [thread:$0]  %s3642_s17, 512, %s5613_s7, [#allocation4], %s4638_s30, %s4638_s30, %s4639_s9  }
0x1dbe   :  { %4635 = dma.done.wait [#allocation4], 512  }
0x1dbf   :  { %4636 = vsyncadd [#allocation4], 4294966784 }
0x1dc0   :  { %3655 = vsyncpa [#allocation3], 1 }
0x1dc1   :  { %3656 = vsyncpa [#allocation6], 1 }
0x1dc2   :  { %3657 = vsyncpa [#allocation9], 1 }
0x1dc3   :  { %3658 = vsyncpa [#allocation12], 1 }
0x1dc4   :  { %3659 = vsyncpa [#allocation4], 1 }

</bundles_post_ra>
